<compile_context>
chip_gen: v7x
topology: tpu7x:2x2x1
jax: 0.10.0
libtpu: 0.0.40
codegen_flags: <defaults>
</compile_context>

<pallas_src>
import jax
import jax.numpy as jnp
import numpy as np
from jax import lax
from jax.experimental import pallas as pl
from jax.experimental.pallas import tpu as pltpu

TB = 8  # images processed per grid step


# ----------------------------- Pallas kernel ------------------------------- #
def _fused_forward_kernel(
    x_ref,     # (TB, 28, 28)  f32   TB images
    a1_ref,    # (140, 240)    bf16  conv1 folded band matrix
    c1b_ref,   # (1, 240)      f32   conv1 bias tiled over width
    rc1_ref,   # (TB*12,TB*24) bf16  even-row compaction (block diagonal)
    cc1_ref,   # (240, 120)    bf16  even-column-group compaction
    a2_ref,    # (600, 160)    bf16  conv2 folded band matrix
    c2b_ref,   # (1, 160)      f32
    rc2_ref,   # (TB*4, TB*8)  bf16
    cc2_ref,   # (160, 80)     bf16
    w1_ref,    # (320, 50)     bf16  fc1 (feature-reordered)
    fb1_ref,   # (1, 50)       f32
    w2_ref,    # (50, 128)     bf16  fc2, zero-padded to 128 lanes
    fb2_ref,   # (1, 128)      f32   zero-padded
    out_ref,   # (TB, 128)     f32   logits in lanes 0..9
):
    f32 = jnp.float32
    bf16 = jnp.bfloat16

    def shift_rows(a, k):
        # result[i] = a[i + k]; wrapped tail rows are unused garbage.
        return jnp.concatenate([a[k:, :], a[:k, :]], axis=0)

    def shift_lanes(a, k):
        return jnp.concatenate([a[:, k:], a[:, :k]], axis=1)

    def pool2x2_relu(y, rc, cc, ch):
        # y: f32, per-image rows are consecutive, lane index = w*ch + c.
        t = jnp.maximum(y, shift_rows(y, 1))      # row-pair max (valid @ even rows)
        t = jnp.maximum(t, shift_lanes(t, ch))    # col-group-pair max (valid @ even groups)
        t = jnp.maximum(t, 0.0).astype(bf16)      # ReLU, single bf16 cast
        z = jnp.dot(rc, t, preferred_element_type=f32).astype(bf16)   # exact row pick
        return jnp.dot(z, cc, preferred_element_type=f32)             # exact col pick

    x = x_ref[...]                                # load the TB images once

    # ---- conv1: one folded-K GEMM (TB*24, 140) @ (140, 240) ----
    l1 = jnp.concatenate(
        [jnp.concatenate([x[b, di:di + 24, :] for di in range(5)], axis=-1)
         for b in range(TB)], axis=0)             # (TB*24, 140)
    y1 = jnp.dot(l1.astype(bf16), a1_ref[...],
                 preferred_element_type=f32) + c1b_ref[...]           # (TB*24, 240)
    z1 = pool2x2_relu(y1, rc1_ref[...], cc1_ref[...], 10)             # (TB*12, 120)

    # ---- conv2 (Dropout2d = identity at inference): (TB*8, 600) @ (600, 160) ----
    l2 = jnp.concatenate(
        [jnp.concatenate([z1[12 * b + di:12 * b + di + 8, :] for di in range(5)],
                         axis=-1)
         for b in range(TB)], axis=0)             # (TB*8, 600)
    y2 = jnp.dot(l2.astype(bf16), a2_ref[...],
                 preferred_element_type=f32) + c2b_ref[...]           # (TB*8, 160)
    z2 = pool2x2_relu(y2, rc2_ref[...], cc2_ref[...], 20)             # (TB*4, 80)

    # ---- fc1 / fc2 with the batch folded into the GEMM M dimension ----
    feat = jnp.concatenate(
        [jnp.concatenate([z2[4 * b + i:4 * b + i + 1, :] for i in range(4)], axis=-1)
         for b in range(TB)], axis=0)             # (TB, 320)
    h = jnp.dot(feat.astype(bf16), w1_ref[...],
                preferred_element_type=f32) + fb1_ref[...]
    h = jnp.maximum(h, 0.0)                       # (TB, 50); F.dropout(eval) = identity
    out_ref[...] = jnp.dot(h.astype(bf16), w2_ref[...],
                           preferred_element_type=f32) + fb2_ref[...]  # (TB, 128)


# --------------------------- pallas_call wrapper ---------------------------- #
def _resident_spec(shape):
    zeros = (0,) * len(shape)
    return pl.BlockSpec(shape, lambda i, _z=zeros: _z)


def mnist_forward(x_nchw, packed):
    n = x_nchw.shape[0]
    n_pad = ((n + TB - 1) // TB) * TB
    x3 = x_nchw.reshape(n, 28, 28).astype(jnp.float32)
    if n_pad != n:
        x3 = jnp.pad(x3, ((0, n_pad - n), (0, 0), (0, 0)))

    operands = (
        x3,
        packed["a1"], packed["c1b"], packed["rc1"], packed["cc1"],
        packed["a2"], packed["c2b"], packed["rc2"], packed["cc2"],
        packed["w1"], packed["fb1"], packed["w2"], packed["fb2"],
    )
    in_specs = [pl.BlockSpec((TB, 28, 28), lambda i: (i, 0, 0))]
    in_specs += [_resident_spec(op.shape) for op in operands[1:]]

    logits_pad = pl.pallas_call(
        _fused_forward_kernel,
        out_shape=jax.ShapeDtypeStruct((n_pad, 128), jnp.float32),
        grid_spec=pltpu.PrefetchScalarGridSpec(
            num_scalar_prefetch=0,
            grid=(n_pad // TB,),
            in_specs=in_specs,
            out_specs=pl.BlockSpec((TB, 128), lambda i: (i, 0)),
        ),
        compiler_params=pltpu.CompilerParams(
            dimension_semantics=("parallel",),
        ),
    )(*operands)

    logits = logits_pad[:n, :10]
    # F.log_softmax(dim=0) normalizes over the BATCH axis (module quirk);
    # it is a tiny whole-batch op -> plain JAX, no second Pallas launch.
    return jax.nn.log_softmax(logits, axis=0)


# ------------------------ host-side weight packing --------------------------- #
def prepare_params(params):
    """Pack PyTorch-layout weights into folded-band / selection matrices."""
    f = lambda a: np.asarray(a, dtype=np.float32)
    c1w, c1b = f(params["conv1_w"]), f(params["conv1_b"])
    c2w, c2b = f(params["conv2_w"]), f(params["conv2_b"])
    f1w, f1b = f(params["fc1_w"]), f(params["fc1_b"])
    f2w, f2b = f(params["fc2_w"]), f(params["fc2_b"])

    def folded_band(w, wo):
        # w: (CO, CI, KH, KW) -> (KH*W_in*CI, wo*CO) with
        # A[di*W_in*CI + win*CI + ci, j*CO + co] = w[co, ci, di, win - j]
        co_n, ci_n, kh, kw = w.shape
        wi = wo + kw - 1
        a = np.zeros((kh, wi * ci_n, wo * co_n), np.float32)
        for di in range(kh):
            for dj in range(kw):
                for j in range(wo):
                    a[di, (j + dj) * ci_n:(j + dj + 1) * ci_n,
                      j * co_n:(j + 1) * co_n] = w[:, :, di, dj].T
        return a.reshape(kh * wi * ci_n, wo * co_n)

    def row_compact(rows_out, rows_in):
        # block-diagonal even-row selector for TB stacked images
        m = np.zeros((TB * rows_out, TB * rows_in), np.float32)
        for b in range(TB):
            for p in range(rows_out):
                m[b * rows_out + p, b * rows_in + 2 * p] = 1.0
        return m

    def col_compact(groups_in, ch):
        m = np.zeros((groups_in * ch, (groups_in // 2) * ch), np.float32)
        for q in range(groups_in // 2):
            for c in range(ch):
                m[(2 * q) * ch + c, q * ch + c] = 1.0
        return m

    # fc1 repacked for the kernel's feature order p*80 + q*20 + c
    # (torch x.view(-1, 320) order is c*16 + p*4 + q).
    w1p = np.zeros((320, 50), np.float32)
    for p in range(4):
        for q in range(4):
            for c in range(20):
                w1p[p * 80 + q * 20 + c, :] = f1w[:, c * 16 + p * 4 + q]

    # fc2 zero-padded to 128 output lanes for an unmasked, lane-dense store.
    w2p = np.zeros((50, 128), np.float32)
    w2p[:, :10] = f2w.T
    fb2p = np.zeros((1, 128), np.float32)
    fb2p[0, :10] = f2b

    bf = jnp.bfloat16
    return {
        "a1": jnp.asarray(folded_band(c1w, 24), bf),
        "c1b": jnp.asarray(np.tile(c1b, 24)[None, :], jnp.float32),
        "rc1": jnp.asarray(row_compact(12, 24), bf),
        "cc1": jnp.asarray(col_compact(24, 10), bf),
        "a2": jnp.asarray(folded_band(c2w, 8), bf),
        "c2b": jnp.asarray(np.tile(c2b, 8)[None, :], jnp.float32),
        "rc2": jnp.asarray(row_compact(4, 8), bf),
        "cc2": jnp.asarray(col_compact(8, 20), bf),
        "w1": jnp.asarray(w1p, bf),
        "fb1": jnp.asarray(f1b[None, :], jnp.float32),
        "w2": jnp.asarray(w2p, bf),
        "fb2": jnp.asarray(fb2p, jnp.float32),
    }


# ------------------------- pure-JAX reference (check) ------------------------ #
def mnist_reference(x_nchw, params):
    n = x_nchw.shape[0]
    hi = lax.Precision.HIGHEST
    dn = ("NCHW", "OIHW", "NCHW")
    x = x_nchw.astype(jnp.float32)

    y1 = lax.conv_general_dilated(x, params["conv1_w"], (1, 1), "VALID",
                                  dimension_numbers=dn, precision=hi)
    y1 = y1 + params["conv1_b"][None, :, None, None]
    z1 = jnp.maximum(y1.reshape(n, 10, 12, 2, 12, 2).max(axis=(3, 5)), 0.0)

    y2 = lax.conv_general_dilated(z1, params["conv2_w"], (1, 1), "VALID",
                                  dimension_numbers=dn, precision=hi)
    y2 = y2 + params["conv2_b"][None, :, None, None]
    z2 = jnp.maximum(y2.reshape(n, 20, 4, 2, 4, 2).max(axis=(3, 5)), 0.0)

    feat = z2.reshape(n, 320)
    h = jnp.maximum(jnp.dot(feat, params["fc1_w"].T, precision=hi)
                    + params["fc1_b"], 0.0)
    logits = jnp.dot(h, params["fc2_w"].T, precision=hi) + params["fc2_b"]
    return jax.nn.log_softmax(logits, axis=0)


# ------------------------------ parameter init ------------------------------- #
def init_params(key):
    ks = jax.random.split(key, 8)

    def uniform(k, shape, fan_in):
        bound = 1.0 / float(np.sqrt(fan_in))
        return jax.random.uniform(k, shape, jnp.float32, -bound, bound)

    return {
        "conv1_w": uniform(ks[0], (10, 1, 5, 5), 1 * 5 * 5),
        "conv1_b": uniform(ks[1], (10,), 1 * 5 * 5),
        "conv2_w": uniform(ks[2], (20, 10, 5, 5), 10 * 5 * 5),
        "conv2_b": uniform(ks[3], (20,), 10 * 5 * 5),
        "fc1_w": uniform(ks[4], (50, 320), 320),
        "fc1_b": uniform(ks[5], (50,), 320),
        "fc2_w": uniform(ks[6], (10, 50), 50),
        "fc2_b": uniform(ks[7], (10,), 50),
    }


if __name__ == "__main__":
    key = jax.random.PRNGKey(0)
    pkey, xkey = jax.random.split(key)
    params = init_params(pkey)
    # Spatial size must be 28x28 so the 320-feature flatten is consistent;
    # batch 16 -> grid of 2 parallel steps (feeds both v7x TensorCores).
    x = jax.random.normal(xkey, (16, 1, 28, 28), jnp.float32)

    packed = prepare_params(params)
    fwd = jax.jit(mnist_forward)
    out = jax.block_until_ready(fwd(x, packed))

    ref = mnist_reference(x, params)
    np.testing.assert_allclose(np.asarray(out), np.asarray(ref),
                               rtol=2e-2, atol=2e-2)

    print("KERNEL_OK")
</pallas_src>

<mosaic_0001>
module attributes {stable_mosaic.version = 11 : i64} {
  func.func @_fused_forward_kernel(%arg0: i32, %arg1: memref<8x28x28xf32, #tpu.memory_space<vmem>>, %arg2: memref<140x240xbf16, #tpu.memory_space<vmem>>, %arg3: memref<1x240xf32, #tpu.memory_space<vmem>>, %arg4: memref<96x192xbf16, #tpu.memory_space<vmem>>, %arg5: memref<240x120xbf16, #tpu.memory_space<vmem>>, %arg6: memref<600x160xbf16, #tpu.memory_space<vmem>>, %arg7: memref<1x160xf32, #tpu.memory_space<vmem>>, %arg8: memref<32x64xbf16, #tpu.memory_space<vmem>>, %arg9: memref<160x80xbf16, #tpu.memory_space<vmem>>, %arg10: memref<320x50xbf16, #tpu.memory_space<vmem>>, %arg11: memref<1x50xf32, #tpu.memory_space<vmem>>, %arg12: memref<50x128xbf16, #tpu.memory_space<vmem>>, %arg13: memref<1x128xf32, #tpu.memory_space<vmem>>, %arg14: memref<8x128xf32, #tpu.memory_space<vmem>>) attributes {dimension_semantics = [#tpu.dimension_semantics<parallel>], iteration_bounds = array<i64: 2>, scalar_prefetch = 0 : i64, scratch_operands = 0 : i64, tpu.core_type = #tpu.core_type<tc>, window_params = [{transform_indices = @transform_0, window_bounds = array<i64: 8, 28, 28>}, {pipeline_mode = #tpu.pipeline_mode<synchronous>, transform_indices = @transform_1, window_bounds = array<i64: 140, 240>}, {pipeline_mode = #tpu.pipeline_mode<synchronous>, transform_indices = @transform_2, window_bounds = array<i64: 1, 240>}, {pipeline_mode = #tpu.pipeline_mode<synchronous>, transform_indices = @transform_3, window_bounds = array<i64: 96, 192>}, {pipeline_mode = #tpu.pipeline_mode<synchronous>, transform_indices = @transform_4, window_bounds = array<i64: 240, 120>}, {pipeline_mode = #tpu.pipeline_mode<synchronous>, transform_indices = @transform_5, window_bounds = array<i64: 600, 160>}, {pipeline_mode = #tpu.pipeline_mode<synchronous>, transform_indices = @transform_6, window_bounds = array<i64: 1, 160>}, {pipeline_mode = #tpu.pipeline_mode<synchronous>, transform_indices = @transform_7, window_bounds = array<i64: 32, 64>}, {pipeline_mode = #tpu.pipeline_mode<synchronous>, transform_indices = @transform_8, window_bounds = array<i64: 160, 80>}, {pipeline_mode = #tpu.pipeline_mode<synchronous>, transform_indices = @transform_9, window_bounds = array<i64: 320, 50>}, {pipeline_mode = #tpu.pipeline_mode<synchronous>, transform_indices = @transform_10, window_bounds = array<i64: 1, 50>}, {pipeline_mode = #tpu.pipeline_mode<synchronous>, transform_indices = @transform_11, window_bounds = array<i64: 50, 128>}, {pipeline_mode = #tpu.pipeline_mode<synchronous>, transform_indices = @transform_12, window_bounds = array<i64: 1, 128>}, {transform_indices = @transform_13, window_bounds = array<i64: 8, 128>}]} {
    %c0 = arith.constant 0 : index
    %c0_0 = arith.constant 0 : index
    %c0_1 = arith.constant 0 : index
    %0 = vector.load %arg1[%c0, %c0_0, %c0_1] : memref<8x28x28xf32, #tpu.memory_space<vmem>>, vector<8x28x28xf32>
    %1 = vector.extract_strided_slice %0 {offsets = [0, 0, 0], sizes = [1, 24, 28], strides = [1, 1, 1]} : vector<8x28x28xf32> to vector<1x24x28xf32>
    %2 = vector.shape_cast %1 : vector<1x24x28xf32> to vector<24x28xf32>
    %3 = vector.extract_strided_slice %0 {offsets = [0, 1, 0], sizes = [1, 24, 28], strides = [1, 1, 1]} : vector<8x28x28xf32> to vector<1x24x28xf32>
    %4 = vector.shape_cast %3 : vector<1x24x28xf32> to vector<24x28xf32>
    %5 = vector.extract_strided_slice %0 {offsets = [0, 2, 0], sizes = [1, 24, 28], strides = [1, 1, 1]} : vector<8x28x28xf32> to vector<1x24x28xf32>
    %6 = vector.shape_cast %5 : vector<1x24x28xf32> to vector<24x28xf32>
    %7 = vector.extract_strided_slice %0 {offsets = [0, 3, 0], sizes = [1, 24, 28], strides = [1, 1, 1]} : vector<8x28x28xf32> to vector<1x24x28xf32>
    %8 = vector.shape_cast %7 : vector<1x24x28xf32> to vector<24x28xf32>
    %9 = vector.extract_strided_slice %0 {offsets = [0, 4, 0], sizes = [1, 24, 28], strides = [1, 1, 1]} : vector<8x28x28xf32> to vector<1x24x28xf32>
    %10 = vector.shape_cast %9 : vector<1x24x28xf32> to vector<24x28xf32>
    %11 = tpu.concatenate %2, %4, %6, %8, %10 in 1 : vector<24x28xf32>, vector<24x28xf32>, vector<24x28xf32>, vector<24x28xf32>, vector<24x28xf32> -> vector<24x140xf32>
    %12 = vector.extract_strided_slice %0 {offsets = [1, 0, 0], sizes = [1, 24, 28], strides = [1, 1, 1]} : vector<8x28x28xf32> to vector<1x24x28xf32>
    %13 = vector.shape_cast %12 : vector<1x24x28xf32> to vector<24x28xf32>
    %14 = vector.extract_strided_slice %0 {offsets = [1, 1, 0], sizes = [1, 24, 28], strides = [1, 1, 1]} : vector<8x28x28xf32> to vector<1x24x28xf32>
    %15 = vector.shape_cast %14 : vector<1x24x28xf32> to vector<24x28xf32>
    %16 = vector.extract_strided_slice %0 {offsets = [1, 2, 0], sizes = [1, 24, 28], strides = [1, 1, 1]} : vector<8x28x28xf32> to vector<1x24x28xf32>
    %17 = vector.shape_cast %16 : vector<1x24x28xf32> to vector<24x28xf32>
    %18 = vector.extract_strided_slice %0 {offsets = [1, 3, 0], sizes = [1, 24, 28], strides = [1, 1, 1]} : vector<8x28x28xf32> to vector<1x24x28xf32>
    %19 = vector.shape_cast %18 : vector<1x24x28xf32> to vector<24x28xf32>
    %20 = vector.extract_strided_slice %0 {offsets = [1, 4, 0], sizes = [1, 24, 28], strides = [1, 1, 1]} : vector<8x28x28xf32> to vector<1x24x28xf32>
    %21 = vector.shape_cast %20 : vector<1x24x28xf32> to vector<24x28xf32>
    %22 = tpu.concatenate %13, %15, %17, %19, %21 in 1 : vector<24x28xf32>, vector<24x28xf32>, vector<24x28xf32>, vector<24x28xf32>, vector<24x28xf32> -> vector<24x140xf32>
    %23 = vector.extract_strided_slice %0 {offsets = [2, 0, 0], sizes = [1, 24, 28], strides = [1, 1, 1]} : vector<8x28x28xf32> to vector<1x24x28xf32>
    %24 = vector.shape_cast %23 : vector<1x24x28xf32> to vector<24x28xf32>
    %25 = vector.extract_strided_slice %0 {offsets = [2, 1, 0], sizes = [1, 24, 28], strides = [1, 1, 1]} : vector<8x28x28xf32> to vector<1x24x28xf32>
    %26 = vector.shape_cast %25 : vector<1x24x28xf32> to vector<24x28xf32>
    %27 = vector.extract_strided_slice %0 {offsets = [2, 2, 0], sizes = [1, 24, 28], strides = [1, 1, 1]} : vector<8x28x28xf32> to vector<1x24x28xf32>
    %28 = vector.shape_cast %27 : vector<1x24x28xf32> to vector<24x28xf32>
    %29 = vector.extract_strided_slice %0 {offsets = [2, 3, 0], sizes = [1, 24, 28], strides = [1, 1, 1]} : vector<8x28x28xf32> to vector<1x24x28xf32>
    %30 = vector.shape_cast %29 : vector<1x24x28xf32> to vector<24x28xf32>
    %31 = vector.extract_strided_slice %0 {offsets = [2, 4, 0], sizes = [1, 24, 28], strides = [1, 1, 1]} : vector<8x28x28xf32> to vector<1x24x28xf32>
    %32 = vector.shape_cast %31 : vector<1x24x28xf32> to vector<24x28xf32>
    %33 = tpu.concatenate %24, %26, %28, %30, %32 in 1 : vector<24x28xf32>, vector<24x28xf32>, vector<24x28xf32>, vector<24x28xf32>, vector<24x28xf32> -> vector<24x140xf32>
    %34 = vector.extract_strided_slice %0 {offsets = [3, 0, 0], sizes = [1, 24, 28], strides = [1, 1, 1]} : vector<8x28x28xf32> to vector<1x24x28xf32>
    %35 = vector.shape_cast %34 : vector<1x24x28xf32> to vector<24x28xf32>
    %36 = vector.extract_strided_slice %0 {offsets = [3, 1, 0], sizes = [1, 24, 28], strides = [1, 1, 1]} : vector<8x28x28xf32> to vector<1x24x28xf32>
    %37 = vector.shape_cast %36 : vector<1x24x28xf32> to vector<24x28xf32>
    %38 = vector.extract_strided_slice %0 {offsets = [3, 2, 0], sizes = [1, 24, 28], strides = [1, 1, 1]} : vector<8x28x28xf32> to vector<1x24x28xf32>
    %39 = vector.shape_cast %38 : vector<1x24x28xf32> to vector<24x28xf32>
    %40 = vector.extract_strided_slice %0 {offsets = [3, 3, 0], sizes = [1, 24, 28], strides = [1, 1, 1]} : vector<8x28x28xf32> to vector<1x24x28xf32>
    %41 = vector.shape_cast %40 : vector<1x24x28xf32> to vector<24x28xf32>
    %42 = vector.extract_strided_slice %0 {offsets = [3, 4, 0], sizes = [1, 24, 28], strides = [1, 1, 1]} : vector<8x28x28xf32> to vector<1x24x28xf32>
    %43 = vector.shape_cast %42 : vector<1x24x28xf32> to vector<24x28xf32>
    %44 = tpu.concatenate %35, %37, %39, %41, %43 in 1 : vector<24x28xf32>, vector<24x28xf32>, vector<24x28xf32>, vector<24x28xf32>, vector<24x28xf32> -> vector<24x140xf32>
    %45 = vector.extract_strided_slice %0 {offsets = [4, 0, 0], sizes = [1, 24, 28], strides = [1, 1, 1]} : vector<8x28x28xf32> to vector<1x24x28xf32>
    %46 = vector.shape_cast %45 : vector<1x24x28xf32> to vector<24x28xf32>
    %47 = vector.extract_strided_slice %0 {offsets = [4, 1, 0], sizes = [1, 24, 28], strides = [1, 1, 1]} : vector<8x28x28xf32> to vector<1x24x28xf32>
    %48 = vector.shape_cast %47 : vector<1x24x28xf32> to vector<24x28xf32>
    %49 = vector.extract_strided_slice %0 {offsets = [4, 2, 0], sizes = [1, 24, 28], strides = [1, 1, 1]} : vector<8x28x28xf32> to vector<1x24x28xf32>
    %50 = vector.shape_cast %49 : vector<1x24x28xf32> to vector<24x28xf32>
    %51 = vector.extract_strided_slice %0 {offsets = [4, 3, 0], sizes = [1, 24, 28], strides = [1, 1, 1]} : vector<8x28x28xf32> to vector<1x24x28xf32>
    %52 = vector.shape_cast %51 : vector<1x24x28xf32> to vector<24x28xf32>
    %53 = vector.extract_strided_slice %0 {offsets = [4, 4, 0], sizes = [1, 24, 28], strides = [1, 1, 1]} : vector<8x28x28xf32> to vector<1x24x28xf32>
    %54 = vector.shape_cast %53 : vector<1x24x28xf32> to vector<24x28xf32>
    %55 = tpu.concatenate %46, %48, %50, %52, %54 in 1 : vector<24x28xf32>, vector<24x28xf32>, vector<24x28xf32>, vector<24x28xf32>, vector<24x28xf32> -> vector<24x140xf32>
    %56 = vector.extract_strided_slice %0 {offsets = [5, 0, 0], sizes = [1, 24, 28], strides = [1, 1, 1]} : vector<8x28x28xf32> to vector<1x24x28xf32>
    %57 = vector.shape_cast %56 : vector<1x24x28xf32> to vector<24x28xf32>
    %58 = vector.extract_strided_slice %0 {offsets = [5, 1, 0], sizes = [1, 24, 28], strides = [1, 1, 1]} : vector<8x28x28xf32> to vector<1x24x28xf32>
    %59 = vector.shape_cast %58 : vector<1x24x28xf32> to vector<24x28xf32>
    %60 = vector.extract_strided_slice %0 {offsets = [5, 2, 0], sizes = [1, 24, 28], strides = [1, 1, 1]} : vector<8x28x28xf32> to vector<1x24x28xf32>
    %61 = vector.shape_cast %60 : vector<1x24x28xf32> to vector<24x28xf32>
    %62 = vector.extract_strided_slice %0 {offsets = [5, 3, 0], sizes = [1, 24, 28], strides = [1, 1, 1]} : vector<8x28x28xf32> to vector<1x24x28xf32>
    %63 = vector.shape_cast %62 : vector<1x24x28xf32> to vector<24x28xf32>
    %64 = vector.extract_strided_slice %0 {offsets = [5, 4, 0], sizes = [1, 24, 28], strides = [1, 1, 1]} : vector<8x28x28xf32> to vector<1x24x28xf32>
    %65 = vector.shape_cast %64 : vector<1x24x28xf32> to vector<24x28xf32>
    %66 = tpu.concatenate %57, %59, %61, %63, %65 in 1 : vector<24x28xf32>, vector<24x28xf32>, vector<24x28xf32>, vector<24x28xf32>, vector<24x28xf32> -> vector<24x140xf32>
    %67 = vector.extract_strided_slice %0 {offsets = [6, 0, 0], sizes = [1, 24, 28], strides = [1, 1, 1]} : vector<8x28x28xf32> to vector<1x24x28xf32>
    %68 = vector.shape_cast %67 : vector<1x24x28xf32> to vector<24x28xf32>
    %69 = vector.extract_strided_slice %0 {offsets = [6, 1, 0], sizes = [1, 24, 28], strides = [1, 1, 1]} : vector<8x28x28xf32> to vector<1x24x28xf32>
    %70 = vector.shape_cast %69 : vector<1x24x28xf32> to vector<24x28xf32>
    %71 = vector.extract_strided_slice %0 {offsets = [6, 2, 0], sizes = [1, 24, 28], strides = [1, 1, 1]} : vector<8x28x28xf32> to vector<1x24x28xf32>
    %72 = vector.shape_cast %71 : vector<1x24x28xf32> to vector<24x28xf32>
    %73 = vector.extract_strided_slice %0 {offsets = [6, 3, 0], sizes = [1, 24, 28], strides = [1, 1, 1]} : vector<8x28x28xf32> to vector<1x24x28xf32>
    %74 = vector.shape_cast %73 : vector<1x24x28xf32> to vector<24x28xf32>
    %75 = vector.extract_strided_slice %0 {offsets = [6, 4, 0], sizes = [1, 24, 28], strides = [1, 1, 1]} : vector<8x28x28xf32> to vector<1x24x28xf32>
    %76 = vector.shape_cast %75 : vector<1x24x28xf32> to vector<24x28xf32>
    %77 = tpu.concatenate %68, %70, %72, %74, %76 in 1 : vector<24x28xf32>, vector<24x28xf32>, vector<24x28xf32>, vector<24x28xf32>, vector<24x28xf32> -> vector<24x140xf32>
    %78 = vector.extract_strided_slice %0 {offsets = [7, 0, 0], sizes = [1, 24, 28], strides = [1, 1, 1]} : vector<8x28x28xf32> to vector<1x24x28xf32>
    %79 = vector.shape_cast %78 : vector<1x24x28xf32> to vector<24x28xf32>
    %80 = vector.extract_strided_slice %0 {offsets = [7, 1, 0], sizes = [1, 24, 28], strides = [1, 1, 1]} : vector<8x28x28xf32> to vector<1x24x28xf32>
    %81 = vector.shape_cast %80 : vector<1x24x28xf32> to vector<24x28xf32>
    %82 = vector.extract_strided_slice %0 {offsets = [7, 2, 0], sizes = [1, 24, 28], strides = [1, 1, 1]} : vector<8x28x28xf32> to vector<1x24x28xf32>
    %83 = vector.shape_cast %82 : vector<1x24x28xf32> to vector<24x28xf32>
    %84 = vector.extract_strided_slice %0 {offsets = [7, 3, 0], sizes = [1, 24, 28], strides = [1, 1, 1]} : vector<8x28x28xf32> to vector<1x24x28xf32>
    %85 = vector.shape_cast %84 : vector<1x24x28xf32> to vector<24x28xf32>
    %86 = vector.extract_strided_slice %0 {offsets = [7, 4, 0], sizes = [1, 24, 28], strides = [1, 1, 1]} : vector<8x28x28xf32> to vector<1x24x28xf32>
    %87 = vector.shape_cast %86 : vector<1x24x28xf32> to vector<24x28xf32>
    %88 = tpu.concatenate %79, %81, %83, %85, %87 in 1 : vector<24x28xf32>, vector<24x28xf32>, vector<24x28xf32>, vector<24x28xf32>, vector<24x28xf32> -> vector<24x140xf32>
    %89 = tpu.concatenate %11, %22, %33, %44, %55, %66, %77, %88 in 0 : vector<24x140xf32>, vector<24x140xf32>, vector<24x140xf32>, vector<24x140xf32>, vector<24x140xf32>, vector<24x140xf32>, vector<24x140xf32>, vector<24x140xf32> -> vector<192x140xf32>
    %90 = arith.truncf %89 : vector<192x140xf32> to vector<192x140xbf16>
    %c0_2 = arith.constant 0 : index
    %c0_3 = arith.constant 0 : index
    %91 = vector.load %arg2[%c0_2, %c0_3] : memref<140x240xbf16, #tpu.memory_space<vmem>>, vector<140x240xbf16>
    %cst = arith.constant dense<0.000000e+00> : vector<192x240xf32>
    %92 = tpu.matmul %90, %91, %cst {dimension_numbers = #tpu.dot_dimension_numbers<[1], [0], [0], [1], [0, 0, 1, 1], [], []>} : vector<192x140xbf16>, vector<140x240xbf16>, vector<192x240xf32> -> vector<192x240xf32>
    %c0_4 = arith.constant 0 : index
    %c0_5 = arith.constant 0 : index
    %93 = vector.load %arg3[%c0_4, %c0_5] : memref<1x240xf32, #tpu.memory_space<vmem>>, vector<1x240xf32>
    %94 = vector.broadcast %93 : vector<1x240xf32> to vector<192x240xf32>
    %95 = arith.addf %92, %94 : vector<192x240xf32>
    %c0_6 = arith.constant 0 : index
    %c0_7 = arith.constant 0 : index
    %96 = vector.load %arg4[%c0_6, %c0_7] : memref<96x192xbf16, #tpu.memory_space<vmem>>, vector<96x192xbf16>
    %c0_8 = arith.constant 0 : index
    %c0_9 = arith.constant 0 : index
    %97 = vector.load %arg5[%c0_8, %c0_9] : memref<240x120xbf16, #tpu.memory_space<vmem>>, vector<240x120xbf16>
    %98 = vector.extract_strided_slice %95 {offsets = [1, 0], sizes = [191, 240], strides = [1, 1]} : vector<192x240xf32> to vector<191x240xf32>
    %99 = vector.extract_strided_slice %95 {offsets = [0, 0], sizes = [1, 240], strides = [1, 1]} : vector<192x240xf32> to vector<1x240xf32>
    %100 = tpu.concatenate %98, %99 in 0 : vector<191x240xf32>, vector<1x240xf32> -> vector<192x240xf32>
    %101 = arith.maximumf %95, %100 : vector<192x240xf32>
    %102 = vector.extract_strided_slice %101 {offsets = [0, 10], sizes = [192, 230], strides = [1, 1]} : vector<192x240xf32> to vector<192x230xf32>
    %103 = vector.extract_strided_slice %101 {offsets = [0, 0], sizes = [192, 10], strides = [1, 1]} : vector<192x240xf32> to vector<192x10xf32>
    %104 = tpu.concatenate %102, %103 in 1 : vector<192x230xf32>, vector<192x10xf32> -> vector<192x240xf32>
    %105 = arith.maximumf %101, %104 : vector<192x240xf32>
    %cst_10 = arith.constant 0.000000e+00 : f32
    %106 = vector.broadcast %cst_10 : f32 to vector<192x240xf32>
    %107 = arith.maximumf %105, %106 : vector<192x240xf32>
    %108 = arith.truncf %107 : vector<192x240xf32> to vector<192x240xbf16>
    %cst_11 = arith.constant dense<0.000000e+00> : vector<96x240xf32>
    %109 = tpu.matmul %96, %108, %cst_11 {dimension_numbers = #tpu.dot_dimension_numbers<[1], [0], [0], [1], [0, 0, 1, 1], [], []>} : vector<96x192xbf16>, vector<192x240xbf16>, vector<96x240xf32> -> vector<96x240xf32>
    %110 = arith.truncf %109 : vector<96x240xf32> to vector<96x240xbf16>
    %cst_12 = arith.constant dense<0.000000e+00> : vector<96x120xf32>
    %111 = tpu.matmul %110, %97, %cst_12 {dimension_numbers = #tpu.dot_dimension_numbers<[1], [0], [0], [1], [0, 0, 1, 1], [], []>} : vector<96x240xbf16>, vector<240x120xbf16>, vector<96x120xf32> -> vector<96x120xf32>
    %112 = vector.extract_strided_slice %111 {offsets = [0, 0], sizes = [8, 120], strides = [1, 1]} : vector<96x120xf32> to vector<8x120xf32>
    %113 = vector.extract_strided_slice %111 {offsets = [1, 0], sizes = [8, 120], strides = [1, 1]} : vector<96x120xf32> to vector<8x120xf32>
    %114 = vector.extract_strided_slice %111 {offsets = [2, 0], sizes = [8, 120], strides = [1, 1]} : vector<96x120xf32> to vector<8x120xf32>
    %115 = vector.extract_strided_slice %111 {offsets = [3, 0], sizes = [8, 120], strides = [1, 1]} : vector<96x120xf32> to vector<8x120xf32>
    %116 = vector.extract_strided_slice %111 {offsets = [4, 0], sizes = [8, 120], strides = [1, 1]} : vector<96x120xf32> to vector<8x120xf32>
    %117 = tpu.concatenate %112, %113, %114, %115, %116 in 1 : vector<8x120xf32>, vector<8x120xf32>, vector<8x120xf32>, vector<8x120xf32>, vector<8x120xf32> -> vector<8x600xf32>
    %118 = vector.extract_strided_slice %111 {offsets = [12, 0], sizes = [8, 120], strides = [1, 1]} : vector<96x120xf32> to vector<8x120xf32>
    %119 = vector.extract_strided_slice %111 {offsets = [13, 0], sizes = [8, 120], strides = [1, 1]} : vector<96x120xf32> to vector<8x120xf32>
    %120 = vector.extract_strided_slice %111 {offsets = [14, 0], sizes = [8, 120], strides = [1, 1]} : vector<96x120xf32> to vector<8x120xf32>
    %121 = vector.extract_strided_slice %111 {offsets = [15, 0], sizes = [8, 120], strides = [1, 1]} : vector<96x120xf32> to vector<8x120xf32>
    %122 = vector.extract_strided_slice %111 {offsets = [16, 0], sizes = [8, 120], strides = [1, 1]} : vector<96x120xf32> to vector<8x120xf32>
    %123 = tpu.concatenate %118, %119, %120, %121, %122 in 1 : vector<8x120xf32>, vector<8x120xf32>, vector<8x120xf32>, vector<8x120xf32>, vector<8x120xf32> -> vector<8x600xf32>
    %124 = vector.extract_strided_slice %111 {offsets = [24, 0], sizes = [8, 120], strides = [1, 1]} : vector<96x120xf32> to vector<8x120xf32>
    %125 = vector.extract_strided_slice %111 {offsets = [25, 0], sizes = [8, 120], strides = [1, 1]} : vector<96x120xf32> to vector<8x120xf32>
    %126 = vector.extract_strided_slice %111 {offsets = [26, 0], sizes = [8, 120], strides = [1, 1]} : vector<96x120xf32> to vector<8x120xf32>
    %127 = vector.extract_strided_slice %111 {offsets = [27, 0], sizes = [8, 120], strides = [1, 1]} : vector<96x120xf32> to vector<8x120xf32>
    %128 = vector.extract_strided_slice %111 {offsets = [28, 0], sizes = [8, 120], strides = [1, 1]} : vector<96x120xf32> to vector<8x120xf32>
    %129 = tpu.concatenate %124, %125, %126, %127, %128 in 1 : vector<8x120xf32>, vector<8x120xf32>, vector<8x120xf32>, vector<8x120xf32>, vector<8x120xf32> -> vector<8x600xf32>
    %130 = vector.extract_strided_slice %111 {offsets = [36, 0], sizes = [8, 120], strides = [1, 1]} : vector<96x120xf32> to vector<8x120xf32>
    %131 = vector.extract_strided_slice %111 {offsets = [37, 0], sizes = [8, 120], strides = [1, 1]} : vector<96x120xf32> to vector<8x120xf32>
    %132 = vector.extract_strided_slice %111 {offsets = [38, 0], sizes = [8, 120], strides = [1, 1]} : vector<96x120xf32> to vector<8x120xf32>
    %133 = vector.extract_strided_slice %111 {offsets = [39, 0], sizes = [8, 120], strides = [1, 1]} : vector<96x120xf32> to vector<8x120xf32>
    %134 = vector.extract_strided_slice %111 {offsets = [40, 0], sizes = [8, 120], strides = [1, 1]} : vector<96x120xf32> to vector<8x120xf32>
    %135 = tpu.concatenate %130, %131, %132, %133, %134 in 1 : vector<8x120xf32>, vector<8x120xf32>, vector<8x120xf32>, vector<8x120xf32>, vector<8x120xf32> -> vector<8x600xf32>
    %136 = vector.extract_strided_slice %111 {offsets = [48, 0], sizes = [8, 120], strides = [1, 1]} : vector<96x120xf32> to vector<8x120xf32>
    %137 = vector.extract_strided_slice %111 {offsets = [49, 0], sizes = [8, 120], strides = [1, 1]} : vector<96x120xf32> to vector<8x120xf32>
    %138 = vector.extract_strided_slice %111 {offsets = [50, 0], sizes = [8, 120], strides = [1, 1]} : vector<96x120xf32> to vector<8x120xf32>
    %139 = vector.extract_strided_slice %111 {offsets = [51, 0], sizes = [8, 120], strides = [1, 1]} : vector<96x120xf32> to vector<8x120xf32>
    %140 = vector.extract_strided_slice %111 {offsets = [52, 0], sizes = [8, 120], strides = [1, 1]} : vector<96x120xf32> to vector<8x120xf32>
    %141 = tpu.concatenate %136, %137, %138, %139, %140 in 1 : vector<8x120xf32>, vector<8x120xf32>, vector<8x120xf32>, vector<8x120xf32>, vector<8x120xf32> -> vector<8x600xf32>
    %142 = vector.extract_strided_slice %111 {offsets = [60, 0], sizes = [8, 120], strides = [1, 1]} : vector<96x120xf32> to vector<8x120xf32>
    %143 = vector.extract_strided_slice %111 {offsets = [61, 0], sizes = [8, 120], strides = [1, 1]} : vector<96x120xf32> to vector<8x120xf32>
    %144 = vector.extract_strided_slice %111 {offsets = [62, 0], sizes = [8, 120], strides = [1, 1]} : vector<96x120xf32> to vector<8x120xf32>
    %145 = vector.extract_strided_slice %111 {offsets = [63, 0], sizes = [8, 120], strides = [1, 1]} : vector<96x120xf32> to vector<8x120xf32>
    %146 = vector.extract_strided_slice %111 {offsets = [64, 0], sizes = [8, 120], strides = [1, 1]} : vector<96x120xf32> to vector<8x120xf32>
    %147 = tpu.concatenate %142, %143, %144, %145, %146 in 1 : vector<8x120xf32>, vector<8x120xf32>, vector<8x120xf32>, vector<8x120xf32>, vector<8x120xf32> -> vector<8x600xf32>
    %148 = vector.extract_strided_slice %111 {offsets = [72, 0], sizes = [8, 120], strides = [1, 1]} : vector<96x120xf32> to vector<8x120xf32>
    %149 = vector.extract_strided_slice %111 {offsets = [73, 0], sizes = [8, 120], strides = [1, 1]} : vector<96x120xf32> to vector<8x120xf32>
    %150 = vector.extract_strided_slice %111 {offsets = [74, 0], sizes = [8, 120], strides = [1, 1]} : vector<96x120xf32> to vector<8x120xf32>
    %151 = vector.extract_strided_slice %111 {offsets = [75, 0], sizes = [8, 120], strides = [1, 1]} : vector<96x120xf32> to vector<8x120xf32>
    %152 = vector.extract_strided_slice %111 {offsets = [76, 0], sizes = [8, 120], strides = [1, 1]} : vector<96x120xf32> to vector<8x120xf32>
    %153 = tpu.concatenate %148, %149, %150, %151, %152 in 1 : vector<8x120xf32>, vector<8x120xf32>, vector<8x120xf32>, vector<8x120xf32>, vector<8x120xf32> -> vector<8x600xf32>
    %154 = vector.extract_strided_slice %111 {offsets = [84, 0], sizes = [8, 120], strides = [1, 1]} : vector<96x120xf32> to vector<8x120xf32>
    %155 = vector.extract_strided_slice %111 {offsets = [85, 0], sizes = [8, 120], strides = [1, 1]} : vector<96x120xf32> to vector<8x120xf32>
    %156 = vector.extract_strided_slice %111 {offsets = [86, 0], sizes = [8, 120], strides = [1, 1]} : vector<96x120xf32> to vector<8x120xf32>
    %157 = vector.extract_strided_slice %111 {offsets = [87, 0], sizes = [8, 120], strides = [1, 1]} : vector<96x120xf32> to vector<8x120xf32>
    %158 = vector.extract_strided_slice %111 {offsets = [88, 0], sizes = [8, 120], strides = [1, 1]} : vector<96x120xf32> to vector<8x120xf32>
    %159 = tpu.concatenate %154, %155, %156, %157, %158 in 1 : vector<8x120xf32>, vector<8x120xf32>, vector<8x120xf32>, vector<8x120xf32>, vector<8x120xf32> -> vector<8x600xf32>
    %160 = tpu.concatenate %117, %123, %129, %135, %141, %147, %153, %159 in 0 : vector<8x600xf32>, vector<8x600xf32>, vector<8x600xf32>, vector<8x600xf32>, vector<8x600xf32>, vector<8x600xf32>, vector<8x600xf32>, vector<8x600xf32> -> vector<64x600xf32>
    %161 = arith.truncf %160 : vector<64x600xf32> to vector<64x600xbf16>
    %c0_13 = arith.constant 0 : index
    %c0_14 = arith.constant 0 : index
    %162 = vector.load %arg6[%c0_13, %c0_14] : memref<600x160xbf16, #tpu.memory_space<vmem>>, vector<600x160xbf16>
    %cst_15 = arith.constant dense<0.000000e+00> : vector<64x160xf32>
    %163 = tpu.matmul %161, %162, %cst_15 {dimension_numbers = #tpu.dot_dimension_numbers<[1], [0], [0], [1], [0, 0, 1, 1], [], []>} : vector<64x600xbf16>, vector<600x160xbf16>, vector<64x160xf32> -> vector<64x160xf32>
    %c0_16 = arith.constant 0 : index
    %c0_17 = arith.constant 0 : index
    %164 = vector.load %arg7[%c0_16, %c0_17] : memref<1x160xf32, #tpu.memory_space<vmem>>, vector<1x160xf32>
    %165 = vector.broadcast %164 : vector<1x160xf32> to vector<64x160xf32>
    %166 = arith.addf %163, %165 : vector<64x160xf32>
    %c0_18 = arith.constant 0 : index
    %c0_19 = arith.constant 0 : index
    %167 = vector.load %arg8[%c0_18, %c0_19] : memref<32x64xbf16, #tpu.memory_space<vmem>>, vector<32x64xbf16>
    %c0_20 = arith.constant 0 : index
    %c0_21 = arith.constant 0 : index
    %168 = vector.load %arg9[%c0_20, %c0_21] : memref<160x80xbf16, #tpu.memory_space<vmem>>, vector<160x80xbf16>
    %169 = vector.extract_strided_slice %166 {offsets = [1, 0], sizes = [63, 160], strides = [1, 1]} : vector<64x160xf32> to vector<63x160xf32>
    %170 = vector.extract_strided_slice %166 {offsets = [0, 0], sizes = [1, 160], strides = [1, 1]} : vector<64x160xf32> to vector<1x160xf32>
    %171 = tpu.concatenate %169, %170 in 0 : vector<63x160xf32>, vector<1x160xf32> -> vector<64x160xf32>
    %172 = arith.maximumf %166, %171 : vector<64x160xf32>
    %173 = vector.extract_strided_slice %172 {offsets = [0, 20], sizes = [64, 140], strides = [1, 1]} : vector<64x160xf32> to vector<64x140xf32>
    %174 = vector.extract_strided_slice %172 {offsets = [0, 0], sizes = [64, 20], strides = [1, 1]} : vector<64x160xf32> to vector<64x20xf32>
    %175 = tpu.concatenate %173, %174 in 1 : vector<64x140xf32>, vector<64x20xf32> -> vector<64x160xf32>
    %176 = arith.maximumf %172, %175 : vector<64x160xf32>
    %cst_22 = arith.constant 0.000000e+00 : f32
    %177 = vector.broadcast %cst_22 : f32 to vector<64x160xf32>
    %178 = arith.maximumf %176, %177 : vector<64x160xf32>
    %179 = arith.truncf %178 : vector<64x160xf32> to vector<64x160xbf16>
    %cst_23 = arith.constant dense<0.000000e+00> : vector<32x160xf32>
    %180 = tpu.matmul %167, %179, %cst_23 {dimension_numbers = #tpu.dot_dimension_numbers<[1], [0], [0], [1], [0, 0, 1, 1], [], []>} : vector<32x64xbf16>, vector<64x160xbf16>, vector<32x160xf32> -> vector<32x160xf32>
    %181 = arith.truncf %180 : vector<32x160xf32> to vector<32x160xbf16>
    %cst_24 = arith.constant dense<0.000000e+00> : vector<32x80xf32>
    %182 = tpu.matmul %181, %168, %cst_24 {dimension_numbers = #tpu.dot_dimension_numbers<[1], [0], [0], [1], [0, 0, 1, 1], [], []>} : vector<32x160xbf16>, vector<160x80xbf16>, vector<32x80xf32> -> vector<32x80xf32>
    %183 = vector.extract_strided_slice %182 {offsets = [0, 0], sizes = [1, 80], strides = [1, 1]} : vector<32x80xf32> to vector<1x80xf32>
    %184 = vector.extract_strided_slice %182 {offsets = [1, 0], sizes = [1, 80], strides = [1, 1]} : vector<32x80xf32> to vector<1x80xf32>
    %185 = vector.extract_strided_slice %182 {offsets = [2, 0], sizes = [1, 80], strides = [1, 1]} : vector<32x80xf32> to vector<1x80xf32>
    %186 = vector.extract_strided_slice %182 {offsets = [3, 0], sizes = [1, 80], strides = [1, 1]} : vector<32x80xf32> to vector<1x80xf32>
    %187 = tpu.concatenate %183, %184, %185, %186 in 1 : vector<1x80xf32>, vector<1x80xf32>, vector<1x80xf32>, vector<1x80xf32> -> vector<1x320xf32>
    %188 = vector.extract_strided_slice %182 {offsets = [4, 0], sizes = [1, 80], strides = [1, 1]} : vector<32x80xf32> to vector<1x80xf32>
    %189 = vector.extract_strided_slice %182 {offsets = [5, 0], sizes = [1, 80], strides = [1, 1]} : vector<32x80xf32> to vector<1x80xf32>
    %190 = vector.extract_strided_slice %182 {offsets = [6, 0], sizes = [1, 80], strides = [1, 1]} : vector<32x80xf32> to vector<1x80xf32>
    %191 = vector.extract_strided_slice %182 {offsets = [7, 0], sizes = [1, 80], strides = [1, 1]} : vector<32x80xf32> to vector<1x80xf32>
    %192 = tpu.concatenate %188, %189, %190, %191 in 1 : vector<1x80xf32>, vector<1x80xf32>, vector<1x80xf32>, vector<1x80xf32> -> vector<1x320xf32>
    %193 = vector.extract_strided_slice %182 {offsets = [8, 0], sizes = [1, 80], strides = [1, 1]} : vector<32x80xf32> to vector<1x80xf32>
    %194 = vector.extract_strided_slice %182 {offsets = [9, 0], sizes = [1, 80], strides = [1, 1]} : vector<32x80xf32> to vector<1x80xf32>
    %195 = vector.extract_strided_slice %182 {offsets = [10, 0], sizes = [1, 80], strides = [1, 1]} : vector<32x80xf32> to vector<1x80xf32>
    %196 = vector.extract_strided_slice %182 {offsets = [11, 0], sizes = [1, 80], strides = [1, 1]} : vector<32x80xf32> to vector<1x80xf32>
    %197 = tpu.concatenate %193, %194, %195, %196 in 1 : vector<1x80xf32>, vector<1x80xf32>, vector<1x80xf32>, vector<1x80xf32> -> vector<1x320xf32>
    %198 = vector.extract_strided_slice %182 {offsets = [12, 0], sizes = [1, 80], strides = [1, 1]} : vector<32x80xf32> to vector<1x80xf32>
    %199 = vector.extract_strided_slice %182 {offsets = [13, 0], sizes = [1, 80], strides = [1, 1]} : vector<32x80xf32> to vector<1x80xf32>
    %200 = vector.extract_strided_slice %182 {offsets = [14, 0], sizes = [1, 80], strides = [1, 1]} : vector<32x80xf32> to vector<1x80xf32>
    %201 = vector.extract_strided_slice %182 {offsets = [15, 0], sizes = [1, 80], strides = [1, 1]} : vector<32x80xf32> to vector<1x80xf32>
    %202 = tpu.concatenate %198, %199, %200, %201 in 1 : vector<1x80xf32>, vector<1x80xf32>, vector<1x80xf32>, vector<1x80xf32> -> vector<1x320xf32>
    %203 = vector.extract_strided_slice %182 {offsets = [16, 0], sizes = [1, 80], strides = [1, 1]} : vector<32x80xf32> to vector<1x80xf32>
    %204 = vector.extract_strided_slice %182 {offsets = [17, 0], sizes = [1, 80], strides = [1, 1]} : vector<32x80xf32> to vector<1x80xf32>
    %205 = vector.extract_strided_slice %182 {offsets = [18, 0], sizes = [1, 80], strides = [1, 1]} : vector<32x80xf32> to vector<1x80xf32>
    %206 = vector.extract_strided_slice %182 {offsets = [19, 0], sizes = [1, 80], strides = [1, 1]} : vector<32x80xf32> to vector<1x80xf32>
    %207 = tpu.concatenate %203, %204, %205, %206 in 1 : vector<1x80xf32>, vector<1x80xf32>, vector<1x80xf32>, vector<1x80xf32> -> vector<1x320xf32>
    %208 = vector.extract_strided_slice %182 {offsets = [20, 0], sizes = [1, 80], strides = [1, 1]} : vector<32x80xf32> to vector<1x80xf32>
    %209 = vector.extract_strided_slice %182 {offsets = [21, 0], sizes = [1, 80], strides = [1, 1]} : vector<32x80xf32> to vector<1x80xf32>
    %210 = vector.extract_strided_slice %182 {offsets = [22, 0], sizes = [1, 80], strides = [1, 1]} : vector<32x80xf32> to vector<1x80xf32>
    %211 = vector.extract_strided_slice %182 {offsets = [23, 0], sizes = [1, 80], strides = [1, 1]} : vector<32x80xf32> to vector<1x80xf32>
    %212 = tpu.concatenate %208, %209, %210, %211 in 1 : vector<1x80xf32>, vector<1x80xf32>, vector<1x80xf32>, vector<1x80xf32> -> vector<1x320xf32>
    %213 = vector.extract_strided_slice %182 {offsets = [24, 0], sizes = [1, 80], strides = [1, 1]} : vector<32x80xf32> to vector<1x80xf32>
    %214 = vector.extract_strided_slice %182 {offsets = [25, 0], sizes = [1, 80], strides = [1, 1]} : vector<32x80xf32> to vector<1x80xf32>
    %215 = vector.extract_strided_slice %182 {offsets = [26, 0], sizes = [1, 80], strides = [1, 1]} : vector<32x80xf32> to vector<1x80xf32>
    %216 = vector.extract_strided_slice %182 {offsets = [27, 0], sizes = [1, 80], strides = [1, 1]} : vector<32x80xf32> to vector<1x80xf32>
    %217 = tpu.concatenate %213, %214, %215, %216 in 1 : vector<1x80xf32>, vector<1x80xf32>, vector<1x80xf32>, vector<1x80xf32> -> vector<1x320xf32>
    %218 = vector.extract_strided_slice %182 {offsets = [28, 0], sizes = [1, 80], strides = [1, 1]} : vector<32x80xf32> to vector<1x80xf32>
    %219 = vector.extract_strided_slice %182 {offsets = [29, 0], sizes = [1, 80], strides = [1, 1]} : vector<32x80xf32> to vector<1x80xf32>
    %220 = vector.extract_strided_slice %182 {offsets = [30, 0], sizes = [1, 80], strides = [1, 1]} : vector<32x80xf32> to vector<1x80xf32>
    %221 = vector.extract_strided_slice %182 {offsets = [31, 0], sizes = [1, 80], strides = [1, 1]} : vector<32x80xf32> to vector<1x80xf32>
    %222 = tpu.concatenate %218, %219, %220, %221 in 1 : vector<1x80xf32>, vector<1x80xf32>, vector<1x80xf32>, vector<1x80xf32> -> vector<1x320xf32>
    %223 = tpu.concatenate %187, %192, %197, %202, %207, %212, %217, %222 in 0 : vector<1x320xf32>, vector<1x320xf32>, vector<1x320xf32>, vector<1x320xf32>, vector<1x320xf32>, vector<1x320xf32>, vector<1x320xf32>, vector<1x320xf32> -> vector<8x320xf32>
    %224 = arith.truncf %223 : vector<8x320xf32> to vector<8x320xbf16>
    %c0_25 = arith.constant 0 : index
    %c0_26 = arith.constant 0 : index
    %225 = vector.load %arg10[%c0_25, %c0_26] : memref<320x50xbf16, #tpu.memory_space<vmem>>, vector<320x50xbf16>
    %cst_27 = arith.constant dense<0.000000e+00> : vector<8x50xf32>
    %226 = tpu.matmul %224, %225, %cst_27 {dimension_numbers = #tpu.dot_dimension_numbers<[1], [0], [0], [1], [0, 0, 1, 1], [], []>} : vector<8x320xbf16>, vector<320x50xbf16>, vector<8x50xf32> -> vector<8x50xf32>
    %c0_28 = arith.constant 0 : index
    %c0_29 = arith.constant 0 : index
    %227 = vector.load %arg11[%c0_28, %c0_29] : memref<1x50xf32, #tpu.memory_space<vmem>>, vector<1x50xf32>
    %228 = vector.broadcast %227 : vector<1x50xf32> to vector<8x50xf32>
    %229 = arith.addf %226, %228 : vector<8x50xf32>
    %cst_30 = arith.constant 0.000000e+00 : f32
    %230 = vector.broadcast %cst_30 : f32 to vector<8x50xf32>
    %231 = arith.maximumf %229, %230 : vector<8x50xf32>
    %232 = arith.truncf %231 : vector<8x50xf32> to vector<8x50xbf16>
    %c0_31 = arith.constant 0 : index
    %c0_32 = arith.constant 0 : index
    %233 = vector.load %arg12[%c0_31, %c0_32] : memref<50x128xbf16, #tpu.memory_space<vmem>>, vector<50x128xbf16>
    %cst_33 = arith.constant dense<0.000000e+00> : vector<8x128xf32>
    %234 = tpu.matmul %232, %233, %cst_33 {dimension_numbers = #tpu.dot_dimension_numbers<[1], [0], [0], [1], [0, 0, 1, 1], [], []>} : vector<8x50xbf16>, vector<50x128xbf16>, vector<8x128xf32> -> vector<8x128xf32>
    %c0_34 = arith.constant 0 : index
    %c0_35 = arith.constant 0 : index
    %235 = vector.load %arg13[%c0_34, %c0_35] : memref<1x128xf32, #tpu.memory_space<vmem>>, vector<1x128xf32>
    %236 = vector.broadcast %235 : vector<1x128xf32> to vector<8x128xf32>
    %237 = arith.addf %234, %236 : vector<8x128xf32>
    %c0_36 = arith.constant 0 : index
    %c0_37 = arith.constant 0 : index
    %238 = vector.load %arg14[%c0_36, %c0_37] : memref<8x128xf32, #tpu.memory_space<vmem>>, vector<8x128xf32>
    tpu.vector_store %arg14[%c0_36, %c0_37], %237 {strides = array<i32>} : memref<8x128xf32, #tpu.memory_space<vmem>>, vector<8x128xf32>,
    return
  }
  func.func @transform_0(%arg0: i32) -> (i32, i32, i32) {
    %c0_i32 = arith.constant 0 : i32
    %c0_i32_0 = arith.constant 0 : i32
    %c0_i32_1 = arith.constant 0 : i32
    return %arg0, %c0_i32, %c0_i32_0 : i32, i32, i32
  }
  func.func @transform_1(%arg0: i32) -> (i32, i32) {
    %c0_i32 = arith.constant 0 : i32
    %c0_i32_0 = arith.constant 0 : i32
    %c0_i32_1 = arith.constant 0 : i32
    return %c0_i32, %c0_i32_0 : i32, i32
  }
  func.func @transform_2(%arg0: i32) -> (i32, i32) {
    %c0_i32 = arith.constant 0 : i32
    %c0_i32_0 = arith.constant 0 : i32
    %c0_i32_1 = arith.constant 0 : i32
    return %c0_i32, %c0_i32_0 : i32, i32
  }
  func.func @transform_3(%arg0: i32) -> (i32, i32) {
    %c0_i32 = arith.constant 0 : i32
    %c0_i32_0 = arith.constant 0 : i32
    %c0_i32_1 = arith.constant 0 : i32
    return %c0_i32, %c0_i32_0 : i32, i32
  }
  func.func @transform_4(%arg0: i32) -> (i32, i32) {
    %c0_i32 = arith.constant 0 : i32
    %c0_i32_0 = arith.constant 0 : i32
    %c0_i32_1 = arith.constant 0 : i32
    return %c0_i32, %c0_i32_0 : i32, i32
  }
  func.func @transform_5(%arg0: i32) -> (i32, i32) {
    %c0_i32 = arith.constant 0 : i32
    %c0_i32_0 = arith.constant 0 : i32
    %c0_i32_1 = arith.constant 0 : i32
    return %c0_i32, %c0_i32_0 : i32, i32
  }
  func.func @transform_6(%arg0: i32) -> (i32, i32) {
    %c0_i32 = arith.constant 0 : i32
    %c0_i32_0 = arith.constant 0 : i32
    %c0_i32_1 = arith.constant 0 : i32
    return %c0_i32, %c0_i32_0 : i32, i32
  }
  func.func @transform_7(%arg0: i32) -> (i32, i32) {
    %c0_i32 = arith.constant 0 : i32
    %c0_i32_0 = arith.constant 0 : i32
    %c0_i32_1 = arith.constant 0 : i32
    return %c0_i32, %c0_i32_0 : i32, i32
  }
  func.func @transform_8(%arg0: i32) -> (i32, i32) {
    %c0_i32 = arith.constant 0 : i32
    %c0_i32_0 = arith.constant 0 : i32
    %c0_i32_1 = arith.constant 0 : i32
    return %c0_i32, %c0_i32_0 : i32, i32
  }
  func.func @transform_9(%arg0: i32) -> (i32, i32) {
    %c0_i32 = arith.constant 0 : i32
    %c0_i32_0 = arith.constant 0 : i32
    %c0_i32_1 = arith.constant 0 : i32
    return %c0_i32, %c0_i32_0 : i32, i32
  }
  func.func @transform_10(%arg0: i32) -> (i32, i32) {
    %c0_i32 = arith.constant 0 : i32
    %c0_i32_0 = arith.constant 0 : i32
    %c0_i32_1 = arith.constant 0 : i32
    return %c0_i32, %c0_i32_0 : i32, i32
  }
  func.func @transform_11(%arg0: i32) -> (i32, i32) {
    %c0_i32 = arith.constant 0 : i32
    %c0_i32_0 = arith.constant 0 : i32
    %c0_i32_1 = arith.constant 0 : i32
    return %c0_i32, %c0_i32_0 : i32, i32
  }
  func.func @transform_12(%arg0: i32) -> (i32, i32) {
    %c0_i32 = arith.constant 0 : i32
    %c0_i32_0 = arith.constant 0 : i32
    %c0_i32_1 = arith.constant 0 : i32
    return %c0_i32, %c0_i32_0 : i32, i32
  }
  func.func @transform_13(%arg0: i32) -> (i32, i32) {
    %c0_i32 = arith.constant 0 : i32
    %c0_i32_0 = arith.constant 0 : i32
    return %arg0, %c0_i32 : i32, i32
  }
}

</mosaic_0001>

<bundles_post_ra>
// kernel: mnist_forward.1
= control target key start
LH: loop header
LB: loop body
LE: loop exit
PB: predicated region body
PF: predicated region fallthrough
CT: control target
= control target key end

     0   :  { %s5869_s25 = smov 0   ;;  %s7882_s0 = inlined_call_operand.vmem [shape: f32[16,28,28], index: 0, kind: input, shape index: {}]   ;;  %s7883_s1 = inlined_call_operand.vmem [shape: bf16[140,240], index: 1, kind: input, shape index: {}]   ;;  %s7884_s2 = inlined_call_operand.vmem [shape: f32[1,240], index: 2, kind: input, shape index: {}]   ;;  %s7885_s3 = inlined_call_operand.vmem [shape: bf16[96,192], index: 3, kind: input, shape index: {}]   ;;  %s7886_s4 = inlined_call_operand.vmem [shape: bf16[240,120], index: 4, kind: input, shape index: {}]   ;;  %s7887_s5 = inlined_call_operand.vmem [shape: bf16[600,160], index: 5, kind: input, shape index: {}]   ;;  %s7888_s6 = inlined_call_operand.vmem [shape: f32[1,160], index: 6, kind: input, shape index: {}]   ;;  %s7889_s7 = inlined_call_operand.vmem [shape: bf16[32,64], index: 7, kind: input, shape index: {}]   ;;  %s7890_s8 = inlined_call_operand.vmem [shape: bf16[160,80], index: 8, kind: input, shape index: {}]   ;;  %s7891_s9 = inlined_call_operand.vmem [shape: bf16[320,50], index: 9, kind: input, shape index: {}]   ;;  %s7892_s10 = inlined_call_operand.vmem [shape: f32[1,50], index: 10, kind: input, shape index: {}]   ;;  %s7893_s11 = inlined_call_operand.vmem [shape: bf16[50,128], index: 11, kind: input, shape index: {}]   ;;  %s7894_s12 = inlined_call_operand.vmem [shape: f32[1,128], index: 12, kind: input, shape index: {}]   ;;  %s7895_s13 = inlined_call_operand.vmem [shape: f32[16,128], index: 13, kind: output, shape index: {}]  }
   0x1 LB: > { %s5875_s26 = sadd.s32 4294967295, %s5781_s25   ;;  %p4621_p0 = scmp.ge.s32.totalorder %s5781_s25, 1  ;;  %s5781_s25 = sphi %s5869_s25, %s23_s25  }
   0x2   : > { %p389_p1 = scmp.lt.s32.totalorder %s5781_s25, 3 }
   0x4   : > { %p390_p2 = pnand %p4621_p0, %p389_p1 }
   0x6   : > { %393 = sbr.rel (%p390_p2) target bundleno = 2665 (0xa69), region = 72 }
   0xd   : > { %s4622_s27 = sshll.u32 %s5875_s26, 3  ;;  %v5552_v0 = vld [vmem:[%s7883_s1 + $0x4] ss:$8 sps:$4 sm:$0xff]   ;;  %v5554_v1 = vld [vmem:[%s7883_s1] ss:$8 sps:$4 sm:$0xff]   ;;  %vm481_vm0 = vcmask 1046528  }
   0xe   : > { %p434_p3 = scmp.lt.s32.totalorder %s4622_s27, 15  ;;  %1310 = vmatprep.subr.bf16.mxu0 %v5552_v0  ;;  %v5555_v2 = vld [vmem:[%s7883_s1 + $0x14] ss:$8 sps:$4 sm:$0xff]   ;;  %v5557_v3 = vld [vmem:[%s7883_s1 + $0x10] ss:$8 sps:$4 sm:$0xff]   ;;  %vm515_vm1 = vcmask 1044480  }
   0xf   : > { %1311 = vmatpush1.bf16.msra.mxu0 %v5554_v1  ;;  %v5558_v4 = vld [vmem:[%s7883_s1 + $0x24] ss:$8 sps:$4 sm:$0xff]   ;;  %vm498_vm2 = vcmask 1045504   ;;  %vm532_vm3 = vcmask 1043456   ;;  %v5560_v12 = vld [vmem:[%s7883_s1 + $0x20] ss:$8 sps:$4 sm:$0xff]  }
  0x10   : > { %s7927_s27 = smov (!%p434_p3, %s4622_s27), 15  ;;  %1312 = vmatprep.subr.bf16.mxu0 %v5555_v2  ;;  %v5561_v17 = vld [vmem:[%s7883_s1 + $0x34] ss:$8 sps:$4 sm:$0xff]   ;;  %v5563_v33 = vld [vmem:[%s7883_s1 + $0x30] ss:$8 sps:$4 sm:$0xff]   ;;  %s5783_s16 = smov 28  }
  0x11   : > { %s4823_s19 = sshll.u32 %s7927_s27, 5  ;;  %s5784_s17 = smov 84   ;;  %v5564_v2 = vld [vmem:[%s7883_s1 + $0x44] ss:$8 sps:$4 sm:$0xff]   ;;  %vm549_vm4 = vcmask 228352   ;;  %vm553_vm5 = vcmask 457728  }
  0x12   : > { %s5898_s24 = scalar_lea.vmem %s7882_s0, %s4823_s19  ;;  %s5785_s18 = smov 56   ;;  %vm557_vm6 = vcmask 687104   ;;  %vm561_vm7 = vcmask 916480   ;;  %vm1267_vm8 = vcmask 97280   ;;  %vm2235_vm9 = vcmask 523264  }
  0x13   : > { %v445_v5 = vld [vmem:[%s5898_s24] sm:$0xff]  ;;  %v446_v6 = vld [vmem:[%s5898_s24 + $0x8] sm:$0xff]  ;;  %v5903_v7 = vld [vmem:[%s5898_s24 + $0x10] sm:$0xff]  ;;  %1313 = vmatpush1.bf16.msra.mxu0 %v5557_v3  ;;  %s5786_s19 = smov 112   ;;  %vm1891_vm10 = vcmask 965632   ;;  %vm2036_vm11 = vcmask 834560  }
  0x14   : > { %v482_v8 = vrot.slane %v445_v5, 1  ;;  %v483_v9 = vrot.slane %v446_v6, 1  ;;  %v485_v10 = vrot.slane %v5903_v7, 1  ;;  %v516_v11 = vrot.slane %v445_v5, 3  ;;  %1314 = vmatprep.subr.bf16.mxu0 %v5558_v4  ;;  %v448_v22 = vld [vmem:[%s5898_s24 + $0x18] sm:$0xf] }
  0x15   : > { %v517_v13 = vrot.slane %v446_v6, 3  ;;  %v519_v14 = vrot.slane %v5903_v7, 3  ;;  %v499_v15 = vrot.slane %v445_v5, 2  ;;  %v500_v16 = vrot.slane %v446_v6, 2  ;;  %v449_v23 = vld [vmem:[%s5898_s24 + $0x20] sm:$0xff]  ;;  %v5919_v24 = vld [vmem:[%s5898_s24 + $0x28] sm:$0xff] }
  0x16   : > { %v484_v18 = vsel %vm481_vm0, %v482_v8, %v483_v9  ;;  %v486_v19 = vsel %vm481_vm0, %v483_v9, %v485_v10  ;;  %v502_v20 = vrot.slane %v5903_v7, 2  ;;  %v533_v21 = vrot.slane %v445_v5, 4  ;;  %v451_v46 = vld [vmem:[%s5898_s24 + $0x30] sm:$0xff]  ;;  %v452_v51 = vld [vmem:[%s5898_s24 + $0x38] sm:$0xf]  ;;  %v5949_v0 = vld [vmem:[%s5898_s24 + $0x40] sm:$0xff] }
  0x17   : > { %v4952_v25 = vpack.i.bf16 %v486_v19, %v484_v18  ;;  %v518_v26 = vsel %vm515_vm1, %v516_v11, %v517_v13  ;;  %v520_v27 = vsel %vm515_vm1, %v517_v13, %v519_v14  ;;  %v501_v28 = vsel %vm498_vm2, %v499_v15, %v500_v16  ;;  %1315 = vmatpush1.bf16.msra.mxu0 %v5560_v12  ;;  %v5952_v1 = vld [vmem:[%s5898_s24 + $0x48] sm:$0xff]  ;;  %v5567_v11 = vld [vmem:[%s7883_s1 + $0x54] ss:$8 sps:$4 sm:$0xff]   ;;  %v5569_v15 = vld [vmem:[%s7883_s1 + $0x50] ss:$8 sps:$4 sm:$0xff]   ;;  %s5790_s14 = smov 120  }
  0x18   : > { %v4962_v29 = vpack.i.bf16 %v520_v27, %v518_v26  ;;  %v503_v30 = vsel %vm498_vm2, %v500_v16, %v502_v20  ;;  %v534_v31 = vrot.slane %v446_v6, 4  ;;  %v536_v32 = vrot.slane %v5903_v7, 4  ;;  %1316 = vmatprep.subr.bf16.mxu0 %v5561_v17  ;;  %v5566_v5 = vld [vmem:[%s7883_s1 + $0x40] ss:$8 sps:$4 sm:$0xff]   ;;  %v5570_v19 = vld [vmem:[%s7883_s1 + $0x64] ss:$8 sps:$4 sm:$0xff]  }
  0x19   : > { %4953 = vrot.lane.b32.xlu0 %v4952_v25, %s5783_s16  ;;  %v4957_v34 = vpack.i.bf16 %v503_v30, %v501_v28  ;;  %v487_v35 = vrot.slane %v448_v22, 1  ;;  %v569_v36 = vrot.slane %v449_v23, 1  ;;  %v570_v37 = vrot.slane %v5919_v24, 1  ;;  %s5791_s15 = smov 96   ;;  %s5794_s20 = smov 12  }
  0x1a   : > { %4963 = vrot.lane.b32.xlu1 %v4962_v29, %s5784_s17  ;;  %v535_v38 = vsel %vm532_vm3, %v533_v21, %v534_v31  ;;  %v537_v39 = vsel %vm532_vm3, %v534_v31, %v536_v32  ;;  %v504_v40 = vrot.slane %v448_v22, 2  ;;  %v585_v41 = vrot.slane %v449_v23, 2  ;;  %s5795_s30 = smov 80   ;;  %p440_p4 = scmp.lt.s32.totalorder %s5875_s26, 1 }
  0x1b   : > { %v4967_v42 = vpack.i.bf16 %v537_v39, %v535_v38  ;;  %v488_v43 = vsel %vm481_vm0, %v485_v10, %v487_v35  ;;  %v571_v44 = vsel %vm481_vm0, %v569_v36, %v570_v37  ;;  %v586_v45 = vrot.slane %v5919_v24, 2  ;;  %1317 = vmatpush1.bf16.msra.mxu0 %v5563_v33  ;;  %v5965_v10 = vld [vmem:[%s5898_s24 + $0x50] sm:$0xff]  ;;  %v5995_v33 = vld [vmem:[%s5898_s24 + $0x58] sm:$0xf]  ;;  %v457_v38 = vld [vmem:[%s5898_s24 + $0x60] sm:$0xff] }
  0x1c   : > { %v4972_v47 = vpack.i.bf16 %v571_v44, %v488_v43  ;;  %v505_v48 = vsel %vm498_vm2, %v502_v20, %v504_v40  ;;  %v521_v49 = vrot.slane %v448_v22, 3  ;;  %v601_v50 = vrot.slane %v449_v23, 3  ;;  %1318 = vmatprep.subr.bf16.mxu0 %v5564_v2  ;;  %v6003_v39 = vld [vmem:[%s5898_s24 + $0x68] sm:$0xff]  ;;  %v5575_v40 = vld [vmem:[%s7883_s1 + $0x70] ss:$8 sps:$4 sm:$0xff]   ;;  %s7929_s26 = smov (!%p440_p4, %s5875_s26), 1 }
  0x1d   : > { %4958 = vrot.lane.b32.xlu0 %v4957_v34, %s5785_s18  ;;  %v587_v52 = vsel %vm498_vm2, %v585_v41, %v586_v45  ;;  %v602_v53 = vrot.slane %v5919_v24, 3  ;;  %v538_v54 = vrot.slane %v448_v22, 4  ;;  %v617_v55 = vrot.slane %v449_v23, 4  ;;  %v5573_v34 = vld [vmem:[%s7883_s1 + $0x74] ss:$8 sps:$4 sm:$0xff]   ;;  %s4625_s28 = sshll.u32 %s7929_s26, 3 }
  0x1e   : > { %4968 = vrot.lane.b32.xlu1 %v4967_v42, %s5786_s19  ;;  %v4977_v56 = vpack.i.bf16 %v587_v52, %v505_v48  ;;  %v522_v57 = vsel %vm515_vm1, %v519_v14, %v521_v49  ;;  %v618_v58 = vrot.slane %v5919_v24, 4  ;;  %v572_v59 = vrot.slane %v451_v46, 1  ;;  %v5572_v24 = vld [vmem:[%s7883_s1 + $0x60] ss:$8 sps:$4 sm:$0xff]  }
  0x1f   : > { %v603_v60 = vsel %vm515_vm1, %v601_v50, %v602_v53  ;;  %v539_v61 = vsel %vm532_vm3, %v536_v32, %v538_v54  ;;  %v574_v62 = vrot.slane %v452_v51, 1  ;;  %v588_v63 = vrot.slane %v451_v46, 2  ;;  %1319 = vmatpush1.bf16.msra.mxu0 %v5566_v5 }
  0x20   : > { %v619_v3 = vsel %vm532_vm3, %v617_v55, %v618_v58  ;;  %v590_v4 = vrot.slane %v452_v51, 2  ;;  %v4982_v6 = vpack.i.bf16 %v603_v60, %v522_v57  ;;  %v573_v7 = vsel %vm481_vm0, %v570_v37, %v572_v59  ;;  %1320 = vmatprep.subr.bf16.mxu0 %v5567_v11 }
  0x21   : > { %4973 = vrot.lane.b32.xlu0 %v4972_v47, %s5783_s16  ;;  %v575_v8 = vsel %vm481_vm0, %v572_v59, %v574_v62  ;;  %v604_v9 = vrot.slane %v451_v46, 3  ;;  %v4987_v12 = vpack.i.bf16 %v619_v3, %v539_v61  ;;  %v606_v13 = vrot.slane %v452_v51, 3  ;;  %v6031_v61 = vld [vmem:[%s5898_s24 + $0x70] sm:$0xff]  ;;  %v6034_v62 = vld [vmem:[%s5898_s24 + $0x78] sm:$0xf] }
  0x22   : > { %4978 = vrot.lane.b32.xlu1 %v4977_v56, %s5785_s18  ;;  %v620_v14 = vrot.slane %v451_v46, 4  ;;  %v589_v16 = vsel %vm498_vm2, %v586_v45, %v588_v63  ;;  %v591_v17 = vsel %vm498_vm2, %v588_v63, %v590_v4  ;;  %v622_v18 = vrot.slane %v452_v51, 4  ;;  %v5576_v45 = vld [vmem:[%s7883_s1 + $0x84] ss:$8 sps:$4 sm:$0x3f]  }
  0x23   : > { %v4992_v20 = vpack.i.bf16 %v575_v8, %v573_v7  ;;  %v605_v21 = vsel %vm515_vm1, %v602_v53, %v604_v9  ;;  %v649_v22 = vrot.slane %v5949_v0, 1  ;;  %v650_v23 = vrot.slane %v5952_v1, 1  ;;  %1321 = vmatpush1.bf16.msra.mxu0 %v5569_v15 }
  0x24   : > { %v607_v25 = vsel %vm515_vm1, %v604_v9, %v606_v13  ;;  %v621_v26 = vsel %vm532_vm3, %v618_v58, %v620_v14  ;;  %v623_v27 = vsel %vm532_vm3, %v620_v14, %v622_v18  ;;  %v652_v28 = vrot.slane %v5965_v10, 1  ;;  %1322 = vmatprep.subr.bf16.mxu0 %v5570_v19 }
  0x25   : > { %4983 = vrot.lane.b32.xlu0 %v4982_v6, %s5784_s17  ;;  %v4997_v29 = vpack.i.bf16 %v591_v17, %v589_v16  ;;  %v665_v30 = vrot.slane %v5949_v0, 2  ;;  %v666_v31 = vrot.slane %v5952_v1, 2  ;;  %v668_v32 = vrot.slane %v5965_v10, 2 }
  0x26   : > { %4988 = vrot.lane.b32.xlu1 %v4987_v12, %s5786_s19  ;;  %v5002_v35 = vpack.i.bf16 %v607_v25, %v605_v21  ;;  %v5007_v36 = vpack.i.bf16 %v623_v27, %v621_v26  ;;  %v651_v37 = vsel %vm481_vm0, %v649_v22, %v650_v23  ;;  %v653_v41 = vsel %vm481_vm0, %v650_v23, %v652_v28  ;;  %v6062_v25 = vld [vmem:[%s5898_s24 + $0x80] sm:$0xff] }
  0x27   : > { %v681_v42 = vrot.slane %v5949_v0, 3  ;;  %v682_v43 = vrot.slane %v5952_v1, 3  ;;  %v684_v44 = vrot.slane %v5965_v10, 3  ;;  %v667_v46 = vsel %vm498_vm2, %v665_v30, %v666_v31  ;;  %1323 = vmatpush1.bf16.msra.mxu0 %v5572_v24  ;;  %v6069_v30 = vld [vmem:[%s5898_s24 + $0x88] sm:$0xff] }
  0x28   : > { %v669_v47 = vsel %vm498_vm2, %v666_v31, %v668_v32  ;;  %v697_v48 = vrot.slane %v5949_v0, 4  ;;  %v698_v49 = vrot.slane %v5952_v1, 4  ;;  %v700_v50 = vrot.slane %v5965_v10, 4  ;;  %1324 = vmatprep.subr.bf16.mxu0 %v5573_v34 }
  0x29   : > { %4993 = vrot.lane.b32.xlu0 %v4992_v20, %s5783_s16  ;;  %v5012_v51 = vpack.i.bf16 %v653_v41, %v651_v37  ;;  %v654_v52 = vrot.slane %v5995_v33, 1  ;;  %v5017_v53 = vpack.i.bf16 %v669_v47, %v667_v46  ;;  %v683_v54 = vsel %vm515_vm1, %v681_v42, %v682_v43  ;;  %v6086_v41 = vld [vmem:[%s5898_s24 + $0xa8] sm:$0xff] }
  0x2a   : > { %4998 = vrot.lane.b32.xlu1 %v4997_v29, %s5785_s18  ;;  %v729_v55 = vrot.slane %v457_v38, 1  ;;  %v730_v56 = vrot.slane %v6003_v39, 1  ;;  %v685_v57 = vsel %vm515_vm1, %v682_v43, %v684_v44  ;;  %v670_v58 = vrot.slane %v5995_v33, 2 }
  0x2b   : > { %v745_v59 = vrot.slane %v457_v38, 2  ;;  %v746_v60 = vrot.slane %v6003_v39, 2  ;;  %1325 = vmatpush1.bf16.msra.mxu0 %v5575_v40  ;;  %v699_v63 = vsel %vm532_vm3, %v697_v48, %v698_v49  ;;  %v701_v0 = vsel %vm532_vm3, %v698_v49, %v700_v50  ;;  %v6083_v40 = vld [vmem:[%s5898_s24 + $0xa0] sm:$0xff] }
  0x2c   : > { %v686_v1 = vrot.slane %v5995_v33, 3  ;;  %v761_v2 = vrot.slane %v457_v38, 3  ;;  %4644 = vmatprep.subr.msk.bf16.mxu0 %vm498_vm2, %v5576_v45  ;;  %v762_v3 = vrot.slane %v6003_v39, 3  ;;  %v702_v4 = vrot.slane %v5995_v33, 4  ;;  %v6074_v33 = vld [vmem:[%s5898_s24 + $0x90] sm:$0xff] }
  0x2d   : > { %5003 = vrot.lane.b32.xlu0 %v5002_v35, %s5784_s17  ;;  %v5022_v5 = vpack.i.bf16 %v685_v57, %v683_v54  ;;  %v777_v6 = vrot.slane %v457_v38, 4  ;;  %v5027_v7 = vpack.i.bf16 %v701_v0, %v699_v63  ;;  %v655_v8 = vsel %vm481_vm0, %v652_v28, %v654_v52 }
  0x2e   : > { %5008 = vrot.lane.b32.xlu1 %v5007_v36, %s5786_s19  ;;  %v731_v9 = vsel %vm481_vm0, %v729_v55, %v730_v56  ;;  %v778_v10 = vrot.slane %v6003_v39, 4  ;;  %v671_v11 = vsel %vm498_vm2, %v668_v32, %v670_v58  ;;  %v747_v12 = vsel %vm498_vm2, %v745_v59, %v746_v60  ;;  %v6080_v39 = vld [vmem:[%s5898_s24 + $0x98] sm:$0xf] }
  0x2f   : > { %v732_v13 = vrot.slane %v6031_v61, 1  ;;  %v734_v14 = vrot.slane %v6034_v62, 1  ;;  %v748_v15 = vrot.slane %v6031_v61, 2  ;;  %v750_v16 = vrot.slane %v6034_v62, 2 }
  0x30   : > { %v5032_v17 = vpack.i.bf16 %v731_v9, %v655_v8  ;;  %v5037_v18 = vpack.i.bf16 %v747_v12, %v671_v11  ;;  %v687_v19 = vsel %vm515_vm1, %v684_v44, %v686_v1  ;;  %v763_v20 = vsel %vm515_vm1, %v761_v2, %v762_v3  ;;  %v6130_v11 = vld [vmem:[%s5898_s24 + $0xb0] sm:$0xff]  ;;  %v6133_v12 = vld [vmem:[%s5898_s24 + $0xb8] sm:$0xf] }
  0x31   : > { %5013 = vrot.lane.b32.xlu0 %v5012_v51, %s5783_s16  ;;  %v703_v21 = vsel %vm532_vm3, %v700_v50, %v702_v4  ;;  %v779_v22 = vsel %vm532_vm3, %v777_v6, %v778_v10  ;;  %v733_v23 = vsel %vm481_vm0, %v730_v56, %v732_v13  ;;  %v764_v24 = vrot.slane %v6031_v61, 3 }
  0x32   : > { %5018 = vrot.lane.b32.xlu1 %v5017_v53, %s5785_s18  ;;  %v735_v26 = vsel %vm481_vm0, %v732_v13, %v734_v14  ;;  %v749_v27 = vsel %vm498_vm2, %v746_v60, %v748_v15  ;;  %v751_v28 = vsel %vm498_vm2, %v748_v15, %v750_v16  ;;  %v766_v29 = vrot.slane %v6034_v62, 3 }
  0x33   : > { %v5042_v31 = vpack.i.bf16 %v763_v20, %v687_v19  ;;  %v780_v32 = vrot.slane %v6031_v61, 4  ;;  %v5047_v34 = vpack.i.bf16 %v779_v22, %v703_v21  ;;  %v782_v35 = vrot.slane %v6034_v62, 4 }
  0x34   : > { %v5052_v36 = vpack.i.bf16 %v735_v26, %v733_v23  ;;  %v5057_v37 = vpack.i.bf16 %v751_v28, %v749_v27  ;;  %v765_v38 = vsel %vm515_vm1, %v762_v3, %v764_v24  ;;  %v767_v42 = vsel %vm515_vm1, %v764_v24, %v766_v29  ;;  %v6147_v23 = vld [vmem:[%s5898_s24 + $0xc8] sm:$0xff]  ;;  %v6150_v24 = vld [vmem:[%s5898_s24 + $0xd0] sm:$0xff] }
  0x35   : > { %5023 = vrot.lane.b32.xlu0 %v5022_v5, %s5784_s17  ;;  %v809_v43 = vrot.slane %v6062_v25, 1  ;;  %v810_v44 = vrot.slane %v6069_v30, 1  ;;  %v812_v45 = vrot.slane %v6074_v33, 1  ;;  %v781_v46 = vsel %vm532_vm3, %v778_v10, %v780_v32 }
  0x36   : > { %5028 = vrot.lane.b32.xlu1 %v5027_v7, %s5786_s19  ;;  %v825_v47 = vrot.slane %v6062_v25, 2  ;;  %v826_v48 = vrot.slane %v6069_v30, 2  ;;  %v828_v49 = vrot.slane %v6074_v33, 2  ;;  %v783_v50 = vsel %vm532_vm3, %v780_v32, %v782_v35 }
  0x37   : > { %v841_v51 = vrot.slane %v6062_v25, 3  ;;  %v842_v52 = vrot.slane %v6069_v30, 3  ;;  %v844_v53 = vrot.slane %v6074_v33, 3  ;;  %v857_v54 = vrot.slane %v6062_v25, 4 }
  0x38   : > { %v858_v55 = vrot.slane %v6069_v30, 4  ;;  %v860_v56 = vrot.slane %v6074_v33, 4  ;;  %v814_v57 = vrot.slane %v6080_v39, 1  ;;  %v889_v58 = vrot.slane %v6083_v40, 1 }
  0x39   : > { %5033 = vrot.lane.b32.xlu0 %v5032_v17, %s5783_s16  ;;  %v890_v59 = vrot.slane %v6086_v41, 1  ;;  %v5062_v60 = vpack.i.bf16 %v767_v42, %v765_v38  ;;  %v5067_v61 = vpack.i.bf16 %v783_v50, %v781_v46  ;;  %v811_v62 = vsel %vm481_vm0, %v809_v43, %v810_v44  ;;  %v6177_v46 = vld [vmem:[%s5898_s24 + $0xe0] sm:$0xff] }
  0x3a   : > { %5038 = vrot.lane.b32.xlu1 %v5037_v18, %s5785_s18  ;;  %v813_v63 = vsel %vm481_vm0, %v810_v44, %v812_v45  ;;  %v827_v0 = vsel %vm498_vm2, %v825_v47, %v826_v48  ;;  %v829_v1 = vsel %vm498_vm2, %v826_v48, %v828_v49  ;;  %v843_v2 = vsel %vm515_vm1, %v841_v51, %v842_v52  ;;  %v6141_v18 = vld [vmem:[%s5898_s24 + $0xc0] sm:$0xff]  ;;  %v6180_v47 = vld [vmem:[%s5898_s24 + $0xe8] sm:$0xff] }
  0x3b   : > { %v845_v3 = vsel %vm515_vm1, %v842_v52, %v844_v53  ;;  %v859_v4 = vsel %vm532_vm3, %v857_v54, %v858_v55  ;;  %v861_v5 = vsel %vm532_vm3, %v858_v55, %v860_v56  ;;  %v830_v6 = vrot.slane %v6080_v39, 2 }
  0x3c   : > { %v6120_v7 = vsel %vm481_vm0, %v812_v45, %v814_v57  ;;  %v6125_v8 = vsel %vm481_vm0, %v889_v58, %v890_v59  ;;  %v905_v9 = vrot.slane %v6083_v40, 2  ;;  %v906_v10 = vrot.slane %v6086_v41, 2 }
  0x3d   : > { %5043 = vrot.lane.b32.xlu0 %v5042_v31, %s5784_s17  ;;  %v5072_v13 = vpack.i.bf16 %v813_v63, %v811_v62  ;;  %v846_v14 = vrot.slane %v6080_v39, 3  ;;  %v5077_v15 = vpack.i.bf16 %v829_v1, %v827_v0  ;;  %v921_v16 = vrot.slane %v6083_v40, 3  ;;  %v6204_v1 = vld [vmem:[%s5898_s24 + $0xf0] sm:$0xff] }
  0x3e   : > { %5048 = vrot.lane.b32.xlu1 %v5047_v34, %s5786_s19  ;;  %v922_v17 = vrot.slane %v6086_v41, 3  ;;  %v5082_v19 = vpack.i.bf16 %v845_v3, %v843_v2  ;;  %v5087_v20 = vpack.i.bf16 %v861_v5, %v859_v4  ;;  %v5092_v21 = vpack.i.bf16 %v6125_v8, %v6120_v7 }
  0x3f   : > { %v831_v22 = vsel %vm498_vm2, %v828_v49, %v830_v6  ;;  %v907_v26 = vsel %vm498_vm2, %v905_v9, %v906_v10  ;;  %v862_v27 = vrot.slane %v6080_v39, 4  ;;  %v937_v28 = vrot.slane %v6083_v40, 4  ;;  %v6171_v39 = vld [vmem:[%s5898_s24 + $0xd8] sm:$0xf] }
  0x40   : > { %v938_v29 = vrot.slane %v6086_v41, 4  ;;  %v847_v31 = vsel %vm515_vm1, %v844_v53, %v846_v14  ;;  %v892_v32 = vrot.slane %v6130_v11, 1  ;;  %v894_v33 = vrot.slane %v6133_v12, 1  ;;  %v6211_v6 = vld [vmem:[%s5898_s24 + $0xf8] sm:$0xf] }
  0x41   : > { %5053 = vrot.lane.b32.xlu0 %v5052_v36, %s5783_s16  ;;  %v908_v34 = vrot.slane %v6130_v11, 2  ;;  %v923_v35 = vsel %vm515_vm1, %v921_v16, %v922_v17  ;;  %v910_v36 = vrot.slane %v6133_v12, 2  ;;  %v926_v38 = vrot.slane %v6133_v12, 3 }
  0x42   : > { %5058 = vrot.lane.b32.xlu1 %v5057_v37, %s5785_s18  ;;  %v924_v37 = vrot.slane %v6130_v11, 3  ;;  %v5097_v42 = vpack.i.bf16 %v907_v26, %v831_v22  ;;  %v940_v43 = vrot.slane %v6130_v11, 4  ;;  %v942_v44 = vrot.slane %v6133_v12, 4 }
  0x43   : > { %v969_v45 = vrot.slane %v6141_v18, 1  ;;  %v863_v48 = vsel %vm532_vm3, %v860_v56, %v862_v27  ;;  %v970_v49 = vrot.slane %v6147_v23, 1  ;;  %v972_v50 = vrot.slane %v6150_v24, 1 }
  0x44   : > { %v985_v51 = vrot.slane %v6141_v18, 2  ;;  %v5102_v52 = vpack.i.bf16 %v923_v35, %v847_v31  ;;  %v986_v53 = vrot.slane %v6147_v23, 2  ;;  %v988_v54 = vrot.slane %v6150_v24, 2 }
  0x45   : > { %5063 = vrot.lane.b32.xlu0 %v5062_v60, %s5784_s17  ;;  %v1001_v55 = vrot.slane %v6141_v18, 3  ;;  %v939_v56 = vsel %vm532_vm3, %v937_v28, %v938_v29  ;;  %v1002_v57 = vrot.slane %v6147_v23, 3  ;;  %v1004_v58 = vrot.slane %v6150_v24, 3 }
  0x46   : > { %5068 = vrot.lane.b32.xlu1 %v5067_v61, %s5786_s19  ;;  %v1017_v60 = vrot.slane %v6141_v18, 4  ;;  %v893_v61 = vsel %vm481_vm0, %v890_v59, %v892_v32  ;;  %v1018_v62 = vrot.slane %v6147_v23, 4  ;;  %v1020_v63 = vrot.slane %v6150_v24, 4  ;;  %v5578_v59 = vld [vmem:[%s7883_s1 + $0x80] ss:$8 sps:$4 sm:$0x3f]  }
  0x47   : > { %v974_v0 = vrot.slane %v6171_v39, 1  ;;  %v1049_v2 = vrot.slane %v6177_v46, 1  ;;  %v1050_v3 = vrot.slane %v6180_v47, 1  ;;  %v990_v4 = vrot.slane %v6171_v39, 2 }
  0x48   : > { %v1065_v5 = vrot.slane %v6177_v46, 2  ;;  %v5107_v7 = vpack.i.bf16 %v939_v56, %v863_v48  ;;  %v895_v8 = vsel %vm481_vm0, %v892_v32, %v894_v33  ;;  %v1066_v9 = vrot.slane %v6180_v47, 2 }
  0x49   : > { %5073 = vrot.lane.b32.xlu0 %v5072_v13, %s5783_s16  ;;  %v1006_v12 = vrot.slane %v6171_v39, 3  ;;  %v909_v13 = vsel %vm498_vm2, %v906_v10, %v908_v34  ;;  %v911_v14 = vsel %vm498_vm2, %v908_v34, %v910_v36  ;;  %v1082_v16 = vrot.slane %v6180_v47, 3 }
  0x4a   : > { %5078 = vrot.lane.b32.xlu1 %v5077_v15, %s5785_s18  ;;  %v1081_v15 = vrot.slane %v6177_v46, 3  ;;  %v1052_v22 = vrot.slane %v6204_v1, 1  ;;  %v5112_v26 = vpack.i.bf16 %v895_v8, %v893_v61  ;;  %v5117_v27 = vpack.i.bf16 %v911_v14, %v909_v13 }
  0x4b   : > { %v1054_v10 = vrot.slane %v6211_v6, 1  ;;  %v1068_v28 = vrot.slane %v6204_v1, 2  ;;  %v925_v31 = vsel %vm515_vm1, %v922_v17, %v924_v37  ;;  %v927_v32 = vsel %vm515_vm1, %v924_v37, %v926_v38 }
  0x4c   : > { %v1070_v33 = vrot.slane %v6211_v6, 2  ;;  %v1305_v34 = vsel %vm498_vm2, %v5578_v59, 0  ;;  %v941_v35 = vsel %vm532_vm3, %v938_v29, %v940_v43  ;;  %v943_v36 = vsel %vm532_vm3, %v940_v43, %v942_v44 }
  0x4d   : > { %5083 = vrot.lane.b32.xlu0 %v5082_v19, %s5784_s17  ;;  %v1022_v19 = vrot.slane %v6171_v39, 4  ;;  %v1084_v39 = vrot.slane %v6204_v1, 3  ;;  %1327 = vmatpush1.bf16.msra.mxu0 %v1305_v34  ;;  %v5122_v17 = vpack.i.bf16 %v927_v32, %v925_v31  ;;  %v5127_v37 = vpack.i.bf16 %v943_v36, %v941_v35  ;;  %v5761_v35 = vld [vmem:[%s5898_s24 + $0x8] sm:$0xff] }
  0x4e   : > { %5088 = vrot.lane.b32.xlu1 %v5087_v20, %s5786_s19  ;;  %v1097_v20 = vrot.slane %v6177_v46, 4  ;;  %v971_v38 = vsel %vm481_vm0, %v969_v45, %v970_v49  ;;  %v973_v41 = vsel %vm481_vm0, %v970_v49, %v972_v50  ;;  %v987_v29 = vsel %vm498_vm2, %v985_v51, %v986_v53 }
  0x4f   : > { %v989_v43 = vsel %vm498_vm2, %v986_v53, %v988_v54  ;;  %v5132_v44 = vpack.i.bf16 %v973_v41, %v971_v38  ;;  %v1005_v45 = vsel %vm515_vm1, %v1002_v57, %v1004_v58  ;;  %v1019_v49 = vsel %vm532_vm3, %v1017_v60, %v1018_v62 }
  0x50   : > { %v5137_v48 = vpack.i.bf16 %v989_v43, %v987_v29  ;;  %v1021_v51 = vsel %vm532_vm3, %v1018_v62, %v1020_v63  ;;  %v991_v60 = vsel %vm498_vm2, %v988_v54, %v990_v4  ;;  %v1067_v61 = vsel %vm498_vm2, %v1065_v5, %v1066_v9 }
  0x51   : > { %5093 = vrot.lane.b32.xlu0 %v5092_v21, %s5783_s16  ;;  %v1098_v21 = vrot.slane %v6180_v47, 4  ;;  %v5147_v56 = vpack.i.bf16 %v1021_v51, %v1019_v49  ;;  %v5157_v59 = vpack.i.bf16 %v1067_v61, %v991_v60  ;;  %v1023_v54 = vsel %vm532_vm3, %v1020_v63, %v1022_v19  ;;  %v5763_v60 = vld [vmem:[%s5898_s24 + $0x20] sm:$0xff] }
  0x52   : > { %5098 = vrot.lane.b32.xlu1 %v5097_v42, %s5785_s18  ;;  %v1086_v42 = vrot.slane %v6211_v6, 3  ;;  %v1069_v63 = vsel %vm498_vm2, %v1066_v9, %v1068_v28  ;;  %v1071_v8 = vsel %vm498_vm2, %v1068_v28, %v1070_v33  ;;  %v1102_v13 = vrot.slane %v6211_v6, 4 }
  0x53   : > { %vm2574_vm12 = vcmask 982016   ;;  %vm2577_vm13 = vcmask 850944   ;;  %vm2579_vm14 = vcmask 785408   ;;  %vm3409_vm15 = vcmask 719872  }
  0x54   : > { %v1087_v19 = vsel %vm515_vm1, %v1084_v39, %v1086_v42 }
  0x55   : > { %5103 = vrot.lane.b32.xlu0 %v5102_v52, %s5784_s17  ;;  %v1003_v52 = vsel %vm515_vm1, %v1001_v55, %v1002_v57  ;;  %v975_v55 = vsel %vm481_vm0, %v972_v50, %v974_v0  ;;  %v1051_v57 = vsel %vm481_vm0, %v1049_v2, %v1050_v3  ;;  %v1007_v50 = vsel %vm515_vm1, %v1004_v58, %v1006_v12 }
  0x56   : > { %5108 = vrot.lane.b32.xlu1 %v5107_v7, %s5786_s19  ;;  %v5142_v53 = vpack.i.bf16 %v1005_v45, %v1003_v52  ;;  %v5152_v62 = vpack.i.bf16 %v1051_v57, %v975_v55  ;;  %v1083_v0 = vsel %vm515_vm1, %v1081_v15, %v1082_v16  ;;  %v1099_v2 = vsel %vm532_vm3, %v1097_v20, %v1098_v21 }
  0x57   : > { %v5162_v4 = vpack.i.bf16 %v1083_v0, %v1007_v50  ;;  %v5167_v5 = vpack.i.bf16 %v1099_v2, %v1023_v54  ;;  %v1053_v58 = vsel %vm481_vm0, %v1050_v3, %v1052_v22  ;;  %v1055_v7 = vsel %vm481_vm0, %v1052_v22, %v1054_v10 }
  0x58   : > { %v1100_v12 = vrot.slane %v6204_v1, 4  ;;  %v5172_v14 = vpack.i.bf16 %v1055_v7, %v1053_v58  ;;  %v5177_v15 = vpack.i.bf16 %v1071_v8, %v1069_v63  ;;  %v1085_v3 = vsel %vm515_vm1, %v1082_v16, %v1084_v39  ;;  %v5762_v39 = vld [vmem:[%s5898_s24] sm:$0xff] }
  0x59   : > { %5113 = vrot.lane.b32.xlu0 %v5112_v26, %s5783_s16  ;;  %v5182_v6 = vpack.i.bf16 %v1087_v19, %v1085_v3 }
  0x5a   : > { %5118 = vrot.lane.b32.xlu1 %v5117_v27, %s5785_s18  ;;  %v1101_v9 = vsel %vm532_vm3, %v1098_v21, %v1100_v12  ;;  %v1103_v20 = vsel %vm532_vm3, %v1100_v12, %v1102_v13 }
  0x5b   : > { %v5187_v22 = vpack.i.bf16 %v1103_v20, %v1101_v9 }
  0x5d   : > { %5123 = vrot.lane.b32.xlu0 %v5122_v17, %s5784_s17 }
  0x5e   : > { %5128 = vrot.lane.b32.xlu1 %v5127_v37, %s5786_s19 }
  0x61   : > { %5133 = vrot.lane.b32.xlu0 %v5132_v44, %s5783_s16 }
  0x62   : > { %5138 = vrot.lane.b32.xlu1 %v5137_v48, %s5785_s18 }
  0x65   : > { %5143 = vrot.lane.b32.xlu0 %v5142_v53, %s5784_s17 }
  0x66   : > { %5148 = vrot.lane.b32.xlu1 %v5147_v56, %s5786_s19 }
  0x69   : > { %5153 = vrot.lane.b32.xlu0 %v5152_v62, %s5783_s16  ;;  %v5764_v62 = vld [vmem:[%s5898_s24 + $0x10] sm:$0xff] }
  0x6a   : > { %5158 = vrot.lane.b32.xlu1 %v5157_v59, %s5785_s18 }
  0x6d   : > { %5163 = vrot.lane.b32.xlu0 %v5162_v4, %s5784_s17 }
  0x6e   : > { %5168 = vrot.lane.b32.xlu1 %v5167_v5, %s5786_s19 }
  0x71   : > { %5173 = vrot.lane.b32.xlu0 %v5172_v14, %s5783_s16 }
  0x72   : > { %5178 = vrot.lane.b32.xlu1 %v5177_v15, %s5785_s18  ;;  %s5788_s18 = smov 102  }
  0x75   : > { %5183 = vrot.lane.b32.xlu0 %v5182_v6, %s5784_s17  ;;  %s5787_s17 = smov 118  }
  0x76   : > { %5188 = vrot.lane.b32.xlu1 %v5187_v22, %s5786_s19 }
  0x8b   : > { %v4954_v16 = vpop.permute.xlu0 %4953 }
  0x8c   : > { %v4964_v26 = vpop.permute.xlu1 %4963  ;;  %v4956_v27 = vunpack.i.h.bf16 %v4954_v16  ;;  %v4955_v10 = vunpack.i.l.bf16 %v4954_v16  ;;  %v5765_v16 = vld [vmem:[%s5898_s24 + $0x30] sm:$0xff] }
  0x8d   : > { %v4966_v28 = vunpack.i.h.bf16 %v4964_v26  ;;  %v4965_v31 = vunpack.i.l.bf16 %v4964_v26 }
  0x8e   : > { %v551_v36 = vsel %vm549_vm4, %v5761_v35, %v4956_v27  ;;  %v550_v42 = vsel %vm549_vm4, %v5762_v39, %v4955_v10  ;;  %v5766_v27 = vld [vmem:[%s5898_s24 + $0x28] sm:$0xff] }
  0x8f   : > { %v4959_v21 = vpop.permute.xlu0 %4958 }
  0x90   : > { %v4961_v32 = vunpack.i.h.bf16 %v4959_v21  ;;  %v4960_v33 = vunpack.i.l.bf16 %v4959_v21  ;;  %v4969_v34 = vpop.permute.xlu1 %4968 }
  0x91   : > { %v4971_v17 = vunpack.i.h.bf16 %v4969_v34  ;;  %v4970_v37 = vunpack.i.l.bf16 %v4969_v34 }
  0x92   : > { %v554_v38 = vsel %vm553_vm5, %v550_v42, %v4960_v33  ;;  %v555_v41 = vsel %vm553_vm5, %v551_v36, %v4961_v32 }
  0x93   : > { %v4974_v29 = vpop.permute.xlu0 %4973  ;;  %v1126_v43 = vpack.c.bf16 %v4971_v17, %v4970_v37  ;;  %v558_v44 = vsel %vm557_vm6, %v554_v38, %v4965_v31  ;;  %v559_v48 = vsel %vm557_vm6, %v555_v41, %v4966_v28 }
  0x94   : > { %v4976_v52 = vunpack.i.h.bf16 %v4974_v29  ;;  %v4975_v45 = vunpack.i.l.bf16 %v4974_v29  ;;  %v4979_v49 = vpop.permute.xlu1 %4978  ;;  %v562_v51 = vsel %vm561_vm7, %v558_v44, %v4970_v37  ;;  %v563_v53 = vsel %vm561_vm7, %v559_v48, %v4971_v17 }
  0x95   : > { %v4981_v56 = vunpack.i.h.bf16 %v4979_v49  ;;  %v4980_v55 = vunpack.i.l.bf16 %v4979_v49  ;;  %4645 = vmatprep.mubr.msk.bf16.mxu0 %vm1267_vm8, %v1126_v43  ;;  %v1125_v57 = vpack.c.bf16 %v563_v53, %v562_v51  ;;  %v5767_v49 = vld [vmem:[%s5898_s24 + $0x48] sm:$0xff]  ;;  %v5768_v53 = vld [vmem:[%s5898_s24 + $0x40] sm:$0xff] }
  0x96   : > { %v633_v61 = vsel %vm549_vm4, %v5763_v60, %v4976_v52  ;;  %v552_v59 = vsel %vm549_vm4, %v5764_v62, %v4975_v45 }
  0x97   : > { %v556_v50 = vsel %vm553_vm5, %v552_v59, %v4980_v55  ;;  %v636_v0 = vsel %vm553_vm5, %v633_v61, %v4981_v56  ;;  %v4984_v54 = vpop.permute.xlu0 %4983  ;;  %1343 = vmatmul.mubr.bf16.vlgmr.msra.gmra.mrb[0].mxu0 %v1125_v57 }
  0x98   : > { %v4986_v2 = vunpack.i.h.bf16 %v4984_v54  ;;  %v4985_v4 = vunpack.i.l.bf16 %v4984_v54  ;;  %v4989_v5 = vpop.permute.xlu1 %4988 }
  0x99   : > { %v4991_v58 = vunpack.i.h.bf16 %v4989_v5  ;;  %v4990_v7 = vunpack.i.l.bf16 %v4989_v5 }
  0x9a   : > { %v560_v63 = vsel %vm557_vm6, %v556_v50, %v4985_v4  ;;  %v639_v8 = vsel %vm557_vm6, %v636_v0, %v4986_v2 }
  0x9b   : > { %v1128_v12 = vpack.c.bf16 %v4991_v58, %v4990_v7  ;;  %v4994_v13 = vpop.permute.xlu0 %4993  ;;  %v564_v14 = vsel %vm561_vm7, %v560_v63, %v4990_v7  ;;  %v642_v15 = vsel %vm561_vm7, %v639_v8, %v4991_v58 }
  0x9c   : > { %v4996_v3 = vunpack.i.h.bf16 %v4994_v13  ;;  %v4995_v19 = vunpack.i.l.bf16 %v4994_v13  ;;  %v4999_v9 = vpop.permute.xlu1 %4998  ;;  %v1127_v20 = vpack.c.bf16 %v642_v15, %v564_v14 }
  0x9d   : > { %v5001_v6 = vunpack.i.h.bf16 %v4999_v9  ;;  %v5000_v22 = vunpack.i.l.bf16 %v4999_v9  ;;  %4646 = vmatprep.mubr.msk.bf16.mxu0 %vm1267_vm8, %v1128_v12  ;;  %v5770_v9 = vld [vmem:[%s5898_s24 + $0x50] sm:$0xff] }
  0x9e   : > { %v635_v26 = vsel %vm549_vm4, %v5765_v16, %v4996_v3  ;;  %v634_v10 = vsel %vm549_vm4, %v5766_v27, %v4995_v19  ;;  %v5769_v3 = vld [vmem:[%s5898_s24 + $0x60] sm:$0xff] }
  0x9f   : > { %v637_v21 = vsel %vm553_vm5, %v634_v10, %v5000_v22  ;;  %v638_v28 = vsel %vm553_vm5, %v635_v26, %v5001_v6  ;;  %v5004_v31 = vpop.permute.xlu0 %5003  ;;  %1353 = vmatmul.mubr.bf16.gmra.mrb[4].mxu0 %v1127_v20 }
  0xa0   : > { %v5006_v32 = vunpack.i.h.bf16 %v5004_v31  ;;  %v5005_v33 = vunpack.i.l.bf16 %v5004_v31  ;;  %v5009_v34 = vpop.permute.xlu1 %5008 }
  0xa1   : > { %v5011_v35 = vunpack.i.h.bf16 %v5009_v34  ;;  %v5010_v36 = vunpack.i.l.bf16 %v5009_v34 }
  0xa2   : > { %v640_v39 = vsel %vm557_vm6, %v637_v21, %v5005_v33  ;;  %v641_v42 = vsel %vm557_vm6, %v638_v28, %v5006_v32 }
  0xa3   : > { %v1130_v17 = vpack.c.bf16 %v5011_v35, %v5010_v36  ;;  %v5014_v37 = vpop.permute.xlu0 %5013  ;;  %v643_v38 = vsel %vm561_vm7, %v640_v39, %v5010_v36  ;;  %v644_v41 = vsel %vm561_vm7, %v641_v42, %v5011_v35 }
  0xa4   : > { %v5016_v29 = vunpack.i.h.bf16 %v5014_v37  ;;  %v5015_v43 = vunpack.i.l.bf16 %v5014_v37  ;;  %v5019_v44 = vpop.permute.xlu1 %5018  ;;  %v1129_v48 = vpack.c.bf16 %v644_v41, %v643_v38 }
  0xa5   : > { %v5021_v52 = vunpack.i.h.bf16 %v5019_v44  ;;  %v5020_v45 = vunpack.i.l.bf16 %v5019_v44  ;;  %4647 = vmatprep.mubr.msk.bf16.mxu0 %vm1267_vm8, %v1130_v17  ;;  %v5772_v44 = vld [vmem:[%s5898_s24 + $0x68] sm:$0xff] }
  0xa6   : > { %v714_v51 = vsel %vm549_vm4, %v5767_v49, %v5016_v29  ;;  %v713_v56 = vsel %vm549_vm4, %v5768_v53, %v5015_v43  ;;  %v5771_v29 = vld [vmem:[%s5898_s24 + $0x70] sm:$0xff] }
  0xa7   : > { %v716_v55 = vsel %vm553_vm5, %v713_v56, %v5020_v45  ;;  %v717_v57 = vsel %vm553_vm5, %v714_v51, %v5021_v52  ;;  %v5024_v60 = vpop.permute.xlu0 %5023  ;;  %1363 = vmatmul.mubr.bf16.gmra.mrb[8].mxu0 %v1129_v48 }
  0xa8   : > { %v5026_v61 = vunpack.i.h.bf16 %v5024_v60  ;;  %v5025_v62 = vunpack.i.l.bf16 %v5024_v60  ;;  %v5029_v59 = vpop.permute.xlu1 %5028 }
  0xa9   : > { %v5031_v50 = vunpack.i.h.bf16 %v5029_v59  ;;  %v5030_v0 = vunpack.i.l.bf16 %v5029_v59 }
  0xaa   : > { %v719_v54 = vsel %vm557_vm6, %v716_v55, %v5025_v62  ;;  %v720_v2 = vsel %vm557_vm6, %v717_v57, %v5026_v61 }
  0xab   : > { %v1132_v4 = vpack.c.bf16 %v5031_v50, %v5030_v0  ;;  %v5034_v5 = vpop.permute.xlu0 %5033  ;;  %v722_v58 = vsel %vm561_vm7, %v719_v54, %v5030_v0  ;;  %v723_v7 = vsel %vm561_vm7, %v720_v2, %v5031_v50 }
  0xac   : > { %v5036_v63 = vunpack.i.h.bf16 %v5034_v5  ;;  %v5035_v8 = vunpack.i.l.bf16 %v5034_v5  ;;  %v5039_v12 = vpop.permute.xlu1 %5038  ;;  %v1131_v13 = vpack.c.bf16 %v723_v7, %v722_v58 }
  0xad   : > { %v5041_v14 = vunpack.i.h.bf16 %v5039_v12  ;;  %v5040_v15 = vunpack.i.l.bf16 %v5039_v12  ;;  %4648 = vmatprep.mubr.msk.bf16.mxu0 %vm1267_vm8, %v1132_v4 }
  0xae   : > { %v793_v19 = vsel %vm549_vm4, %v5769_v3, %v5036_v63  ;;  %v715_v20 = vsel %vm549_vm4, %v5770_v9, %v5035_v8 }
  0xaf   : > { %v718_v6 = vsel %vm553_vm5, %v715_v20, %v5040_v15  ;;  %v796_v22 = vsel %vm553_vm5, %v793_v19, %v5041_v14  ;;  %v5044_v16 = vpop.permute.xlu0 %5043  ;;  %1373 = vmatmul.mubr.bf16.gmra.mrb[12].mxu0 %v1131_v13 }
  0xb0   : > { %v5046_v26 = vunpack.i.h.bf16 %v5044_v16  ;;  %v5045_v27 = vunpack.i.l.bf16 %v5044_v16  ;;  %v5049_v10 = vpop.permute.xlu1 %5048 }
  0xb1   : > { %v5051_v21 = vunpack.i.h.bf16 %v5049_v10  ;;  %v5050_v28 = vunpack.i.l.bf16 %v5049_v10 }
  0xb2   : > { %v721_v31 = vsel %vm557_vm6, %v718_v6, %v5045_v27  ;;  %v799_v32 = vsel %vm557_vm6, %v796_v22, %v5046_v26 }
  0xb3   : > { %v1134_v33 = vpack.c.bf16 %v5051_v21, %v5050_v28  ;;  %v5054_v34 = vpop.permute.xlu0 %5053  ;;  %v724_v35 = vsel %vm561_vm7, %v721_v31, %v5050_v28  ;;  %v802_v36 = vsel %vm561_vm7, %v799_v32, %v5051_v21 }
  0xb4   : > { %v5056_v39 = vunpack.i.h.bf16 %v5054_v34  ;;  %v5055_v42 = vunpack.i.l.bf16 %v5054_v34  ;;  %v5059_v17 = vpop.permute.xlu1 %5058  ;;  %v1133_v37 = vpack.c.bf16 %v802_v36, %v724_v35  ;;  %v5773_v34 = vld [vmem:[%s5898_s24 + $0x90] sm:$0xff] }
  0xb5   : > { %v5061_v38 = vunpack.i.h.bf16 %v5059_v17  ;;  %v5060_v41 = vunpack.i.l.bf16 %v5059_v17  ;;  %4649 = vmatprep.mubr.msk.bf16.mxu0 %vm1267_vm8, %v1134_v33 }
  0xb6   : > { %v795_v43 = vsel %vm549_vm4, %v5771_v29, %v5056_v39  ;;  %v794_v48 = vsel %vm549_vm4, %v5772_v44, %v5055_v42 }
  0xb7   : > { %v797_v52 = vsel %vm553_vm5, %v794_v48, %v5060_v41  ;;  %v798_v45 = vsel %vm553_vm5, %v795_v43, %v5061_v38  ;;  %v5064_v49 = vpop.permute.xlu0 %5063  ;;  %1383 = vmatmul.mubr.bf16.gmra.mrb[16].mxu0 %v1133_v37 }
  0xb8   : > { %v5066_v51 = vunpack.i.h.bf16 %v5064_v49  ;;  %v5065_v53 = vunpack.i.l.bf16 %v5064_v49  ;;  %v5069_v56 = vpop.permute.xlu1 %5068 }
  0xb9   : > { %v5071_v55 = vunpack.i.h.bf16 %v5069_v56  ;;  %v5070_v57 = vunpack.i.l.bf16 %v5069_v56 }
  0xba   : > { %v800_v60 = vsel %vm557_vm6, %v797_v52, %v5065_v53  ;;  %v801_v61 = vsel %vm557_vm6, %v798_v45, %v5066_v51 }
  0xbb   : > { %v1136_v62 = vpack.c.bf16 %v5071_v55, %v5070_v57  ;;  %v5074_v59 = vpop.permute.xlu0 %5073  ;;  %v803_v50 = vsel %vm561_vm7, %v800_v60, %v5070_v57  ;;  %v804_v0 = vsel %vm561_vm7, %v801_v61, %v5071_v55  ;;  %v5774_v61 = vld [vmem:[%s5898_s24 + $0xa8] sm:$0xff]  ;;  %s5792_s24 = smov 104  }
  0xbc   : > { %v5076_v54 = vunpack.i.h.bf16 %v5074_v59  ;;  %v5075_v2 = vunpack.i.l.bf16 %v5074_v59  ;;  %v5079_v4 = vpop.permute.xlu1 %5078  ;;  %v1135_v5 = vpack.c.bf16 %v804_v0, %v803_v50 }
  0xbd   : > { %v5081_v58 = vunpack.i.h.bf16 %v5079_v4  ;;  %v5080_v7 = vunpack.i.l.bf16 %v5079_v4  ;;  %4650 = vmatprep.mubr.msk.bf16.mxu0 %vm1267_vm8, %v1136_v62 }
  0xbe   : > { %v874_v63 = vsel %vm549_vm4, %v6069_v30, %v5076_v54  ;;  %v873_v8 = vsel %vm549_vm4, %v6062_v25, %v5075_v2 }
  0xbf   : > { %v876_v12 = vsel %vm553_vm5, %v873_v8, %v5080_v7  ;;  %v877_v13 = vsel %vm553_vm5, %v874_v63, %v5081_v58  ;;  %v5084_v14 = vpop.permute.xlu0 %5083  ;;  %1393 = vmatmul.mubr.bf16.gmra.mrb[20].mxu0 %v1135_v5 }
  0xc0   : > { %v5086_v15 = vunpack.i.h.bf16 %v5084_v14  ;;  %v5085_v3 = vunpack.i.l.bf16 %v5084_v14  ;;  %v5089_v19 = vpop.permute.xlu1 %5088 }
  0xc1   : > { %v5091_v9 = vunpack.i.h.bf16 %v5089_v19  ;;  %v5090_v20 = vunpack.i.l.bf16 %v5089_v19 }
  0xc2   : > { %v879_v6 = vsel %vm557_vm6, %v876_v12, %v5085_v3  ;;  %v880_v22 = vsel %vm557_vm6, %v877_v13, %v5086_v15 }
  0xc3   : > { %v1138_v30 = vpack.c.bf16 %v5091_v9, %v5090_v20  ;;  %v5094_v16 = vpop.permute.xlu0 %5093  ;;  %v882_v25 = vsel %vm561_vm7, %v879_v6, %v5090_v20  ;;  %v883_v26 = vsel %vm561_vm7, %v880_v22, %v5091_v9 }
  0xc4   : > { %v5096_v27 = vunpack.i.h.bf16 %v5094_v16  ;;  %v5095_v10 = vunpack.i.l.bf16 %v5094_v16  ;;  %v5099_v21 = vpop.permute.xlu1 %5098  ;;  %v1137_v28 = vpack.c.bf16 %v883_v26, %v882_v25 }
  0xc5   : > { %v5101_v31 = vunpack.i.h.bf16 %v5099_v21  ;;  %v5100_v32 = vunpack.i.l.bf16 %v5099_v21  ;;  %4651 = vmatprep.mubr.msk.bf16.mxu0 %vm1267_vm8, %v1138_v30 }
  0xc6   : > { %v953_v33 = vsel %vm549_vm4, %v6083_v40, %v5096_v27  ;;  %v875_v35 = vsel %vm549_vm4, %v5773_v34, %v5095_v10 }
  0xc7   : > { %v878_v36 = vsel %vm553_vm5, %v875_v35, %v5100_v32  ;;  %v956_v39 = vsel %vm553_vm5, %v953_v33, %v5101_v31  ;;  %v5104_v42 = vpop.permute.xlu0 %5103  ;;  %1403 = vmatmul.mubr.bf16.gmra.mrb[24].mxu0 %v1137_v28 }
  0xc8   : > { %v5106_v17 = vunpack.i.h.bf16 %v5104_v42  ;;  %v5105_v37 = vunpack.i.l.bf16 %v5104_v42  ;;  %v5109_v38 = vpop.permute.xlu1 %5108 }
  0xc9   : > { %v5111_v41 = vunpack.i.h.bf16 %v5109_v38  ;;  %v5110_v29 = vunpack.i.l.bf16 %v5109_v38 }
  0xca   : > { %v881_v43 = vsel %vm557_vm6, %v878_v36, %v5105_v37  ;;  %v959_v44 = vsel %vm557_vm6, %v956_v39, %v5106_v17 }
  0xcb   : > { %v1140_v40 = vpack.c.bf16 %v5111_v41, %v5110_v29  ;;  %v5114_v48 = vpop.permute.xlu0 %5113  ;;  %v884_v52 = vsel %vm561_vm7, %v881_v43, %v5110_v29  ;;  %v962_v45 = vsel %vm561_vm7, %v959_v44, %v5111_v41 }
  0xcc   : > { %v5116_v49 = vunpack.i.h.bf16 %v5114_v48  ;;  %v5115_v51 = vunpack.i.l.bf16 %v5114_v48  ;;  %v5119_v53 = vpop.permute.xlu1 %5118  ;;  %v1139_v56 = vpack.c.bf16 %v962_v45, %v884_v52 }
  0xcd   : > { %v5121_v55 = vunpack.i.h.bf16 %v5119_v53  ;;  %v5120_v57 = vunpack.i.l.bf16 %v5119_v53  ;;  %4652 = vmatprep.mubr.msk.bf16.mxu0 %vm1267_vm8, %v1140_v40 }
  0xce   : > { %v955_v60 = vsel %vm549_vm4, %v6130_v11, %v5116_v49  ;;  %v954_v62 = vsel %vm549_vm4, %v5774_v61, %v5115_v51 }
  0xcf   : > { %v957_v59 = vsel %vm553_vm5, %v954_v62, %v5120_v57  ;;  %v958_v50 = vsel %vm553_vm5, %v955_v60, %v5121_v55  ;;  %v5124_v0 = vpop.permute.xlu0 %5123  ;;  %1413 = vmatmul.mubr.bf16.gmra.mrb[28].mxu0 %v1139_v56 }
  0xd0   : > { %v5126_v54 = vunpack.i.h.bf16 %v5124_v0  ;;  %v5125_v2 = vunpack.i.l.bf16 %v5124_v0  ;;  %v5129_v4 = vpop.permute.xlu1 %5128 }
  0xd1   : > { %v5131_v5 = vunpack.i.h.bf16 %v5129_v4  ;;  %v5130_v58 = vunpack.i.l.bf16 %v5129_v4 }
  0xd2   : > { %v960_v7 = vsel %vm557_vm6, %v957_v59, %v5125_v2  ;;  %v961_v63 = vsel %vm557_vm6, %v958_v50, %v5126_v54 }
  0xd3   : > { %v1142_v8 = vpack.c.bf16 %v5131_v5, %v5130_v58  ;;  %v5134_v11 = vpop.permute.xlu0 %5133  ;;  %v963_v12 = vsel %vm561_vm7, %v960_v7, %v5130_v58  ;;  %v964_v13 = vsel %vm561_vm7, %v961_v63, %v5131_v5 }
  0xd4   : > { %v5136_v14 = vunpack.i.h.bf16 %v5134_v11  ;;  %v5135_v15 = vunpack.i.l.bf16 %v5134_v11  ;;  %v5139_v3 = vpop.permute.xlu1 %5138  ;;  %v1141_v19 = vpack.c.bf16 %v964_v13, %v963_v12 }
  0xd5   : > { %v5141_v9 = vunpack.i.h.bf16 %v5139_v3  ;;  %v5140_v20 = vunpack.i.l.bf16 %v5139_v3  ;;  %4653 = vmatprep.mubr.msk.bf16.mxu0 %vm1267_vm8, %v1142_v8  ;;  %v1169_v3 = vlaneseq }
  0xd6   : > { %v1034_v6 = vsel %vm549_vm4, %v6147_v23, %v5136_v14  ;;  %v1033_v22 = vsel %vm549_vm4, %v6141_v18, %v5135_v15 }
  0xd7   : > { %v1036_v30 = vsel %vm553_vm5, %v1033_v22, %v5140_v20  ;;  %v1037_v16 = vsel %vm553_vm5, %v1034_v6, %v5141_v9  ;;  %v5144_v25 = vpop.permute.xlu0 %5143  ;;  %1423 = vmatmul.mubr.bf16.gmra.mrb[32].mxu0 %v1141_v19  ;;  %v6453_v19 = vshrl.u32 %v1169_v3, 7  ;;  %v1167_v20 = vld [vmem:[%s7884_s2] sm:$0x3] }
  0xd8   : > { %v5146_v26 = vunpack.i.h.bf16 %v5144_v25  ;;  %v5145_v27 = vunpack.i.l.bf16 %v5144_v25  ;;  %v5149_v10 = vpop.permute.xlu1 %5148 }
  0xd9   : > { %v5151_v21 = vunpack.i.h.bf16 %v5149_v10  ;;  %v5150_v28 = vunpack.i.l.bf16 %v5149_v10  ;;  %7908 = vst [vmem:[#allocation2_spill] sm:$0xff] %v6453_v19  ;;  %v7897_v9 = vsub.s32 0, %v6453_v19  ;;  %v7896_v6 = vsub.s32 1, %v6453_v19 }
  0xda   : > { %v1039_v31 = vsel %vm557_vm6, %v1036_v30, %v5145_v27  ;;  %v1040_v32 = vsel %vm557_vm6, %v1037_v16, %v5146_v26 }
  0xdb   : > { %v1144_v33 = vpack.c.bf16 %v5151_v21, %v5150_v28  ;;  %v5154_v23 = vpop.permute.xlu0 %5153  ;;  %v1042_v34 = vsel %vm561_vm7, %v1039_v31, %v5150_v28  ;;  %v1043_v18 = vsel %vm561_vm7, %v1040_v32, %v5151_v21  ;;  %v6462_v22 = vrot.slane %v1167_v20, %v7897_v9 }
  0xdc   : > { %v5156_v35 = vunpack.i.h.bf16 %v5154_v23  ;;  %v5155_v36 = vunpack.i.l.bf16 %v5154_v23  ;;  %v5159_v39 = vpop.permute.xlu1 %5158  ;;  %v1143_v42 = vpack.c.bf16 %v1043_v18, %v1042_v34  ;;  %v6466_v30 = vrot.slane %v1167_v20, %v7896_v6 }
  0xdd   : > { %v5161_v17 = vunpack.i.h.bf16 %v5159_v39  ;;  %v5160_v37 = vunpack.i.l.bf16 %v5159_v39  ;;  %4654 = vmatprep.mubr.msk.bf16.mxu0 %vm1267_vm8, %v1144_v33 }
  0xde   : > { %v1113_v38 = vsel %vm549_vm4, %v6177_v46, %v5156_v35  ;;  %v1035_v41 = vsel %vm549_vm4, %v6150_v24, %v5155_v36 }
  0xdf   : > { %v1038_v29 = vsel %vm553_vm5, %v1035_v41, %v5160_v37  ;;  %v1116_v43 = vsel %vm553_vm5, %v1113_v38, %v5161_v17  ;;  %v5164_v44 = vpop.permute.xlu0 %5163  ;;  %1433 = vmatmul.mubr.bf16.gmra.mrb[36].mxu0 %v1143_v42 }
  0xe0   : > { %v5166_v40 = vunpack.i.h.bf16 %v5164_v44  ;;  %v5165_v48 = vunpack.i.l.bf16 %v5164_v44  ;;  %v5169_v52 = vpop.permute.xlu1 %5168 }
  0xe1   : > { %v5171_v45 = vunpack.i.h.bf16 %v5169_v52  ;;  %v5170_v49 = vunpack.i.l.bf16 %v5169_v52 }
  0xe2   : > { %v1041_v51 = vsel %vm557_vm6, %v1038_v29, %v5165_v48  ;;  %v1119_v53 = vsel %vm557_vm6, %v1116_v43, %v5166_v40 }
  0xe3   : > { %v1146_v56 = vpack.c.bf16 %v5171_v45, %v5170_v49  ;;  %v5174_v46 = vpop.permute.xlu0 %5173  ;;  %v1044_v55 = vsel %vm561_vm7, %v1041_v51, %v5170_v49  ;;  %v1122_v24 = vsel %vm561_vm7, %v1119_v53, %v5171_v45 }
  0xe4   : > { %v5176_v57 = vunpack.i.h.bf16 %v5174_v46  ;;  %v5175_v60 = vunpack.i.l.bf16 %v5174_v46  ;;  %v5179_v61 = vpop.permute.xlu1 %5178  ;;  %v1145_v62 = vpack.c.bf16 %v1122_v24, %v1044_v55 }
  0xe5   : > { %v5181_v59 = vunpack.i.h.bf16 %v5179_v61  ;;  %v5180_v50 = vunpack.i.l.bf16 %v5179_v61  ;;  %4655 = vmatprep.mubr.msk.bf16.mxu0 %vm1267_vm8, %v1146_v56 }
  0xe6   : > { %v1115_v0 = vsel %vm549_vm4, %v6204_v1, %v5176_v57  ;;  %v1114_v54 = vsel %vm549_vm4, %v6180_v47, %v5175_v60  ;;  %vm3801_vm4 = vcmask 883712  }
  0xe7   : > { %v1117_v2 = vsel %vm553_vm5, %v1114_v54, %v5180_v50  ;;  %v1118_v4 = vsel %vm553_vm5, %v1115_v0, %v5181_v59  ;;  %v5184_v5 = vpop.permute.xlu0 %5183  ;;  %1443 = vmatmul.mubr.bf16.gmra.mrb[40].mxu0 %v1145_v62  ;;  %vm4031_vm5 = vcmask 261120  }
  0xe8   : > { %v5186_v58 = vunpack.i.h.bf16 %v5184_v5  ;;  %v5185_v7 = vunpack.i.l.bf16 %v5184_v5  ;;  %v5189_v63 = vpop.permute.xlu1 %5188 }
  0xe9   : > { %v5191_v8 = vunpack.i.h.bf16 %v5189_v63  ;;  %v5190_v11 = vunpack.i.l.bf16 %v5189_v63 }
  0xea   : > { %v1120_v12 = vsel %vm557_vm6, %v1117_v2, %v5185_v7  ;;  %v1121_v13 = vsel %vm557_vm6, %v1118_v4, %v5186_v58  ;;  %vm5798_vm6 = vmmov 0  }
  0xeb   : > { %v1148_v14 = vpack.c.bf16 %v5191_v8, %v5190_v11  ;;  %v1123_v1 = vsel %vm561_vm7, %v1120_v12, %v5190_v11  ;;  %v1124_v47 = vsel %vm561_vm7, %v1121_v13, %v5191_v8 }
  0xec   : > { %v1147_v15 = vpack.c.bf16 %v1124_v47, %v1123_v1 }
  0xed   : > { %4656 = vmatprep.mubr.msk.bf16.mxu0 %vm1267_vm8, %v1148_v14 }
  0xef   : > { %1453 = vmatmul.mubr.bf16.gmra.mrb[44].mxu0 %v1147_v15 }
 0x16a   : > { %v1344_v16 = vpop.f32.mrb[0].mxu0 }
 0x16b   : > { %v6469_v25 = vadd.f32 %v1344_v16, %v6462_v22  ;;  %v1346_v26 = vpop.f32.mrb[1].mxu0 }
 0x16c   : > { %v6472_v27 = vadd.f32 %v1346_v26, %v6466_v30  ;;  %v1348_v10 = vpop.f32.mrb[2].mxu0 }
 0x16d   : > { %v1349_v21 = vadd.f32 %v1348_v10, %v6462_v22  ;;  %v1350_v28 = vpop.f32.mrb[3].mxu0  ;;  %v7898_v32 = vrot.slane %v6469_v25, 1 }
 0x16e   : > { %v1351_v31 = vadd.f32 %v1350_v28, %v6466_v30  ;;  %v7899_v23 = vrot.slane %v6472_v27, 1 }
 0x16f   : > { %v1554_v33 = vrot.slane %v1349_v21, 1 }
 0x170   : > { %v1557_v34 = vrot.slane %v1351_v31, 1 }
 0x171   : > { %v1555_v18 = vsel %vm481_vm0, %v7898_v32, %v1554_v33 }
 0x172   : > { %v6482_v35 = vmax.f32 %v6469_v25, %v1555_v18  ;;  %v1354_v36 = vpop.f32.mrb[4].mxu0  ;;  %v1558_v39 = vsel %vm481_vm0, %v7899_v23, %v1557_v34 }
 0x173   : > { %v1355_v42 = vadd.f32 %v1354_v36, %v6462_v22  ;;  %v1356_v17 = vpop.f32.mrb[5].mxu0  ;;  %v6489_v37 = vmax.f32 %v6472_v27, %v1558_v39 }
 0x174   : > { %v1357_v38 = vadd.f32 %v1356_v17, %v6466_v30  ;;  %v1358_v41 = vpop.f32.mrb[6].mxu0 }
 0x175   : > { %v1559_v29 = vrot.slane %v1355_v42, 1  ;;  %v1359_v43 = vadd.f32 %v1358_v41, %v6462_v22  ;;  %v1360_v44 = vpop.f32.mrb[7].mxu0 }
 0x176   : > { %v1561_v40 = vrot.slane %v1357_v38, 1  ;;  %v1361_v48 = vadd.f32 %v1360_v44, %v6466_v30 }
 0x177   : > { %v1560_v52 = vsel %vm481_vm0, %v1554_v33, %v1559_v29  ;;  %v1563_v45 = vrot.slane %v1359_v43, 1 }
 0x178   : > { %v6495_v49 = vmax.f32 %v1349_v21, %v1560_v52  ;;  %v1565_v51 = vrot.slane %v1361_v48, 1  ;;  %v1562_v53 = vsel %vm481_vm0, %v1557_v34, %v1561_v40 }
 0x179   : > { %v1564_v56 = vsel %vm481_vm0, %v1559_v29, %v1563_v45  ;;  %v6499_v46 = vmax.f32 %v1351_v31, %v1562_v53 }
 0x17a   : > { %v6501_v55 = vmax.f32 %v1355_v42, %v1564_v56  ;;  %v1364_v24 = vpop.f32.mrb[8].mxu0  ;;  %v5197_v57 = vpack.i.bf16 %v6495_v49, %v6482_v35  ;;  %v1566_v60 = vsel %vm481_vm0, %v1561_v40, %v1565_v51 }
 0x17b   : > { %v1365_v61 = vadd.f32 %v1364_v24, %v6462_v22  ;;  %v1366_v62 = vpop.f32.mrb[9].mxu0  ;;  %v6507_v59 = vmax.f32 %v1357_v38, %v1566_v60  ;;  %v5202_v7 = vpack.i.bf16 %v6499_v46, %v6489_v37 }
 0x17c   : > { %v1367_v50 = vadd.f32 %v1366_v62, %v6466_v30  ;;  %v1368_v0 = vpop.f32.mrb[10].mxu0  ;;  %5198 = vrot.lane.b32.xlu0 %v5197_v57, %s5787_s17  ;;  %5193 = vrot.lane.b32.xlu1 %v5197_v57, %s5788_s18 }
 0x17d   : > { %v1567_v54 = vrot.slane %v1365_v61, 1  ;;  %v1369_v2 = vadd.f32 %v1368_v0, %v6462_v22  ;;  %v1370_v4 = vpop.f32.mrb[11].mxu0 }
 0x17e   : > { %v1569_v5 = vrot.slane %v1367_v50, 1  ;;  %v1371_v58 = vadd.f32 %v1370_v4, %v6466_v30 }
 0x17f   : > { %v1568_v63 = vsel %vm481_vm0, %v1563_v45, %v1567_v54  ;;  %v1571_v8 = vrot.slane %v1369_v2, 1 }
 0x180   : > { %v6517_v11 = vmax.f32 %v1359_v43, %v1568_v63  ;;  %v1573_v12 = vrot.slane %v1371_v58, 1  ;;  %5203 = vrot.lane.b32.xlu0 %v5202_v7, %s5787_s17  ;;  %v1570_v13 = vsel %vm481_vm0, %v1565_v51, %v1569_v5 }
 0x181   : > { %v1572_v14 = vsel %vm481_vm0, %v1567_v54, %v1571_v8  ;;  %v6522_v1 = vmax.f32 %v1361_v48, %v1570_v13 }
 0x182   : > { %v6524_v47 = vmax.f32 %v1365_v61, %v1572_v14  ;;  %v1374_v15 = vpop.f32.mrb[12].mxu0  ;;  %v5207_v3 = vpack.i.bf16 %v6517_v11, %v6501_v55  ;;  %v1574_v20 = vsel %vm481_vm0, %v1569_v5, %v1573_v12 }
 0x183   : > { %v1375_v16 = vadd.f32 %v1374_v15, %v6462_v22  ;;  %v1376_v26 = vpop.f32.mrb[13].mxu0  ;;  %v6530_v10 = vmax.f32 %v1367_v50, %v1574_v20  ;;  %v5217_v39 = vpack.i.bf16 %v6522_v1, %v6507_v59 }
 0x184   : > { %v1377_v21 = vadd.f32 %v1376_v26, %v6466_v30  ;;  %v1378_v28 = vpop.f32.mrb[14].mxu0  ;;  %5208 = vrot.lane.b32.xlu0 %v5207_v3, %s5788_s18  ;;  %5213 = vrot.lane.b32.xlu1 %v5207_v3, %s5787_s17 }
 0x185   : > { %v1575_v31 = vrot.slane %v1375_v16, 1  ;;  %v1379_v33 = vadd.f32 %v1378_v28, %v6462_v22  ;;  %v1380_v34 = vpop.f32.mrb[15].mxu0 }
 0x186   : > { %v1577_v18 = vrot.slane %v1377_v21, 1  ;;  %v1381_v36 = vadd.f32 %v1380_v34, %v6466_v30 }
 0x187   : > { %v1576_v42 = vsel %vm481_vm0, %v1571_v8, %v1575_v31  ;;  %v1579_v17 = vrot.slane %v1379_v33, 1 }
 0x188   : > { %v6540_v38 = vmax.f32 %v1369_v2, %v1576_v42  ;;  %v1581_v41 = vrot.slane %v1381_v36, 1  ;;  %5218 = vrot.lane.b32.xlu1 %v5217_v39, %s5787_s17  ;;  %v1578_v29 = vsel %vm481_vm0, %v1573_v12, %v1577_v18 }
 0x189   : > { %v1580_v43 = vsel %vm481_vm0, %v1575_v31, %v1579_v17  ;;  %v6545_v44 = vmax.f32 %v1371_v58, %v1578_v29 }
 0x18a   : > { %v6547_v40 = vmax.f32 %v1375_v16, %v1580_v43  ;;  %v1384_v48 = vpop.f32.mrb[16].mxu0  ;;  %v5227_v52 = vpack.i.bf16 %v6540_v38, %v6524_v47  ;;  %v1582_v45 = vsel %vm481_vm0, %v1577_v18, %v1581_v41 }
 0x18b   : > { %v1385_v51 = vadd.f32 %v1384_v48, %v6462_v22  ;;  %v1386_v53 = vpop.f32.mrb[17].mxu0  ;;  %v6553_v56 = vmax.f32 %v1377_v21, %v1582_v45  ;;  %v5232_v54 = vpack.i.bf16 %v6545_v44, %v6530_v10 }
 0x18c   : > { %v1387_v24 = vadd.f32 %v1386_v53, %v6466_v30  ;;  %v1388_v57 = vpop.f32.mrb[18].mxu0  ;;  %5228 = vrot.lane.b32.xlu0 %v5227_v52, %s5787_s17  ;;  %5223 = vrot.lane.b32.xlu1 %v5227_v52, %s5788_s18 }
 0x18d   : > { %v1583_v60 = vrot.slane %v1385_v51, 1  ;;  %v1389_v61 = vadd.f32 %v1388_v57, %v6462_v22  ;;  %v1390_v62 = vpop.f32.mrb[19].mxu0 }
 0x18e   : > { %v1585_v50 = vrot.slane %v1387_v24, 1  ;;  %v1391_v0 = vadd.f32 %v1390_v62, %v6466_v30 }
 0x18f   : > { %v1584_v2 = vsel %vm481_vm0, %v1579_v17, %v1583_v60  ;;  %v1587_v4 = vrot.slane %v1389_v61, 1 }
 0x190   : > { %v6563_v5 = vmax.f32 %v1379_v33, %v1584_v2  ;;  %v1589_v58 = vrot.slane %v1391_v0, 1  ;;  %5233 = vrot.lane.b32.xlu0 %v5232_v54, %s5787_s17  ;;  %v1586_v7 = vsel %vm481_vm0, %v1581_v41, %v1585_v50 }
 0x191   : > { %v1588_v63 = vsel %vm481_vm0, %v1583_v60, %v1587_v4  ;;  %v6568_v8 = vmax.f32 %v1381_v36, %v1586_v7 }
 0x192   : > { %v6570_v12 = vmax.f32 %v1385_v51, %v1588_v63  ;;  %v1394_v13 = vpop.f32.mrb[20].mxu0  ;;  %v5237_v14 = vpack.i.bf16 %v6563_v5, %v6547_v40  ;;  %v1590_v15 = vsel %vm481_vm0, %v1585_v50, %v1589_v58 }
 0x193   : > { %v1395_v3 = vadd.f32 %v1394_v13, %v6462_v22  ;;  %v1396_v20 = vpop.f32.mrb[21].mxu0  ;;  %v6576_v16 = vmax.f32 %v1387_v24, %v1590_v15  ;;  %v5247_v36 = vpack.i.bf16 %v6568_v8, %v6553_v56 }
 0x194   : > { %v1397_v26 = vadd.f32 %v1396_v20, %v6466_v30  ;;  %v1398_v21 = vpop.f32.mrb[22].mxu0  ;;  %5238 = vrot.lane.b32.xlu0 %v5237_v14, %s5788_s18  ;;  %5243 = vrot.lane.b32.xlu1 %v5237_v14, %s5787_s17 }
 0x195   : > { %v1591_v28 = vrot.slane %v1395_v3, 1  ;;  %v1399_v31 = vadd.f32 %v1398_v21, %v6462_v22  ;;  %v1400_v33 = vpop.f32.mrb[23].mxu0 }
 0x196   : > { %v1593_v34 = vrot.slane %v1397_v26, 1  ;;  %v1401_v18 = vadd.f32 %v1400_v33, %v6466_v30 }
 0x197   : > { %v1592_v39 = vsel %vm481_vm0, %v1587_v4, %v1591_v28  ;;  %v1595_v42 = vrot.slane %v1399_v31, 1 }
 0x198   : > { %v6586_v17 = vmax.f32 %v1389_v61, %v1592_v39  ;;  %v1597_v41 = vrot.slane %v1401_v18, 1  ;;  %5248 = vrot.lane.b32.xlu1 %v5247_v36, %s5787_s17  ;;  %v1594_v29 = vsel %vm481_vm0, %v1589_v58, %v1593_v34 }
 0x199   : > { %v1596_v43 = vsel %vm481_vm0, %v1591_v28, %v1595_v42  ;;  %v6591_v48 = vmax.f32 %v1391_v0, %v1594_v29 }
 0x19a   : > { %v6593_v52 = vmax.f32 %v1395_v3, %v1596_v43  ;;  %v1404_v45 = vpop.f32.mrb[24].mxu0  ;;  %v5257_v51 = vpack.i.bf16 %v6586_v17, %v6570_v12  ;;  %v1598_v53 = vsel %vm481_vm0, %v1593_v34, %v1597_v41 }
 0x19b   : > { %v1405_v24 = vadd.f32 %v1404_v45, %v6462_v22  ;;  %v1406_v57 = vpop.f32.mrb[25].mxu0  ;;  %v6599_v60 = vmax.f32 %v1397_v26, %v1598_v53  ;;  %v5262_v58 = vpack.i.bf16 %v6591_v48, %v6576_v16 }
 0x19c   : > { %v1407_v61 = vadd.f32 %v1406_v57, %v6466_v30  ;;  %v1408_v62 = vpop.f32.mrb[26].mxu0  ;;  %5258 = vrot.lane.b32.xlu0 %v5257_v51, %s5787_s17  ;;  %5253 = vrot.lane.b32.xlu1 %v5257_v51, %s5788_s18 }
 0x19d   : > { %v1599_v50 = vrot.slane %v1405_v24, 1  ;;  %v1409_v0 = vadd.f32 %v1408_v62, %v6462_v22  ;;  %v1410_v54 = vpop.f32.mrb[27].mxu0 }
 0x19e   : > { %v1601_v2 = vrot.slane %v1407_v61, 1  ;;  %v1411_v4 = vadd.f32 %v1410_v54, %v6466_v30 }
 0x19f   : > { %v1600_v7 = vsel %vm481_vm0, %v1595_v42, %v1599_v50  ;;  %v1603_v63 = vrot.slane %v1409_v0, 1 }
 0x1a0   : > { %v6609_v13 = vmax.f32 %v1399_v31, %v1600_v7  ;;  %v1605_v14 = vrot.slane %v1411_v4, 1  ;;  %5263 = vrot.lane.b32.xlu0 %v5262_v58, %s5787_s17  ;;  %v1602_v15 = vsel %vm481_vm0, %v1597_v41, %v1601_v2 }
 0x1a1   : > { %v1604_v3 = vsel %vm481_vm0, %v1599_v50, %v1603_v63  ;;  %v6614_v20 = vmax.f32 %v1401_v18, %v1602_v15 }
 0x1a2   : > { %v6616_v26 = vmax.f32 %v1405_v24, %v1604_v3  ;;  %v1414_v21 = vpop.f32.mrb[28].mxu0  ;;  %v5267_v28 = vpack.i.bf16 %v6609_v13, %v6593_v52  ;;  %v1606_v33 = vsel %vm481_vm0, %v1601_v2, %v1605_v14 }
 0x1a3   : > { %v1415_v31 = vadd.f32 %v1414_v21, %v6462_v22  ;;  %v1416_v34 = vpop.f32.mrb[29].mxu0  ;;  %v6622_v36 = vmax.f32 %v1407_v61, %v1606_v33  ;;  %v5277_v51 = vpack.i.bf16 %v6614_v20, %v6599_v60 }
 0x1a4   : > { %v1417_v39 = vadd.f32 %v1416_v34, %v6466_v30  ;;  %v1418_v42 = vpop.f32.mrb[30].mxu0  ;;  %5268 = vrot.lane.b32.xlu0 %v5267_v28, %s5788_s18  ;;  %5273 = vrot.lane.b32.xlu1 %v5267_v28, %s5787_s17 }
 0x1a5   : > { %v1607_v18 = vrot.slane %v1415_v31, 1  ;;  %v1419_v41 = vadd.f32 %v1418_v42, %v6462_v22  ;;  %v1420_v29 = vpop.f32.mrb[31].mxu0 }
 0x1a6   : > { %v1609_v43 = vrot.slane %v1417_v39, 1  ;;  %v1421_v45 = vadd.f32 %v1420_v29, %v6466_v30 }
 0x1a7   : > { %v1608_v53 = vsel %vm481_vm0, %v1603_v63, %v1607_v18  ;;  %v1611_v24 = vrot.slane %v1419_v41, 1 }
 0x1a8   : > { %v6632_v57 = vmax.f32 %v1409_v0, %v1608_v53  ;;  %v1613_v61 = vrot.slane %v1421_v45, 1  ;;  %5278 = vrot.lane.b32.xlu1 %v5277_v51, %s5787_s17  ;;  %v1610_v62 = vsel %vm481_vm0, %v1605_v14, %v1609_v43 }
 0x1a9   : > { %v1612_v50 = vsel %vm481_vm0, %v1607_v18, %v1611_v24  ;;  %v6637_v54 = vmax.f32 %v1411_v4, %v1610_v62 }
 0x1aa   : > { %v6639_v2 = vmax.f32 %v1415_v31, %v1612_v50  ;;  %v1424_v58 = vpop.f32.mrb[32].mxu0  ;;  %v5287_v7 = vpack.i.bf16 %v6632_v57, %v6616_v26  ;;  %v1614_v63 = vsel %vm481_vm0, %v1609_v43, %v1613_v61 }
 0x1ab   : > { %v1425_v0 = vadd.f32 %v1424_v58, %v6462_v22  ;;  %v1426_v15 = vpop.f32.mrb[33].mxu0  ;;  %v6645_v3 = vmax.f32 %v1417_v39, %v1614_v63  ;;  %v5292_v42 = vpack.i.bf16 %v6637_v54, %v6622_v36 }
 0x1ac   : > { %v1427_v21 = vadd.f32 %v1426_v15, %v6466_v30  ;;  %v1428_v14 = vpop.f32.mrb[34].mxu0  ;;  %5288 = vrot.lane.b32.xlu0 %v5287_v7, %s5787_s17  ;;  %5283 = vrot.lane.b32.xlu1 %v5287_v7, %s5788_s18 }
 0x1ad   : > { %v1615_v4 = vrot.slane %v1425_v0, 1  ;;  %v1429_v28 = vadd.f32 %v1428_v14, %v6462_v22  ;;  %v1430_v33 = vpop.f32.mrb[35].mxu0 }
 0x1ae   : > { %v1617_v31 = vrot.slane %v1427_v21, 1  ;;  %v1431_v34 = vadd.f32 %v1430_v33, %v6466_v30 }
 0x1af   : > { %v1616_v39 = vsel %vm481_vm0, %v1611_v24, %v1615_v4  ;;  %v1619_v18 = vrot.slane %v1429_v28, 1 }
 0x1b0   : > { %v6655_v29 = vmax.f32 %v1419_v41, %v1616_v39  ;;  %v1621_v43 = vrot.slane %v1431_v34, 1  ;;  %5293 = vrot.lane.b32.xlu0 %v5292_v42, %s5787_s17  ;;  %v1618_v51 = vsel %vm481_vm0, %v1613_v61, %v1617_v31 }
 0x1b1   : > { %v1620_v53 = vsel %vm481_vm0, %v1615_v4, %v1619_v18  ;;  %v6660_v62 = vmax.f32 %v1421_v45, %v1618_v51 }
 0x1b2   : > { %v6662_v50 = vmax.f32 %v1425_v0, %v1620_v53  ;;  %v1434_v58 = vpop.f32.mrb[36].mxu0  ;;  %v5297_v7 = vpack.i.bf16 %v6655_v29, %v6639_v2  ;;  %v1622_v24 = vsel %vm481_vm0, %v1617_v31, %v1621_v43 }
 0x1b3   : > { %v1435_v41 = vadd.f32 %v1434_v58, %v6462_v22  ;;  %v1436_v63 = vpop.f32.mrb[37].mxu0  ;;  %v6668_v15 = vmax.f32 %v1427_v21, %v1622_v24  ;;  %v5307_v31 = vpack.i.bf16 %v6660_v62, %v6645_v3 }
 0x1b4   : > { %v1437_v14 = vadd.f32 %v1436_v63, %v6466_v30  ;;  %v1438_v61 = vpop.f32.mrb[38].mxu0  ;;  %5298 = vrot.lane.b32.xlu0 %v5297_v7, %s5788_s18  ;;  %5303 = vrot.lane.b32.xlu1 %v5297_v7, %s5787_s17 }
 0x1b5   : > { %v1623_v45 = vrot.slane %v1435_v41, 1  ;;  %v1439_v0 = vadd.f32 %v1438_v61, %v6462_v22  ;;  %v1440_v4 = vpop.f32.mrb[39].mxu0 }
 0x1b6   : > { %v1625_v33 = vrot.slane %v1437_v14, 1  ;;  %v1441_v42 = vadd.f32 %v1440_v4, %v6466_v30 }
 0x1b7   : > { %v1624_v21 = vsel %vm481_vm0, %v1619_v18, %v1623_v45  ;;  %v1627_v39 = vrot.slane %v1439_v0, 1 }
 0x1b8   : > { %v6678_v51 = vmax.f32 %v1429_v28, %v1624_v21  ;;  %v1629_v53 = vrot.slane %v1441_v42, 1  ;;  %5308 = vrot.lane.b32.xlu1 %v5307_v31, %s5787_s17  ;;  %v1626_v58 = vsel %vm481_vm0, %v1621_v43, %v1625_v33 }
 0x1b9   : > { %v1628_v7 = vsel %vm481_vm0, %v1623_v45, %v1627_v39  ;;  %v6683_v24 = vmax.f32 %v1431_v34, %v1626_v58 }
 0x1ba   : > { %v6685_v63 = vmax.f32 %v1435_v41, %v1628_v7  ;;  %v1444_v61 = vpop.f32.mrb[40].mxu0  ;;  %v5317_v4 = vpack.i.bf16 %v6678_v51, %v6662_v50  ;;  %v1630_v18 = vsel %vm481_vm0, %v1625_v33, %v1629_v53 }
 0x1bb   : > { %v1445_v28 = vadd.f32 %v1444_v61, %v6462_v22  ;;  %v1446_v21 = vpop.f32.mrb[41].mxu0  ;;  %v6691_v6 = vmax.f32 %v1437_v14, %v1630_v18  ;;  %v5322_v33 = vpack.i.bf16 %v6683_v24, %v6668_v15 }
 0x1bc   : > { %v1447_v31 = vadd.f32 %v1446_v21, %v6466_v30  ;;  %v1448_v43 = vpop.f32.mrb[42].mxu0  ;;  %5318 = vrot.lane.b32.xlu0 %v5317_v4, %s5787_s17  ;;  %5313 = vrot.lane.b32.xlu1 %v5317_v4, %s5788_s18 }
 0x1bd   : > { %v1631_v34 = vrot.slane %v1445_v28, 1  ;;  %v1449_v41 = vadd.f32 %v1448_v43, %v6462_v22  ;;  %v1450_v45 = vpop.f32.mrb[43].mxu0 }
 0x1be   : > { %v1633_v58 = vrot.slane %v1447_v31, 1  ;;  %v1451_v7 = vadd.f32 %v1450_v45, %v6466_v30 }
 0x1bf   : > { %v1632_v14 = vsel %vm481_vm0, %v1627_v39, %v1631_v34  ;;  %v1635_v61 = vrot.slane %v1449_v41, 1 }
 0x1c0   : > { %v6701_v18 = vmax.f32 %v1439_v0, %v1632_v14  ;;  %v1637_v21 = vrot.slane %v1451_v7, 1  ;;  %5323 = vrot.lane.b32.xlu0 %v5322_v33, %s5787_s17  ;;  %v1634_v4 = vsel %vm481_vm0, %v1629_v53, %v1633_v58 }
 0x1c1   : > { %v1636_v9 = vsel %vm481_vm0, %v1631_v34, %v1635_v61  ;;  %v6706_v43 = vmax.f32 %v1441_v42, %v1634_v4 }
 0x1c2   : > { %7909 = vst [vmem:[#allocation3_spill] sm:$0xff] %v6701_v18  ;;  %v6708_v32 = vmax.f32 %v1445_v28, %v1636_v9  ;;  %v1454_v45 = vpop.f32.mrb[44].mxu0  ;;  %v5327_v23 = vpack.i.bf16 %v6701_v18, %v6685_v63  ;;  %v1638_v39 = vsel %vm481_vm0, %v1633_v58, %v1637_v21 }
 0x1c3   : > { %v1455_v0 = vadd.f32 %v1454_v45, %v6462_v22  ;;  %v1456_v14 = vpop.f32.mrb[45].mxu0  ;;  %v6714_v19 = vmax.f32 %v1447_v31, %v1638_v39  ;;  %v5337_v58 = vpack.i.bf16 %v6706_v43, %v6691_v6 }
 0x1c4   : > { %v1457_v33 = vadd.f32 %v1456_v14, %v6466_v30  ;;  %v1458_v53 = vpop.f32.mrb[46].mxu0  ;;  %5328 = vrot.lane.b32.xlu0 %v5327_v23, %s5788_s18  ;;  %5333 = vrot.lane.b32.xlu1 %v5327_v23, %s5787_s17 }
 0x1c5   : > { %v1639_v9 = vrot.slane %v1455_v0, 1  ;;  %v1459_v42 = vadd.f32 %v1458_v53, %v6462_v22  ;;  %v1460_v28 = vpop.f32.mrb[47].mxu0 }
 0x1c6   : > { %v1641_v34 = vrot.slane %v1457_v33, 1  ;;  %v1461_v4 = vadd.f32 %v1460_v28, %v6466_v30  ;;  %v7912_v30 = vrot.slane %v6472_v27, 1 }
 0x1c7   : > { %v1640_v31 = vsel %vm481_vm0, %v1635_v61, %v1639_v9  ;;  %v1643_v45 = vrot.slane %v1459_v42, 1 }
 0x1c8   : > { %v6724_v39 = vmax.f32 %v1449_v41, %v1640_v31  ;;  %v1645_v14 = vrot.slane %v1461_v4, 1  ;;  %5338 = vrot.lane.b32.xlu1 %v5337_v58, %s5787_s17  ;;  %v1642_v23 = vsel %vm481_vm0, %v1637_v21, %v1641_v34  ;;  %v7913_v41 = vrot.slane %v6469_v25, 1 }
 0x1c9   : > { %v1644_v18 = vsel %vm481_vm0, %v1639_v9, %v1643_v45  ;;  %v6729_v22 = vmax.f32 %v1451_v7, %v1642_v23 }
 0x1ca   : > { %7910 = vst [vmem:[#allocation4_spill] sm:$0xff] %v6724_v39  ;;  %v6731_v53 = vmax.f32 %v1455_v0, %v1644_v18  ;;  %v1698_v28 = vsel %vm481_vm0, %v1645_v14, %v7912_v30  ;;  %v5347_v61 = vpack.i.bf16 %v6724_v39, %v6708_v32  ;;  %v1697_v31 = vsel %vm481_vm0, %v1643_v45, %v7913_v41 }
 0x1cb   : > { %v6741_v58 = vmax.f32 %v1461_v4, %v1698_v28  ;;  %v1646_v21 = vsel %vm481_vm0, %v1641_v34, %v1645_v14  ;;  %v6748_v27 = vmax.f32 %v1459_v42, %v1697_v31  ;;  %v5352_v18 = vpack.i.bf16 %v6729_v22, %v6714_v19 }
 0x1cc   : > { %7911 = vst [vmem:[#allocation5_spill] sm:$0xff] %v6731_v53  ;;  %5348 = vrot.lane.b32.xlu0 %v5347_v61, %s5787_s17  ;;  %v6745_v7 = vmax.f32 %v1457_v33, %v1646_v21  ;;  %5343 = vrot.lane.b32.xlu1 %v5347_v61, %s5788_s18  ;;  %v5581_v33 = vld [vmem:[%s7885_s3 + $0x4] ss:$8 sps:$4 sm:$0xff]  }
 0x1cd   : > { %7914 = vst [vmem:[#allocation6_spill] sm:$0xff] %v6741_v58  ;;  %7916 = vst [vmem:[#allocation8_spill] sm:$0xff] %v6748_v27  ;;  %v5357_v0 = vpack.i.bf16 %v6748_v27, %v6731_v53  ;;  %4669 = vmatprep.mubr.msk.bf16.mxu1 %vm2235_vm9, %v5581_v33 }
 0x1ce   : > { %7915 = vst [vmem:[#allocation7_spill] sm:$0xff] %v6745_v7  ;;  %v5362_v25 = vpack.i.bf16 %v6741_v58, %v6745_v7 }
 0x1d0   : > { %5353 = vrot.lane.b32.xlu0 %v5352_v18, %s5787_s17  ;;  %5363 = vrot.lane.b32.xlu1 %v5362_v25, %s5787_s17 }
 0x1d4   : > { %5358 = vrot.lane.b32.xlu0 %v5357_v0, %s5788_s18  ;;  %5368 = vrot.lane.b32.xlu1 %v5357_v0, %s5787_s17  ;;  %s5793_s18 = smov 108  }
 0x1ee   : > { %v5199_v9 = vpop.permute.xlu0 %5198  ;;  %v5194_v42 = vpop.permute.xlu1 %5193 }
 0x1ef   : > { %v5201_v34 = vunpack.i.h.bf16 %v5199_v9  ;;  %v5200_v4 = vunpack.i.l.bf16 %v5199_v9  ;;  %v5196_v14 = vunpack.i.h.bf16 %v5194_v42  ;;  %v5195_v23 = vunpack.i.l.bf16 %v5194_v42 }
 0x1f2   : > { %v5204_v45 = vpop.permute.xlu0 %5203 }
 0x1f3   : > { %v5206_v30 = vunpack.i.h.bf16 %v5204_v45  ;;  %v5205_v28 = vunpack.i.l.bf16 %v5204_v45 }
 0x1f5   : > { %v2037_v61 = vsel %vm2036_vm11, %v5205_v28, %v5195_v23  ;;  %v2038_v41 = vsel %vm2036_vm11, %v5206_v30, %v5196_v14  ;;  %v1892_v31 = vsel %vm1891_vm10, %v5200_v4, %v5205_v28  ;;  %v1893_v21 = vsel %vm1891_vm10, %v5201_v34, %v5206_v30 }
 0x1f6   : > { %v5214_v18 = vpop.permute.xlu1 %5213  ;;  %v2062_v25 = vmax.f32 %v6489_v37, %v2037_v61  ;;  %v2064_v0 = vmax.f32 %v6499_v46, %v2038_v41  ;;  %v2061_v33 = vmax.f32 %v6482_v35, %v1892_v31  ;;  %v2063_v9 = vmax.f32 %v6495_v49, %v1893_v21  ;;  %v5209_v42 = vpop.permute.xlu0 %5208 }
 0x1f7   : > { %v5211_v58 = vunpack.i.h.bf16 %v5209_v42  ;;  %v5210_v14 = vunpack.i.l.bf16 %v5209_v42  ;;  %v5216_v34 = vunpack.i.h.bf16 %v5214_v18  ;;  %v5215_v30 = vunpack.i.l.bf16 %v5214_v18 }
 0x1f8   : > { %v2110_v27 = vmax.f32 %v2062_v25, 0.0  ;;  %v2112_v45 = vmax.f32 %v2064_v0, 0.0  ;;  %v2109_v53 = vmax.f32 %v2061_v33, 0.0  ;;  %v2111_v23 = vmax.f32 %v2063_v9, 0.0 }
 0x1fa   : > { %v5219_v7 = vpop.permute.xlu1 %5218  ;;  %v2158_v4 = vpack.c.bf16 %v2112_v45, %v2110_v27  ;;  %v2157_v28 = vpack.c.bf16 %v2111_v23, %v2109_v53 }
 0x1fb   : > { %v5221_v39 = vunpack.i.h.bf16 %v5219_v7  ;;  %v5220_v37 = vunpack.i.l.bf16 %v5219_v7 }
 0x1fc   : > { %2254 = vmatprep.subr.bf16.mxu1 %v2158_v4 }
 0x1fd   : > { %v2040_v46 = vsel %vm2036_vm11, %v5221_v39, %v5211_v58  ;;  %v1894_v35 = vsel %vm1891_vm10, %v5215_v30, %v5220_v37  ;;  %v1895_v49 = vsel %vm1891_vm10, %v5216_v34, %v5221_v39  ;;  %v2039_v61 = vsel %vm2036_vm11, %v5220_v37, %v5210_v14  ;;  %2255 = vmatpush1.bf16.msra.mxu1 %v2157_v28 }
 0x1fe   : > { %v5229_v41 = vpop.permute.xlu0 %5228  ;;  %v2066_v31 = vmax.f32 %v6507_v59, %v2039_v61  ;;  %v2068_v27 = vmax.f32 %v6522_v1, %v2040_v46  ;;  %v2065_v53 = vmax.f32 %v6501_v55, %v1894_v35  ;;  %v2067_v21 = vmax.f32 %v6517_v11, %v1895_v49  ;;  %v5224_v7 = vpop.permute.xlu1 %5223 }
 0x1ff   : > { %v5231_v33 = vunpack.i.h.bf16 %v5229_v41  ;;  %v5230_v9 = vunpack.i.l.bf16 %v5229_v41  ;;  %v5226_v23 = vunpack.i.h.bf16 %v5224_v7  ;;  %v5225_v14 = vunpack.i.l.bf16 %v5224_v7 }
 0x200   : > { %v2114_v18 = vmax.f32 %v2066_v31, 0.0  ;;  %v2116_v25 = vmax.f32 %v2068_v27, 0.0  ;;  %v2113_v58 = vmax.f32 %v2065_v53, 0.0  ;;  %v2115_v0 = vmax.f32 %v2067_v21, 0.0 }
 0x202   : > { %v5234_v39 = vpop.permute.xlu0 %5233  ;;  %v2160_v42 = vpack.c.bf16 %v2116_v25, %v2114_v18  ;;  %v2159_v45 = vpack.c.bf16 %v2115_v0, %v2113_v58 }
 0x203   : > { %v5236_v4 = vunpack.i.h.bf16 %v5234_v39  ;;  %v5235_v59 = vunpack.i.l.bf16 %v5234_v39 }
 0x204   : > { %2256 = vmatprep.subr.bf16.mxu1 %v2160_v42 }
 0x205   : > { %v1896_v1 = vsel %vm1891_vm10, %v5230_v9, %v5235_v59  ;;  %v1897_v55 = vsel %vm1891_vm10, %v5231_v33, %v5236_v4  ;;  %v2041_v11 = vsel %vm2036_vm11, %v5235_v59, %v5225_v14  ;;  %v2042_v28 = vsel %vm2036_vm11, %v5236_v4, %v5226_v23  ;;  %2257 = vmatpush1.bf16.msra.mxu1 %v2159_v45 }
 0x206   : > { %v5244_v34 = vpop.permute.xlu1 %5243  ;;  %v2070_v30 = vmax.f32 %v6530_v10, %v2041_v11  ;;  %v2072_v37 = vmax.f32 %v6545_v44, %v2042_v28  ;;  %v2069_v46 = vmax.f32 %v6524_v47, %v1896_v1  ;;  %v2071_v35 = vmax.f32 %v6540_v38, %v1897_v55  ;;  %v5239_v49 = vpop.permute.xlu0 %5238 }
 0x207   : > { %v5241_v53 = vunpack.i.h.bf16 %v5239_v49  ;;  %v5240_v21 = vunpack.i.l.bf16 %v5239_v49  ;;  %v5246_v58 = vunpack.i.h.bf16 %v5244_v34  ;;  %v5245_v0 = vunpack.i.l.bf16 %v5244_v34 }
 0x208   : > { %v2118_v61 = vmax.f32 %v2070_v30, 0.0  ;;  %v2120_v41 = vmax.f32 %v2072_v37, 0.0  ;;  %v2117_v31 = vmax.f32 %v2069_v46, 0.0  ;;  %v2119_v27 = vmax.f32 %v2071_v35, 0.0 }
 0x20a   : > { %v5249_v7 = vpop.permute.xlu1 %5248  ;;  %v2162_v18 = vpack.c.bf16 %v2120_v41, %v2118_v61  ;;  %v2161_v25 = vpack.c.bf16 %v2119_v27, %v2117_v31 }
 0x20b   : > { %v5251_v33 = vunpack.i.h.bf16 %v5249_v7  ;;  %v5250_v10 = vunpack.i.l.bf16 %v5249_v7 }
 0x20c   : > { %2258 = vmatprep.subr.bf16.mxu1 %v2162_v18 }
 0x20d   : > { %v2044_v44 = vsel %vm2036_vm11, %v5251_v33, %v5241_v53  ;;  %v1898_v47 = vsel %vm1891_vm10, %v5245_v0, %v5250_v10  ;;  %v1899_v38 = vsel %vm1891_vm10, %v5246_v58, %v5251_v33  ;;  %v2043_v9 = vsel %vm2036_vm11, %v5250_v10, %v5240_v21  ;;  %2259 = vmatpush1.bf16.msra.mxu1 %v2161_v25 }
 0x20e   : > { %v5259_v39 = vpop.permute.xlu0 %5258  ;;  %v2074_v42 = vmax.f32 %v6553_v56, %v2043_v9  ;;  %v2076_v45 = vmax.f32 %v6568_v8, %v2044_v44  ;;  %v2073_v23 = vmax.f32 %v6547_v40, %v1898_v47  ;;  %v2075_v14 = vmax.f32 %v6563_v5, %v1899_v38  ;;  %v5254_v4 = vpop.permute.xlu1 %5253 }
 0x20f   : > { %v5261_v28 = vunpack.i.h.bf16 %v5259_v39  ;;  %v5260_v34 = vunpack.i.l.bf16 %v5259_v39  ;;  %v5256_v35 = vunpack.i.h.bf16 %v5254_v4  ;;  %v5255_v49 = vunpack.i.l.bf16 %v5254_v4 }
 0x210   : > { %v2122_v59 = vmax.f32 %v2074_v42, 0.0  ;;  %v2124_v1 = vmax.f32 %v2076_v45, 0.0  ;;  %v2121_v55 = vmax.f32 %v2073_v23, 0.0  ;;  %v2123_v11 = vmax.f32 %v2075_v14, 0.0 }
 0x212   : > { %v5264_v30 = vpop.permute.xlu0 %5263  ;;  %v2164_v37 = vpack.c.bf16 %v2124_v1, %v2122_v59  ;;  %v2163_v46 = vpack.c.bf16 %v2123_v11, %v2121_v55 }
 0x213   : > { %v5266_v61 = vunpack.i.h.bf16 %v5264_v30  ;;  %v5265_v56 = vunpack.i.l.bf16 %v5264_v30 }
 0x214   : > { %2260 = vmatprep.subr.bf16.mxu1 %v2164_v37 }
 0x215   : > { %v1900_v8 = vsel %vm1891_vm10, %v5260_v34, %v5265_v56  ;;  %v1901_v40 = vsel %vm1891_vm10, %v5261_v28, %v5266_v61  ;;  %v2045_v5 = vsel %vm2036_vm11, %v5265_v56, %v5255_v49  ;;  %v2046_v41 = vsel %vm2036_vm11, %v5266_v61, %v5256_v35  ;;  %2261 = vmatpush1.bf16.msra.mxu1 %v2163_v46 }
 0x216   : > { %v5274_v31 = vpop.permute.xlu1 %5273  ;;  %v2078_v27 = vmax.f32 %v6576_v16, %v2045_v5  ;;  %v2080_v53 = vmax.f32 %v6591_v48, %v2046_v41  ;;  %v2077_v21 = vmax.f32 %v6570_v12, %v1900_v8  ;;  %v2079_v7 = vmax.f32 %v6586_v17, %v1901_v40  ;;  %v5269_v18 = vpop.permute.xlu0 %5268 }
 0x217   : > { %v5271_v10 = vunpack.i.h.bf16 %v5269_v18  ;;  %v5270_v44 = vunpack.i.l.bf16 %v5269_v18  ;;  %v5276_v39 = vunpack.i.h.bf16 %v5274_v31  ;;  %v5275_v42 = vunpack.i.l.bf16 %v5274_v31 }
 0x218   : > { %v2126_v25 = vmax.f32 %v2078_v27, 0.0  ;;  %v2128_v58 = vmax.f32 %v2080_v53, 0.0  ;;  %v2125_v0 = vmax.f32 %v2077_v21, 0.0  ;;  %v2127_v33 = vmax.f32 %v2079_v7, 0.0 }
 0x21a   : > { %v5279_v47 = vpop.permute.xlu1 %5278  ;;  %v2166_v38 = vpack.c.bf16 %v2128_v58, %v2126_v25  ;;  %v2165_v9 = vpack.c.bf16 %v2127_v33, %v2125_v0 }
 0x21b   : > { %v5281_v45 = vunpack.i.h.bf16 %v5279_v47  ;;  %v5280_v16 = vunpack.i.l.bf16 %v5279_v47 }
 0x21c   : > { %2262 = vmatprep.subr.bf16.mxu1 %v2166_v38 }
 0x21d   : > { %v2048_v48 = vsel %vm2036_vm11, %v5281_v45, %v5271_v10  ;;  %v1902_v12 = vsel %vm1891_vm10, %v5275_v42, %v5280_v16  ;;  %v1903_v17 = vsel %vm1891_vm10, %v5276_v39, %v5281_v45  ;;  %v2047_v23 = vsel %vm2036_vm11, %v5280_v16, %v5270_v44  ;;  %2263 = vmatpush1.bf16.msra.mxu1 %v2165_v9 }
 0x21e   : > { %v5289_v14 = vpop.permute.xlu0 %5288  ;;  %v2082_v4 = vmax.f32 %v6599_v60, %v2047_v23  ;;  %v2084_v59 = vmax.f32 %v6614_v20, %v2048_v48  ;;  %v2081_v1 = vmax.f32 %v6593_v52, %v1902_v12  ;;  %v2083_v55 = vmax.f32 %v6609_v13, %v1903_v17  ;;  %v5284_v11 = vpop.permute.xlu1 %5283 }
 0x21f   : > { %v5291_v46 = vunpack.i.h.bf16 %v5289_v14  ;;  %v5290_v35 = vunpack.i.l.bf16 %v5289_v14  ;;  %v5286_v8 = vunpack.i.h.bf16 %v5284_v11  ;;  %v5285_v40 = vunpack.i.l.bf16 %v5284_v11 }
 0x220   : > { %v2130_v28 = vmax.f32 %v2082_v4, 0.0  ;;  %v2132_v34 = vmax.f32 %v2084_v59, 0.0  ;;  %v2129_v30 = vmax.f32 %v2081_v1, 0.0  ;;  %v2131_v37 = vmax.f32 %v2083_v55, 0.0 }
 0x222   : > { %v5294_v49 = vpop.permute.xlu0 %5293  ;;  %v2168_v61 = vpack.c.bf16 %v2132_v34, %v2130_v28  ;;  %v2167_v56 = vpack.c.bf16 %v2131_v37, %v2129_v30 }
 0x223   : > { %v5296_v5 = vunpack.i.h.bf16 %v5294_v49  ;;  %v5295_v60 = vunpack.i.l.bf16 %v5294_v49 }
 0x224   : > { %2264 = vmatprep.subr.bf16.mxu1 %v2168_v61 }
 0x225   : > { %v1904_v20 = vsel %vm1891_vm10, %v5290_v35, %v5295_v60  ;;  %v1905_v52 = vsel %vm1891_vm10, %v5291_v46, %v5296_v5  ;;  %v2049_v13 = vsel %vm2036_vm11, %v5295_v60, %v5285_v40  ;;  %v2050_v41 = vsel %vm2036_vm11, %v5296_v5, %v5286_v8  ;;  %2265 = vmatpush1.bf16.msra.mxu1 %v2167_v56 }
 0x226   : > { %v5304_v31 = vpop.permute.xlu1 %5303  ;;  %v2086_v27 = vmax.f32 %v6622_v36, %v2049_v13  ;;  %v2088_v53 = vmax.f32 %v6637_v54, %v2050_v41  ;;  %v2085_v21 = vmax.f32 %v6616_v26, %v1904_v20  ;;  %v2087_v7 = vmax.f32 %v6632_v57, %v1905_v52  ;;  %v5299_v18 = vpop.permute.xlu0 %5298 }
 0x227   : > { %v5301_v10 = vunpack.i.h.bf16 %v5299_v18  ;;  %v5300_v44 = vunpack.i.l.bf16 %v5299_v18  ;;  %v5306_v39 = vunpack.i.h.bf16 %v5304_v31  ;;  %v5305_v42 = vunpack.i.l.bf16 %v5304_v31 }
 0x228   : > { %v2134_v25 = vmax.f32 %v2086_v27, 0.0  ;;  %v2136_v58 = vmax.f32 %v2088_v53, 0.0  ;;  %v2133_v0 = vmax.f32 %v2085_v21, 0.0  ;;  %v2135_v33 = vmax.f32 %v2087_v7, 0.0 }
 0x22a   : > { %v5309_v47 = vpop.permute.xlu1 %5308  ;;  %v2170_v38 = vpack.c.bf16 %v2136_v58, %v2134_v25  ;;  %v2169_v9 = vpack.c.bf16 %v2135_v33, %v2133_v0 }
 0x22b   : > { %v5311_v45 = vunpack.i.h.bf16 %v5309_v47  ;;  %v5310_v36 = vunpack.i.l.bf16 %v5309_v47 }
 0x22c   : > { %2266 = vmatprep.subr.bf16.mxu1 %v2170_v38 }
 0x22d   : > { %v2052_v54 = vsel %vm2036_vm11, %v5311_v45, %v5301_v10  ;;  %v1906_v26 = vsel %vm1891_vm10, %v5305_v42, %v5310_v36  ;;  %v1907_v57 = vsel %vm1891_vm10, %v5306_v39, %v5311_v45  ;;  %v2051_v16 = vsel %vm2036_vm11, %v5310_v36, %v5300_v44  ;;  %2267 = vmatpush1.bf16.msra.mxu1 %v2169_v9  ;;  %v7917_v39 = vld [vmem:[#allocation3_spill] sm:$0xff] }
 0x22e   : > { %v5319_v48 = vpop.permute.xlu0 %5318  ;;  %v2090_v12 = vmax.f32 %v6645_v3, %v2051_v16  ;;  %v2092_v17 = vmax.f32 %v6660_v62, %v2052_v54  ;;  %v2089_v23 = vmax.f32 %v6639_v2, %v1906_v26  ;;  %v2091_v14 = vmax.f32 %v6655_v29, %v1907_v57  ;;  %v5314_v4 = vpop.permute.xlu1 %5313 }
 0x22f   : > { %v5321_v28 = vunpack.i.h.bf16 %v5319_v48  ;;  %v5320_v34 = vunpack.i.l.bf16 %v5319_v48  ;;  %v5316_v35 = vunpack.i.h.bf16 %v5314_v4  ;;  %v5315_v49 = vunpack.i.l.bf16 %v5314_v4 }
 0x230   : > { %v2138_v59 = vmax.f32 %v2090_v12, 0.0  ;;  %v2140_v1 = vmax.f32 %v2092_v17, 0.0  ;;  %v2137_v55 = vmax.f32 %v2089_v23, 0.0  ;;  %v2139_v11 = vmax.f32 %v2091_v14, 0.0 }
 0x232   : > { %v5324_v30 = vpop.permute.xlu0 %5323  ;;  %v2172_v37 = vpack.c.bf16 %v2140_v1, %v2138_v59  ;;  %v2171_v46 = vpack.c.bf16 %v2139_v11, %v2137_v55 }
 0x233   : > { %v5326_v61 = vunpack.i.h.bf16 %v5324_v30  ;;  %v5325_v3 = vunpack.i.l.bf16 %v5324_v30 }
 0x234   : > { %2268 = vmatprep.subr.bf16.mxu1 %v2172_v37 }
 0x235   : > { %v1908_v62 = vsel %vm1891_vm10, %v5320_v34, %v5325_v3  ;;  %v1909_v2 = vsel %vm1891_vm10, %v5321_v28, %v5326_v61  ;;  %v2053_v29 = vsel %vm2036_vm11, %v5325_v3, %v5315_v49  ;;  %v2054_v56 = vsel %vm2036_vm11, %v5326_v61, %v5316_v35  ;;  %2269 = vmatpush1.bf16.msra.mxu1 %v2171_v46  ;;  %v7918_v46 = vld [vmem:[#allocation4_spill] sm:$0xff] }
 0x236   : > { %v5334_v8 = vpop.permute.xlu1 %5333  ;;  %v2094_v40 = vmax.f32 %v6668_v15, %v2053_v29  ;;  %v2096_v5 = vmax.f32 %v6683_v24, %v2054_v56  ;;  %v2093_v60 = vmax.f32 %v6662_v50, %v1908_v62  ;;  %v2095_v20 = vmax.f32 %v6678_v51, %v1909_v2  ;;  %v5329_v52 = vpop.permute.xlu0 %5328 }
 0x237   : > { %v5331_v53 = vunpack.i.h.bf16 %v5329_v52  ;;  %v5330_v21 = vunpack.i.l.bf16 %v5329_v52  ;;  %v5336_v58 = vunpack.i.h.bf16 %v5334_v8  ;;  %v5335_v0 = vunpack.i.l.bf16 %v5334_v8 }
 0x238   : > { %v2142_v13 = vmax.f32 %v2094_v40, 0.0  ;;  %v2144_v41 = vmax.f32 %v2096_v5, 0.0  ;;  %v2141_v31 = vmax.f32 %v2093_v60, 0.0  ;;  %v2143_v27 = vmax.f32 %v2095_v20, 0.0 }
 0x23a   : > { %v5339_v7 = vpop.permute.xlu1 %5338  ;;  %v2174_v18 = vpack.c.bf16 %v2144_v41, %v2142_v13  ;;  %v2173_v25 = vpack.c.bf16 %v2143_v27, %v2141_v31  ;;  %v7919_v13 = vld [vmem:[#allocation7_spill] sm:$0xff]  ;;  %v7920_v27 = vld [vmem:[#allocation6_spill] sm:$0xff] }
 0x23b   : > { %v5341_v33 = vunpack.i.h.bf16 %v5339_v7  ;;  %v5340_v15 = vunpack.i.l.bf16 %v5339_v7 }
 0x23c   : > { %2270 = vmatprep.subr.bf16.mxu1 %v2174_v18  ;;  %v7922_v18 = vld [vmem:[#allocation8_spill] sm:$0xff] }
 0x23d   : > { %v2056_v24 = vsel %vm2036_vm11, %v5341_v33, %v5331_v53  ;;  %v1910_v50 = vsel %vm1891_vm10, %v5335_v0, %v5340_v15  ;;  %v1911_v51 = vsel %vm1891_vm10, %v5336_v58, %v5341_v33  ;;  %v2055_v10 = vsel %vm2036_vm11, %v5340_v15, %v5330_v21  ;;  %2271 = vmatpush1.bf16.msra.mxu1 %v2173_v25  ;;  %v7921_v21 = vld [vmem:[#allocation5_spill] sm:$0xff] }
 0x23e   : > { %v5349_v44 = vpop.permute.xlu0 %5348  ;;  %v2098_v47 = vmax.f32 %v6691_v6, %v2055_v10  ;;  %v2100_v38 = vmax.f32 %v6706_v43, %v2056_v24  ;;  %v2097_v9 = vmax.f32 %v6685_v63, %v1910_v50  ;;  %v2099_v42 = vmax.f32 %v7917_v39, %v1911_v51  ;;  %v5344_v45 = vpop.permute.xlu1 %5343  ;;  %v5579_v51 = vld [vmem:[%s7885_s3] ss:$8 sps:$4 sm:$0xff]   ;;  %v5582_v10 = vld [vmem:[%s7885_s3 + $0x14] ss:$8 sps:$4 sm:$0xff]   ;;  %v5585_v39 = vld [vmem:[%s7885_s3 + $0x24] ss:$8 sps:$4 sm:$0xff]  }
 0x23f   : > { %v5351_v16 = vunpack.i.h.bf16 %v5349_v44  ;;  %v5350_v48 = vunpack.i.l.bf16 %v5349_v44  ;;  %v5346_v12 = vunpack.i.h.bf16 %v5344_v45  ;;  %v5345_v14 = vunpack.i.l.bf16 %v5344_v45  ;;  %v5597_v44 = vld [vmem:[%s7886_s4] sm:$0xff]   ;;  %v5600_v45 = vld [vmem:[%s7886_s4 + $0x18] sm:$0xff]  }
 0x240   : > { %v2146_v36 = vmax.f32 %v2098_v47, 0.0  ;;  %v2148_v54 = vmax.f32 %v2100_v38, 0.0  ;;  %v2145_v26 = vmax.f32 %v2097_v9, 0.0  ;;  %v2147_v57 = vmax.f32 %v2099_v42, 0.0  ;;  %v5598_v38 = vld [vmem:[%s7886_s4 + $0x8] sm:$0xff]   ;;  %v5599_v42 = vld [vmem:[%s7886_s4 + $0x10] sm:$0xff]  }
 0x241   : > { %v5789_v47 = vmov 0   ;;  %v5584_v9 = vld [vmem:[%s7885_s3 + $0x10] ss:$8 sps:$4 sm:$0xff]  }
 0x242   : > { %v5354_v17 = vpop.permute.xlu0 %5353  ;;  %v2176_v23 = vpack.c.bf16 %v2148_v54, %v2146_v36  ;;  %v5364_v6 = vpop.permute.xlu1 %5363  ;;  %v2175_v1 = vpack.c.bf16 %v2147_v57, %v2145_v26  ;;  %v5587_v36 = vld [vmem:[%s7885_s3 + $0x20] ss:$8 sps:$4 sm:$0xff]   ;;  %v5588_v54 = vld [vmem:[%s7885_s3 + $0x34] ss:$8 sps:$4 sm:$0xff]  }
 0x243   : > { %v5356_v4 = vunpack.i.h.bf16 %v5354_v17  ;;  %v5355_v59 = vunpack.i.l.bf16 %v5354_v17  ;;  %v5366_v49 = vunpack.i.h.bf16 %v5364_v6  ;;  %v5365_v61 = vunpack.i.l.bf16 %v5364_v6  ;;  %v5601_v26 = vld [vmem:[%s7886_s4 + $0x20] sm:$0xff]   ;;  %v5602_v57 = vld [vmem:[%s7886_s4 + $0x28] sm:$0xff]   ;;  %v5604_v17 = vld [vmem:[%s7886_s4 + $0x38] sm:$0xff]  }
 0x244   : > { %2272 = vmatprep.subr.bf16.mxu1 %v2176_v23  ;;  %v5593_v23 = vld [vmem:[%s7885_s3 + $0x40] ss:$8 sps:$4 sm:$0xff]   ;;  %v5596_v6 = vld [vmem:[%s7885_s3 + $0x50] ss:$8 sps:$4 sm:$0xff]  }
 0x245   : > { %v1912_v63 = vsel %vm1891_vm10, %v5350_v48, %v5355_v59  ;;  %v1913_v43 = vsel %vm1891_vm10, %v5351_v16, %v5356_v4  ;;  %v2057_v55 = vsel %vm2036_vm11, %v5355_v59, %v5345_v14  ;;  %v2058_v11 = vsel %vm2036_vm11, %v5356_v4, %v5346_v12  ;;  %2273 = vmatpush1.bf16.msra.mxu1 %v2175_v1  ;;  %v5590_v16 = vld [vmem:[%s7885_s3 + $0x30] ss:$8 sps:$4 sm:$0xff]   ;;  %v5591_v48 = vld [vmem:[%s7885_s3 + $0x44] ss:$8 sps:$4 sm:$0xff]   ;;  %v5594_v14 = vld [vmem:[%s7885_s3 + $0x54] ss:$8 sps:$4 sm:$0xff]  }
 0x246   : > { %v5359_v28 = vpop.permute.xlu0 %5358  ;;  %v2102_v34 = vmax.f32 %v6714_v19, %v2057_v55  ;;  %v2104_v30 = vmax.f32 %v6729_v22, %v2058_v11  ;;  %v2101_v37 = vmax.f32 %v6708_v32, %v1912_v63  ;;  %v2103_v35 = vmax.f32 %v7918_v46, %v1913_v43  ;;  %v5369_v2 = vpop.permute.xlu1 %5368  ;;  %v5603_v12 = vld [vmem:[%s7886_s4 + $0x30] sm:$0xff]   ;;  %v5605_v4 = vld [vmem:[%s7886_s4 + $0x40] sm:$0xff]   ;;  %v5606_v59 = vld [vmem:[%s7886_s4 + $0x48] sm:$0xff]  }
 0x247   : > { %v5361_v3 = vunpack.i.h.bf16 %v5359_v28  ;;  %v5360_v62 = vunpack.i.l.bf16 %v5359_v28  ;;  %v5371_v29 = vunpack.i.h.bf16 %v5369_v2  ;;  %v5370_v56 = vunpack.i.l.bf16 %v5369_v2  ;;  %v5607_v1 = vld [vmem:[%s7886_s4 + $0x50] sm:$0xff]   ;;  %v5608_v63 = vld [vmem:[%s7886_s4 + $0x58] sm:$0xff]   ;;  %v5609_v43 = vld [vmem:[%s7886_s4 + $0x60] sm:$0xff]  }
 0x248   : > { %v2150_v8 = vmax.f32 %v2102_v34, 0.0  ;;  %v2152_v40 = vmax.f32 %v2104_v30, 0.0  ;;  %v2149_v19 = vmax.f32 %v2101_v37, 0.0  ;;  %v2151_v20 = vmax.f32 %v2103_v35, 0.0  ;;  %v5610_v55 = vld [vmem:[%s7886_s4 + $0x68] sm:$0xff]   ;;  %v5611_v11 = vld [vmem:[%s7886_s4 + $0x70] sm:$0xff]  }
 0x249   : > { %v2059_v5 = vsel %vm2036_vm11, %v5365_v61, %v5360_v62  ;;  %v2060_v60 = vsel %vm2036_vm11, %v5366_v49, %v5361_v3  ;;  %v1914_v22 = vsel %vm1891_vm10, %v5370_v56, %v5365_v61  ;;  %v1915_v32 = vsel %vm1891_vm10, %v5371_v29, %v5366_v49 }
 0x24a   : > { %v2178_v52 = vpack.c.bf16 %v2152_v40, %v2150_v8  ;;  %v2106_v41 = vmax.f32 %v7919_v13, %v2059_v5  ;;  %v2177_v31 = vpack.c.bf16 %v2151_v20, %v2149_v19  ;;  %v2108_v53 = vmax.f32 %v7920_v27, %v2060_v60 }
 0x24b   : > { %v2105_v7 = vmax.f32 %v7921_v21, %v1914_v22  ;;  %v2107_v25 = vmax.f32 %v7922_v18, %v1915_v32  ;;  %vm4202_vm10 = vcmask 1040384   ;;  %vm4206_vm11 = vcmask 1041408  }
 0x24c   : > { %2274 = vmatprep.subr.bf16.mxu1 %v2178_v52  ;;  %v2154_v58 = vmax.f32 %v2106_v41, 0.0  ;;  %v2156_v0 = vmax.f32 %v2108_v53, 0.0 }
 0x24d   : > { %2275 = vmatpush1.bf16.msra.mxu1 %v2177_v31  ;;  %v2153_v33 = vmax.f32 %v2105_v7, 0.0  ;;  %v2155_v15 = vmax.f32 %v2107_v25, 0.0 }
 0x24e   : > { %v2180_v24 = vpack.c.bf16 %v2156_v0, %v2154_v58 }
 0x24f   : > { %v2179_v50 = vpack.c.bf16 %v2155_v15, %v2153_v33 }
 0x250   : > { %2276 = vmatprep.subr.bf16.mxu1 %v2180_v24 }
 0x251   : > { %2277 = vmatpush1.bf16.msra.mxu1 %v2179_v50  ;;  %v5612_v50 = vld [vmem:[%s7887_s5] ss:$8 sps:$4 sm:$0xff]  }
 0x252   : > { %2467 = vmatprep.subr.bf16.mxu1 %v5789_v47 }
 0x254   : > { %2287 = vmatmul.mubr.bf16.vlgmr.msra.gmra.mrb[0].mxu1 %v5579_v51  ;;  %v5614_v51 = vld [vmem:[%s7887_s5 + $0x4] ss:$8 sps:$4 sm:$0xff]  }
 0x255   : > { %4670 = vmatprep.mubr.msk.bf16.mxu1 %vm2235_vm9, %v5582_v10  ;;  %2468 = vmatpush1.bf16.msra.mxu1 %v5597_v44  ;;  %v5615_v10 = vld [vmem:[%s7887_s5 + $0x10] ss:$8 sps:$4 sm:$0xff]   ;;  %v5617_v44 = vld [vmem:[%s7887_s5 + $0x14] ss:$8 sps:$4 sm:$0xff]  }
 0x256   : > { %2469 = vmatprep.subr.bf16.mxu1 %v5789_v47  ;;  %3428 = vmatprep.subr.bf16.mxu0 %v5614_v51 }
 0x257   : > { %3429 = vmatpush1.bf16.msra.mxu0 %v5612_v50 }
 0x258   : > { %3430 = vmatprep.subr.bf16.mxu0 %v5617_v44 }
 0x259   : > { %2470 = vmatpush1.bf16.msra.mxu1 %v5598_v38  ;;  %v5618_v38 = vld [vmem:[%s7887_s5 + $0x20] ss:$8 sps:$4 sm:$0xff]  }
 0x25a   : > { %2471 = vmatprep.subr.bf16.mxu1 %v5789_v47 }
 0x25b   : > { %3431 = vmatpush1.bf16.msra.mxu0 %v5615_v10 }
 0x25c   : > { %2297 = vmatmul.mubr.bf16.gmra.mrb[4].mxu1 %v5584_v9  ;;  %v5620_v9 = vld [vmem:[%s7887_s5 + $0x24] ss:$8 sps:$4 sm:$0xff]  }
 0x25d   : > { %4671 = vmatprep.mubr.msk.bf16.mxu1 %vm2235_vm9, %v5585_v39  ;;  %2472 = vmatpush1.bf16.msra.mxu1 %v5599_v42  ;;  %v5623_v39 = vld [vmem:[%s7887_s5 + $0x34] ss:$8 sps:$4 sm:$0xff]   ;;  %v5621_v42 = vld [vmem:[%s7887_s5 + $0x30] ss:$8 sps:$4 sm:$0xff]  }
 0x25e   : > { %2473 = vmatprep.subr.bf16.mxu1 %v5789_v47  ;;  %3432 = vmatprep.subr.bf16.mxu0 %v5620_v9 }
 0x25f   : > { %3433 = vmatpush1.bf16.msra.mxu0 %v5618_v38 }
 0x260   : > { %3434 = vmatprep.subr.bf16.mxu0 %v5623_v39 }
 0x261   : > { %2474 = vmatpush1.bf16.msra.mxu1 %v5600_v45  ;;  %v5626_v45 = vld [vmem:[%s7887_s5 + $0x44] ss:$8 sps:$4 sm:$0xff]  }
 0x262   : > { %2475 = vmatprep.subr.bf16.mxu1 %v5789_v47 }
 0x263   : > { %3435 = vmatpush1.bf16.msra.mxu0 %v5621_v42 }
 0x264   : > { %2307 = vmatmul.mubr.bf16.gmra.mrb[8].mxu1 %v5587_v36  ;;  %v5624_v36 = vld [vmem:[%s7887_s5 + $0x40] ss:$8 sps:$4 sm:$0xff]   ;;  %3436 = vmatprep.subr.bf16.mxu0 %v5626_v45 }
 0x265   : > { %4672 = vmatprep.mubr.msk.bf16.mxu1 %vm2235_vm9, %v5588_v54  ;;  %2476 = vmatpush1.bf16.msra.mxu1 %v5601_v26  ;;  %v5629_v54 = vld [vmem:[%s7887_s5 + $0x54] ss:$8 sps:$4 sm:$0xff]   ;;  %v5627_v26 = vld [vmem:[%s7887_s5 + $0x50] ss:$8 sps:$4 sm:$0xff]  }
 0x266   : > { %2477 = vmatprep.subr.bf16.mxu1 %v5789_v47 }
 0x267   : > { %3437 = vmatpush1.bf16.msra.mxu0 %v5624_v36 }
 0x268   : > { %3438 = vmatprep.subr.bf16.mxu0 %v5629_v54 }
 0x269   : > { %2478 = vmatpush1.bf16.msra.mxu1 %v5602_v57  ;;  %v5632_v57 = vld [vmem:[%s7887_s5 + $0x64] ss:$8 sps:$4 sm:$0xff]  }
 0x26a   : > { %2479 = vmatprep.subr.bf16.mxu1 %v5789_v47 }
 0x26b   : > { %3439 = vmatpush1.bf16.msra.mxu0 %v5627_v26 }
 0x26c   : > { %2317 = vmatmul.mubr.bf16.gmra.mrb[12].mxu1 %v5590_v16  ;;  %v5630_v16 = vld [vmem:[%s7887_s5 + $0x60] ss:$8 sps:$4 sm:$0xff]   ;;  %3440 = vmatprep.subr.bf16.mxu0 %v5632_v57 }
 0x26d   : > { %4673 = vmatprep.mubr.msk.bf16.mxu1 %vm2235_vm9, %v5591_v48  ;;  %2480 = vmatpush1.bf16.msra.mxu1 %v5603_v12  ;;  %v5635_v48 = vld [vmem:[%s7887_s5 + $0x74] ss:$8 sps:$4 sm:$0xff]   ;;  %v5633_v12 = vld [vmem:[%s7887_s5 + $0x70] ss:$8 sps:$4 sm:$0xff]  }
 0x26e   : > { %2481 = vmatprep.subr.bf16.mxu1 %v5789_v47 }
 0x26f   : > { %3441 = vmatpush1.bf16.msra.mxu0 %v5630_v16 }
 0x270   : > { %3442 = vmatprep.subr.bf16.mxu0 %v5635_v48 }
 0x271   : > { %2482 = vmatpush1.bf16.msra.mxu1 %v5604_v17  ;;  %v5638_v17 = vld [vmem:[%s7887_s5 + $0x84] ss:$8 sps:$4 sm:$0xff]  }
 0x272   : > { %2483 = vmatprep.subr.bf16.mxu1 %v5789_v47 }
 0x273   : > { %3443 = vmatpush1.bf16.msra.mxu0 %v5633_v12 }
 0x274   : > { %2327 = vmatmul.mubr.bf16.gmra.mrb[16].mxu1 %v5593_v23  ;;  %v5636_v23 = vld [vmem:[%s7887_s5 + $0x80] ss:$8 sps:$4 sm:$0xff]   ;;  %3444 = vmatprep.subr.bf16.mxu0 %v5638_v17 }
 0x275   : > { %4674 = vmatprep.mubr.msk.bf16.mxu1 %vm2235_vm9, %v5594_v14  ;;  %2484 = vmatpush1.bf16.msra.mxu1 %v5605_v4  ;;  %v5641_v14 = vld [vmem:[%s7887_s5 + $0x94] ss:$8 sps:$4 sm:$0xff]   ;;  %v5639_v4 = vld [vmem:[%s7887_s5 + $0x90] ss:$8 sps:$4 sm:$0xff]  }
 0x276   : > { %2485 = vmatprep.subr.bf16.mxu1 %v5789_v47 }
 0x277   : > { %3445 = vmatpush1.bf16.msra.mxu0 %v5636_v23 }
 0x278   : > { %3446 = vmatprep.subr.bf16.mxu0 %v5641_v14 }
 0x279   : > { %2486 = vmatpush1.bf16.msra.mxu1 %v5606_v59  ;;  %v5644_v59 = vld [vmem:[%s7887_s5 + $0xa4] ss:$8 sps:$4 sm:$0xff]  }
 0x27a   : > { %2487 = vmatprep.subr.bf16.mxu1 %v5789_v47 }
 0x27b   : > { %3447 = vmatpush1.bf16.msra.mxu0 %v5639_v4 }
 0x27c   : > { %2337 = vmatmul.mubr.bf16.gmra.mrb[20].mxu1 %v5596_v6  ;;  %v5642_v6 = vld [vmem:[%s7887_s5 + $0xa0] ss:$8 sps:$4 sm:$0xff]   ;;  %3448 = vmatprep.subr.bf16.mxu0 %v5644_v59 }
 0x27d   : > { %2488 = vmatpush1.bf16.msra.mxu1 %v5607_v1  ;;  %v5647_v1 = vld [vmem:[%s7887_s5 + $0xb4] ss:$8 sps:$4 sm:$0xff]  }
 0x27e   : > { %2489 = vmatprep.subr.bf16.mxu1 %v5789_v47 }
 0x27f   : > { %3449 = vmatpush1.bf16.msra.mxu0 %v5642_v6 }
 0x280   : > { %3450 = vmatprep.subr.bf16.mxu0 %v5647_v1 }
 0x281   : > { %2490 = vmatpush1.bf16.msra.mxu1 %v5608_v63  ;;  %v5645_v63 = vld [vmem:[%s7887_s5 + $0xb0] ss:$8 sps:$4 sm:$0xff]  }
 0x282   : > { %2491 = vmatprep.subr.bf16.mxu1 %v5789_v47 }
 0x283   : > { %3451 = vmatpush1.bf16.msra.mxu0 %v5645_v63 }
 0x285   : > { %2492 = vmatpush1.bf16.msra.mxu1 %v5609_v43  ;;  %v5650_v43 = vld [vmem:[%s7887_s5 + $0xc4] ss:$8 sps:$4 sm:$0xff]  }
 0x286   : > { %2493 = vmatprep.subr.bf16.mxu1 %v5789_v47  ;;  %3452 = vmatprep.subr.bf16.mxu0 %v5650_v43 }
 0x289   : > { %2494 = vmatpush1.bf16.msra.mxu1 %v5610_v55  ;;  %v5648_v55 = vld [vmem:[%s7887_s5 + $0xc0] ss:$8 sps:$4 sm:$0xff]  }
 0x28a   : > { %2495 = vmatprep.subr.bf16.mxu1 %v5789_v47  ;;  %3453 = vmatpush1.bf16.msra.mxu0 %v5648_v55 }
 0x28d   : > { %2496 = vmatpush1.bf16.msra.mxu1 %v5611_v11  ;;  %v5653_v11 = vld [vmem:[%s7887_s5 + $0xd4] ss:$8 sps:$4 sm:$0xff]  }
 0x28e   : > { %3454 = vmatprep.subr.bf16.mxu0 %v5653_v11 }
 0x327   : > { %v2288_v28 = vpop.f32.mrb[0].mxu1 }
 0x328   : > { %v2290_v34 = vpop.f32.mrb[1].mxu1 }
 0x329   : > { %v2292_v30 = vpop.f32.mrb[2].mxu1 }
 0x32a   : > { %v2347_v37 = vpack.c.bf16 %v2292_v30, %v2288_v28  ;;  %v2294_v46 = vpop.f32.mrb[3].mxu1  ;;  %v5651_v28 = vld [vmem:[%s7887_s5 + $0xd0] ss:$8 sps:$4 sm:$0xff]   ;;  %v5656_v30 = vld [vmem:[%s7887_s5 + $0xe4] ss:$8 sps:$4 sm:$0xff]  }
 0x32b   : > { %v2348_v35 = vpack.c.bf16 %v2294_v46, %v2290_v34  ;;  %3455 = vmatpush1.bf16.msra.mxu0 %v5651_v28 }
 0x32c   : > { %3456 = vmatprep.subr.bf16.mxu0 %v5656_v30 }
 0x32d   : > { %4690 = vmatprep.mubr.msk.bf16.mxu1 %vm561_vm7, %v2348_v35 }
 0x32e   : > { %2500 = vmatmul.mubr.bf16.vlgmr.msra.gmra.mrb[24].mxu1 %v2347_v37 }
 0x32f   : > { %v2298_v49 = vpop.f32.mrb[4].mxu1 }
 0x330   : > { %v2300_v61 = vpop.f32.mrb[5].mxu1 }
 0x331   : > { %v2302_v3 = vpop.f32.mrb[6].mxu1 }
 0x332   : > { %v2349_v62 = vpack.c.bf16 %v2302_v3, %v2298_v49  ;;  %v2304_v2 = vpop.f32.mrb[7].mxu1 }
 0x333   : > { %v2350_v29 = vpack.c.bf16 %v2304_v2, %v2300_v61 }
 0x335   : > { %4691 = vmatprep.mubr.msk.bf16.mxu1 %vm561_vm7, %v2350_v29 }
 0x336   : > { %2508 = vmatmul.mubr.bf16.gmra.mrb[28].mxu1 %v2349_v62  ;;  %v5654_v62 = vld [vmem:[%s7887_s5 + $0xe0] ss:$8 sps:$4 sm:$0xff]  }
 0x337   : > { %v2308_v56 = vpop.f32.mrb[8].mxu1  ;;  %3457 = vmatpush1.bf16.msra.mxu0 %v5654_v62 }
 0x338   : > { %v2310_v8 = vpop.f32.mrb[9].mxu1 }
 0x339   : > { %v2312_v40 = vpop.f32.mrb[10].mxu1 }
 0x33a   : > { %v2351_v5 = vpack.c.bf16 %v2312_v40, %v2308_v56  ;;  %v2314_v60 = vpop.f32.mrb[11].mxu1 }
 0x33b   : > { %v2352_v19 = vpack.c.bf16 %v2314_v60, %v2310_v8 }
 0x33d   : > { %4692 = vmatprep.mubr.msk.bf16.mxu1 %vm561_vm7, %v2352_v19 }
 0x33e   : > { %2516 = vmatmul.mubr.bf16.gmra.mrb[32].mxu1 %v2351_v5  ;;  %v5659_v5 = vld [vmem:[%s7887_s5 + $0xf4] ss:$8 sps:$4 sm:$0xff]  }
 0x33f   : > { %v2318_v20 = vpop.f32.mrb[12].mxu1  ;;  %3458 = vmatprep.subr.bf16.mxu0 %v5659_v5 }
 0x340   : > { %v2320_v22 = vpop.f32.mrb[13].mxu1 }
 0x341   : > { %v2322_v32 = vpop.f32.mrb[14].mxu1 }
 0x342   : > { %v2353_v52 = vpack.c.bf16 %v2322_v32, %v2318_v20  ;;  %v2324_v13 = vpop.f32.mrb[15].mxu1  ;;  %v5657_v32 = vld [vmem:[%s7887_s5 + $0xf0] ss:$8 sps:$4 sm:$0xff]  }
 0x343   : > { %v2354_v41 = vpack.c.bf16 %v2324_v13, %v2320_v22  ;;  %3459 = vmatpush1.bf16.msra.mxu0 %v5657_v32  ;;  %v5662_v13 = vld [vmem:[%s7887_s5 + $0x104] ss:$8 sps:$4 sm:$0xff]  }
 0x344   : > { %3501 = vmatprep.subr.bf16.mxu0 %v5662_v13 }
 0x345   : > { %4693 = vmatprep.mubr.msk.bf16.mxu1 %vm561_vm7, %v2354_v41 }
 0x346   : > { %2524 = vmatmul.mubr.bf16.gmra.mrb[36].mxu1 %v2353_v52 }
 0x347   : > { %v2328_v31 = vpop.f32.mrb[16].mxu1 }
 0x348   : > { %v2330_v27 = vpop.f32.mrb[17].mxu1 }
 0x349   : > { %v2332_v53 = vpop.f32.mrb[18].mxu1 }
 0x34a   : > { %v2355_v21 = vpack.c.bf16 %v2332_v53, %v2328_v31  ;;  %v2334_v7 = vpop.f32.mrb[19].mxu1 }
 0x34b   : > { %v2356_v18 = vpack.c.bf16 %v2334_v7, %v2330_v27 }
 0x34d   : > { %4694 = vmatprep.mubr.msk.bf16.mxu1 %vm561_vm7, %v2356_v18 }
 0x34e   : > { %2532 = vmatmul.mubr.bf16.gmra.mrb[40].mxu1 %v2355_v21 }
 0x34f   : > { %v2338_v25 = vpop.f32.mrb[20].mxu1 }
 0x350   : > { %v2340_v58 = vpop.f32.mrb[21].mxu1 }
 0x351   : > { %v2342_v0 = vpop.f32.mrb[22].mxu1 }
 0x352   : > { %v2357_v33 = vpack.c.bf16 %v2342_v0, %v2338_v25  ;;  %v2344_v15 = vpop.f32.mrb[23].mxu1 }
 0x353   : > { %v2358_v24 = vpack.c.bf16 %v2344_v15, %v2340_v58 }
 0x355   : > { %4695 = vmatprep.mubr.msk.bf16.mxu1 %vm561_vm7, %v2358_v24 }
 0x356   : > { %2540 = vmatmul.mubr.bf16.gmra.mrb[44].mxu1 %v2357_v33 }
 0x357   : > { %3946 = vmatprep.mubr.bf16.mxu1 %v5789_v47 }
 0x401   : > { %v7049_v34 = vpop.f32.mrb[24].mxu1 }
 0x402   : > { %v2562_v37 = vrot.slane %v7049_v34, 3  ;;  %v2503_v46 = vpop.f32.mrb[25].mxu1  ;;  %v2568_v35 = vrot.slane %v7049_v34, 4  ;;  %v2556_v61 = vrot.slane %v7049_v34, 2  ;;  %v2550_v3 = vrot.slane %v7049_v34, 1 }
 0x403   : > { %v7056_v49 = vpop.f32.mrb[26].mxu1 }
 0x404   : > { %v2551_v2 = vrot.slane %v7056_v49, 1  ;;  %v2557_v29 = vrot.slane %v7056_v49, 2  ;;  %v2563_v56 = vrot.slane %v7056_v49, 3  ;;  %v2569_v8 = vrot.slane %v7056_v49, 4  ;;  %v2506_v40 = vpop.f32.mrb[27].mxu1 }
 0x406   : > { %v2558_v60 = vsel %vm498_vm2, %v2556_v61, %v2557_v29  ;;  %v2552_v19 = vsel %vm481_vm0, %v2550_v3, %v2551_v2  ;;  %v2570_v20 = vsel %vm532_vm3, %v2568_v35, %v2569_v8  ;;  %v7074_v22 = vsel %vm515_vm1, %v2562_v37, %v2563_v56 }
 0x409   : > { %v7079_v52 = vpop.f32.mrb[28].mxu1 }
 0x40a   : > { %v2598_v41 = vrot.slane %v7079_v52, 3  ;;  %v2606_v31 = vrot.slane %v7079_v52, 4  ;;  %v2511_v27 = vpop.f32.mrb[29].mxu1  ;;  %v2590_v53 = vrot.slane %v7079_v52, 2  ;;  %v2582_v21 = vrot.slane %v7079_v52, 1 }
 0x40b   : > { %v7088_v7 = vpop.f32.mrb[30].mxu1 }
 0x40c   : > { %v2514_v18 = vpop.f32.mrb[31].mxu1  ;;  %v2591_v25 = vsel %vm498_vm2, %v2557_v29, %v2590_v53  ;;  %v2583_v58 = vsel %vm481_vm0, %v2551_v2, %v2582_v21  ;;  %v7092_v0 = vpack.i.bf16 %v2570_v20, %v2606_v31  ;;  %v2599_v33 = vsel %vm515_vm1, %v2563_v56, %v2598_v41 }
 0x40d   : > { %v5377_v15 = vpack.i.bf16 %v2590_v53, %v2591_v25  ;;  %v5372_v24 = vpack.i.bf16 %v2582_v21, %v2583_v58  ;;  %v7095_v50 = vpack.i.bf16 %v2598_v41, %v2599_v33  ;;  %v2620_v42 = vrot.slane %v7088_v7, 1 }
 0x40e   : > { %v2626_v45 = vrot.slane %v7088_v7, 2  ;;  %v2632_v36 = vrot.slane %v7088_v7, 3  ;;  %v2638_v54 = vrot.slane %v7088_v7, 4 }
 0x40f   : > { %5378 = vrot.lane.b32.xlu1 %v5377_v15, %s5786_s19  ;;  %5373 = vrot.lane.b32.xlu0 %v5372_v24, %s5790_s14 }
 0x411   : > { %v7099_v51 = vpop.f32.mrb[32].mxu1 }
 0x412   : > { %v2621_v10 = vrot.slane %v7099_v51, 1  ;;  %v2627_v44 = vrot.slane %v7099_v51, 2  ;;  %v2633_v38 = vrot.slane %v7099_v51, 3  ;;  %v2639_v9 = vrot.slane %v7099_v51, 4  ;;  %v2519_v39 = vpop.f32.mrb[33].mxu1 }
 0x413   : > { %v7109_v26 = vpop.f32.mrb[34].mxu1  ;;  %2559 = vrot.lane.b32.xlu1 %v2558_v60, %s5786_s19  ;;  %2553 = vrot.lane.b32.xlu0 %v2552_v19, %s5790_s14 }
 0x414   : > { %v2665_v57 = vrot.slane %v7109_v26, 3  ;;  %v2673_v16 = vrot.slane %v7109_v26, 4  ;;  %v2649_v48 = vrot.slane %v7109_v26, 1  ;;  %v2522_v12 = vpop.f32.mrb[35].mxu1  ;;  %v2657_v17 = vrot.slane %v7109_v26, 2 }
 0x415   : > { %v2628_v23 = vsel %vm498_vm2, %v2626_v45, %v2627_v44  ;;  %v2622_v14 = vsel %vm481_vm0, %v2620_v42, %v2621_v10  ;;  %v2634_v4 = vsel %vm515_vm1, %v2632_v36, %v2633_v38  ;;  %v2640_v59 = vsel %vm532_vm3, %v2638_v54, %v2639_v9 }
 0x416   : > { %v2650_v6 = vsel %vm481_vm0, %v2621_v10, %v2649_v48  ;;  %v2658_v1 = vsel %vm498_vm2, %v2627_v44, %v2657_v17  ;;  %v7123_v63 = vpack.i.bf16 %v2634_v4, %v2665_v57  ;;  %v7126_v43 = vsel %vm515_vm1, %v2633_v38, %v2665_v57 }
 0x417   : > { %v5382_v55 = vpack.i.bf16 %v2649_v48, %v2650_v6  ;;  %v5387_v11 = vpack.i.bf16 %v2657_v17, %v2658_v1  ;;  %v5432_v28 = vpack.i.bf16 %v7126_v43, %v7074_v22  ;;  %v7130_v30 = vpack.i.bf16 %v2640_v59, %v2673_v16 }
 0x419   : > { %5383 = vrot.lane.b32.xlu0 %v5382_v55, %s5790_s14  ;;  %v7133_v37 = vpop.f32.mrb[36].mxu1  ;;  %5388 = vrot.lane.b32.xlu1 %v5387_v11, %s5786_s19 }
 0x41a   : > { %v2687_v46 = vrot.slane %v7133_v37, 1  ;;  %v2693_v35 = vrot.slane %v7133_v37, 2  ;;  %v2699_v61 = vrot.slane %v7133_v37, 3  ;;  %v2705_v3 = vrot.slane %v7133_v37, 4  ;;  %v2527_v62 = vpop.f32.mrb[37].mxu1 }
 0x41b   : > { %v7140_v2 = vpop.f32.mrb[38].mxu1 }
 0x41c   : > { %v2688_v29 = vrot.slane %v7140_v2, 1  ;;  %v2694_v56 = vrot.slane %v7140_v2, 2  ;;  %v2700_v8 = vrot.slane %v7140_v2, 3  ;;  %v2706_v40 = vrot.slane %v7140_v2, 4  ;;  %v2530_v5 = vpop.f32.mrb[39].mxu1 }
 0x41e   : > { %v2695_v60 = vsel %vm498_vm2, %v2693_v35, %v2694_v56  ;;  %v2689_v19 = vsel %vm481_vm0, %v2687_v46, %v2688_v29  ;;  %v2701_v20 = vsel %vm515_vm1, %v2699_v61, %v2700_v8  ;;  %v2707_v32 = vsel %vm532_vm3, %v2705_v3, %v2706_v40 }
 0x421   : > { %v7150_v13 = vpop.f32.mrb[40].mxu1 }
 0x422   : > { %v2716_v41 = vrot.slane %v7150_v13, 1  ;;  %v2724_v31 = vrot.slane %v7150_v13, 2  ;;  %v2732_v27 = vrot.slane %v7150_v13, 3  ;;  %v2740_v53 = vrot.slane %v7150_v13, 4  ;;  %v2535_v21 = vpop.f32.mrb[41].mxu1 }
 0x423   : > { %v7156_v18 = vpop.f32.mrb[42].mxu1 }
 0x424   : > { %v2725_v25 = vsel %vm498_vm2, %v2694_v56, %v2724_v31  ;;  %v2717_v58 = vsel %vm481_vm0, %v2688_v29, %v2716_v41  ;;  %v2538_v33 = vpop.f32.mrb[43].mxu1  ;;  %v5407_v15 = vpack.i.bf16 %v2695_v60, %v2724_v31  ;;  %v5402_v44 = vpack.i.bf16 %v2689_v19, %v2716_v41 }
 0x425   : > { %v5397_v24 = vpack.i.bf16 %v2725_v25, %v2628_v23  ;;  %v5392_v10 = vpack.i.bf16 %v2717_v58, %v2622_v14  ;;  %v2733_v38 = vsel %vm515_vm1, %v2700_v8, %v2732_v27  ;;  %v5452_v9 = vpack.i.bf16 %v2707_v32, %v2740_v53 }
 0x426   : > { %v5447_v39 = vpack.i.bf16 %v2732_v27, %v2733_v38  ;;  %v2760_v42 = vrot.slane %v7156_v18, 2  ;;  %v2766_v45 = vrot.slane %v7156_v18, 3  ;;  %v2754_v54 = vrot.slane %v7156_v18, 1 }
 0x427   : > { %5398 = vrot.lane.b32.xlu1 %v5397_v24, %s5786_s19  ;;  %5393 = vrot.lane.b32.xlu0 %v5392_v10, %s5790_s14  ;;  %v2772_v57 = vrot.slane %v7156_v18, 4  ;;  %v5660_v24 = vld [vmem:[%s7887_s5 + $0x100] ss:$8 sps:$4 sm:$0xff]   ;;  %v5665_v10 = vld [vmem:[%s7887_s5 + $0x114] ss:$8 sps:$4 sm:$0xff]  }
 0x429   : > { %v7165_v36 = vpop.f32.mrb[44].mxu1 }
 0x42a   : > { %v2755_v16 = vrot.slane %v7165_v36, 1  ;;  %v2761_v48 = vrot.slane %v7165_v36, 2  ;;  %v2767_v12 = vrot.slane %v7165_v36, 3  ;;  %v2543_v17 = vpop.f32.mrb[45].mxu1  ;;  %v2773_v23 = vrot.slane %v7165_v36, 4 }
 0x42b   : > { %5408 = vrot.lane.b32.xlu1 %v5407_v15, %s5786_s19  ;;  %5403 = vrot.lane.b32.xlu0 %v5402_v44, %s5790_s14  ;;  %v7175_v14 = vpop.f32.mrb[46].mxu1  ;;  %v5666_v17 = vld [vmem:[%s7887_s5 + $0x120] ss:$8 sps:$4 sm:$0xff]  }
 0x42c   : > { %v2799_v4 = vrot.slane %v7175_v14, 3  ;;  %v2791_v59 = vrot.slane %v7175_v14, 2  ;;  %v2783_v6 = vrot.slane %v7175_v14, 1  ;;  %v2762_v1 = vsel %vm498_vm2, %v2760_v42, %v2761_v48  ;;  %v2546_v55 = vpop.f32.mrb[47].mxu1 }
 0x42d   : > { %v2756_v11 = vsel %vm481_vm0, %v2754_v54, %v2755_v16  ;;  %v2768_v46 = vsel %vm515_vm1, %v2766_v45, %v2767_v12  ;;  %v2774_v35 = vsel %vm532_vm3, %v2772_v57, %v2773_v23  ;;  %v2807_v5 = vrot.slane %v7175_v14, 4  ;;  %v5668_v54 = vld [vmem:[%s7887_s5 + $0x124] ss:$8 sps:$4 sm:$0xff]  }
 0x42e   : > { %v2792_v61 = vsel %vm498_vm2, %v2761_v48, %v2791_v59  ;;  %v2784_v3 = vsel %vm481_vm0, %v2755_v16, %v2783_v6  ;;  %v2800_v62 = vsel %vm515_vm1, %v2767_v12, %v2799_v4  ;;  %v5462_v29 = vpack.i.bf16 %v2768_v46, %v2799_v4  ;;  %v5671_v4 = vld [vmem:[%s7887_s5 + $0x134] ss:$8 sps:$4 sm:$0xff]   ;;  %v5674_v55 = vld [vmem:[%s7887_s5 + $0x144] ss:$8 sps:$4 sm:$0xff]  }
 0x42f   : > { %v5417_v56 = vpack.i.bf16 %v2791_v59, %v2792_v61  ;;  %v5412_v8 = vpack.i.bf16 %v2783_v6, %v2784_v3  ;;  %v5457_v40 = vpack.i.bf16 %v2800_v62, %v2701_v20 }
 0x431   : > { %5418 = vrot.lane.b32.xlu1 %v5417_v56, %s5786_s19  ;;  %5413 = vrot.lane.b32.xlu0 %v5412_v8, %s5790_s14  ;;  %v5677_v8 = vld [vmem:[%s7887_s5 + $0x154] ss:$8 sps:$4 sm:$0xff]  }
 0x435   : > { %2763 = vrot.lane.b32.xlu1 %v2762_v1, %s5786_s19  ;;  %2757 = vrot.lane.b32.xlu0 %v2756_v11, %s5790_s14  ;;  %v5669_v1 = vld [vmem:[%s7887_s5 + $0x130] ss:$8 sps:$4 sm:$0xff]   ;;  %s5796_s14 = smov 32  }
 0x439   : > { %5428 = vrot.lane.b32.xlu1 %v7092_v0, %s5791_s15  ;;  %5423 = vrot.lane.b32.xlu0 %v7095_v50, %s5792_s24 }
 0x43d   : > { %5438 = vrot.lane.b32.xlu1 %v7123_v63, %s5792_s24  ;;  %5433 = vrot.lane.b32.xlu0 %v5432_v28, %s5792_s24 }
 0x441   : > { %5448 = vrot.lane.b32.xlu1 %v5447_v39, %s5792_s24  ;;  %5443 = vrot.lane.b32.xlu0 %v7130_v30, %s5791_s15  ;;  %v5663_v39 = vld [vmem:[%s7887_s5 + $0x110] ss:$8 sps:$4 sm:$0xff]  }
 0x445   : > { %5458 = vrot.lane.b32.xlu1 %v5457_v40, %s5792_s24  ;;  %5453 = vrot.lane.b32.xlu0 %v5452_v9, %s5791_s15 }
 0x449   : > { %2808 = vrot.lane.b32.xlu1 %v2807_v5, %s5791_s15  ;;  %5463 = vrot.lane.b32.xlu0 %v5462_v29, %s5792_s24  ;;  %s443_s24 = scalar_lea.vmem %s7895_s13, %s4625_s28 }
 0x44d   : > { %2775 = vrot.lane.b32.xlu0 %v2774_v35, %s5791_s15  ;;  %v5672_v35 = vld [vmem:[%s7887_s5 + $0x140] ss:$8 sps:$4 sm:$0xff]  }
 0x481   : > { %v7199_v0 = vpop.permute.xlu1 %5378  ;;  %v5374_v50 = vpop.permute.xlu0 %5373 }
 0x482   : > { %v5381_v63 = vunpack.i.h.bf16 %v7199_v0  ;;  %v5380_v60 = vunpack.i.l.bf16 %v7199_v0  ;;  %v5376_v22 = vunpack.i.h.bf16 %v5374_v50  ;;  %v5375_v43 = vunpack.i.l.bf16 %v5374_v50 }
 0x484   : > { %v2611_v28 = vsel %vm2574_vm12, %v7079_v52, %v5376_v22  ;;  %v2613_v30 = vsel %vm561_vm7, %v5376_v22, %v5381_v63  ;;  %v2610_v19 = vsel %vm2574_vm12, %v7056_v49, %v5375_v43  ;;  %v2612_v20 = vsel %vm561_vm7, %v5375_v43, %v5380_v60 }
 0x485   : > { %v2828_v32 = vrot.slane %v2611_v28, 4  ;;  %v2831_v41 = vrot.slane %v2613_v30, 4  ;;  %v2827_v31 = vrot.slane %v2610_v19, 4  ;;  %v2830_v27 = vrot.slane %v2612_v20, 4  ;;  %v7213_v53 = vpop.permute.xlu1 %2559  ;;  %v2554_v21 = vpop.permute.xlu0 %2553  ;;  %v5675_v28 = vld [vmem:[%s7887_s5 + $0x150] ss:$8 sps:$4 sm:$0xff]  }
 0x486   : > { %v2575_v52 = vsel %vm2574_vm12, %v7049_v34, %v2554_v21  ;;  %v2576_v25 = vsel %vm561_vm7, %v2554_v21, %v7213_v53 }
 0x487   : > { %v2829_v58 = vsel %vm532_vm3, %v2827_v31, %v2828_v32  ;;  %v2832_v49 = vsel %vm532_vm3, %v2830_v27, %v2831_v41 }
 0x488   : > { %v2927_v33 = vpack.c.bf16 %v2829_v58, %v2575_v52  ;;  %v2928_v15 = vpack.c.bf16 %v2832_v49, %v2576_v25 }
 0x48a   : > { %3460 = vmatprep.mubr.bf16.mxu0 %v2928_v15 }
 0x48b   : > { %v5384_v44 = vpop.permute.xlu0 %5383  ;;  %v7227_v34 = vpop.permute.xlu1 %5388  ;;  %3461 = vmatmul.mubr.bf16.vlgmr.msra.gmra.mrb[48].mxu0 %v2927_v33  ;;  %v5678_v33 = vld [vmem:[%s7887_s5 + $0x160] ss:$8 sps:$4 sm:$0xff]  }
 0x48c   : > { %v5386_v38 = vunpack.i.h.bf16 %v5384_v44  ;;  %v5385_v9 = vunpack.i.l.bf16 %v5384_v44  ;;  %3502 = vmatpush1.bf16.msra.mxu0 %v5660_v24  ;;  %v5391_v57 = vunpack.i.h.bf16 %v7227_v34  ;;  %v5390_v16 = vunpack.i.l.bf16 %v7227_v34 }
 0x48d   : > { %3503 = vmatprep.subr.bf16.mxu0 %v5665_v10 }
 0x48e   : > { %v2678_v42 = vsel %vm2574_vm12, %v7109_v26, %v5386_v38  ;;  %v2677_v45 = vsel %vm2574_vm12, %v7099_v51, %v5385_v9  ;;  %v2679_v51 = vsel %vm561_vm7, %v5385_v9, %v5390_v16  ;;  %v2680_v23 = vsel %vm561_vm7, %v5386_v38, %v5391_v57 }
 0x48f   : > { %v2855_v48 = vrot.slane %v2678_v42, 4  ;;  %v2854_v12 = vrot.slane %v2677_v45, 4  ;;  %v2857_v59 = vrot.slane %v2679_v51, 4  ;;  %v2858_v6 = vrot.slane %v2680_v23, 4 }
 0x490   : > { %3504 = vmatpush1.bf16.msra.mxu0 %v5663_v39 }
 0x491   : > { %v2856_v26 = vsel %vm532_vm3, %v2854_v12, %v2855_v48  ;;  %3505 = vmatprep.subr.bf16.mxu0 %v5668_v54  ;;  %v2859_v61 = vsel %vm532_vm3, %v2857_v59, %v2858_v6  ;;  %v5681_v12 = vld [vmem:[%s7887_s5 + $0x170] ss:$8 sps:$4 sm:$0xff]  }
 0x494   : > { %3506 = vmatpush1.bf16.msra.mxu0 %v5666_v17 }
 0x495   : > { %3507 = vmatprep.subr.bf16.mxu0 %v5671_v4  ;;  %v5686_v4 = vld [vmem:[%s7887_s5 + $0x184] ss:$8 sps:$4 sm:$0xff]  }
 0x498   : > { %3508 = vmatpush1.bf16.msra.mxu0 %v5669_v1 }
 0x499   : > { %v7260_v11 = vpop.permute.xlu1 %5398  ;;  %v5394_v46 = vpop.permute.xlu0 %5393  ;;  %3509 = vmatprep.subr.bf16.mxu0 %v5674_v55 }
 0x49a   : > { %v5401_v3 = vunpack.i.h.bf16 %v7260_v11  ;;  %v5400_v62 = vunpack.i.l.bf16 %v7260_v11  ;;  %v5396_v29 = vunpack.i.h.bf16 %v5394_v46  ;;  %v5395_v56 = vunpack.i.l.bf16 %v5394_v46 }
 0x49c   : > { %v2645_v40 = vsel %vm561_vm7, %v5395_v56, %v5400_v62  ;;  %v2644_v5 = vsel %vm2574_vm12, %v7088_v7, %v5395_v56  ;;  %v2744_v50 = vsel %vm2574_vm12, %v7140_v2, %v5396_v29  ;;  %3510 = vmatpush1.bf16.msra.mxu0 %v5672_v35  ;;  %v2746_v20 = vsel %vm561_vm7, %v5396_v29, %v5401_v3  ;;  %v5680_v2 = vld [vmem:[%s7887_s5 + $0x164] ss:$8 sps:$4 sm:$0xff]   ;;  %v5684_v56 = vld [vmem:[%s7887_s5 + $0x180] ss:$8 sps:$4 sm:$0xff]  }
 0x49d   : > { %v7278_v22 = vpop.permute.xlu1 %5408  ;;  %v5404_v43 = vpop.permute.xlu0 %5403  ;;  %v2933_v30 = vpack.c.bf16 %v2859_v61, %v2645_v40  ;;  %v2932_v19 = vpack.c.bf16 %v2856_v26, %v2644_v5  ;;  %3511 = vmatprep.subr.bf16.mxu0 %v5677_v8  ;;  %v2881_v52 = vrot.slane %v2744_v50, 4  ;;  %v2884_v25 = vrot.slane %v2746_v20, 4 }
 0x49e   : > { %v5411_v32 = vunpack.i.h.bf16 %v7278_v22  ;;  %v5410_v7 = vunpack.i.l.bf16 %v7278_v22  ;;  %v5405_v41 = vunpack.i.l.bf16 %v5404_v43  ;;  %v5406_v31 = vunpack.i.h.bf16 %v5404_v43  ;;  %v5720_v22 = vld [vmem:[%s7887_s5 + $0x240] ss:$8 sps:$4 sm:$0xff]  }
 0x49f   : > { %3470 = vmatprep.mubr.bf16.mxu0 %v2933_v30 }
 0x4a0   : > { %v2745_v27 = vsel %vm2574_vm12, %v7150_v13, %v5405_v41  ;;  %v2747_v21 = vsel %vm561_vm7, %v5405_v41, %v5410_v7  ;;  %3471 = vmatmul.mubr.bf16.gmra.mrb[52].mxu0 %v2932_v19  ;;  %v2712_v15 = vsel %vm561_vm7, %v5406_v31, %v5411_v32  ;;  %v5683_v13 = vld [vmem:[%s7887_s5 + $0x174] ss:$8 sps:$4 sm:$0xff]   ;;  %v2711_v38 = vsel %vm2574_vm12, %v7133_v37, %v5406_v31  ;;  %v5687_v19 = vld [vmem:[%s7887_s5 + $0x190] ss:$8 sps:$4 sm:$0xff]   ;;  %v5692_v31 = vld [vmem:[%s7887_s5 + $0x1a4] ss:$8 sps:$4 sm:$0xff]  }
 0x4a1   : > { %v2882_v58 = vrot.slane %v2745_v27, 4  ;;  %v2885_v49 = vrot.slane %v2747_v21, 4  ;;  %3512 = vmatpush1.bf16.msra.mxu0 %v5675_v28 }
 0x4a2   : > { %3513 = vmatprep.subr.bf16.mxu0 %v5680_v2 }
 0x4a3   : > { %v7305_v24 = vpop.permute.xlu1 %5418  ;;  %v5414_v10 = vpop.permute.xlu0 %5413  ;;  %v2886_v44 = vsel %vm532_vm3, %v2884_v25, %v2885_v49  ;;  %v2883_v9 = vsel %vm532_vm3, %v2881_v52, %v2882_v58 }
 0x4a4   : > { %v5421_v39 = vunpack.i.h.bf16 %v7305_v24  ;;  %v5420_v42 = vunpack.i.l.bf16 %v7305_v24  ;;  %v5416_v45 = vunpack.i.h.bf16 %v5414_v10  ;;  %v5415_v54 = vunpack.i.l.bf16 %v5414_v10 }
 0x4a5   : > { %3514 = vmatpush1.bf16.msra.mxu0 %v5678_v33  ;;  %v2938_v48 = vpack.c.bf16 %v2886_v44, %v2712_v15  ;;  %v2937_v17 = vpack.c.bf16 %v2883_v9, %v2711_v38  ;;  %v5690_v33 = vld [vmem:[%s7887_s5 + $0x1a0] ss:$8 sps:$4 sm:$0xff]  }
 0x4a6   : > { %v2812_v26 = vsel %vm2574_vm12, %v7175_v14, %v5416_v45  ;;  %v2814_v37 = vsel %vm561_vm7, %v5416_v45, %v5421_v39  ;;  %v2811_v51 = vsel %vm2574_vm12, %v7165_v36, %v5415_v54  ;;  %v2813_v23 = vsel %vm561_vm7, %v5415_v54, %v5420_v42  ;;  %3515 = vmatprep.subr.bf16.mxu0 %v5683_v13  ;;  %v5695_v13 = vld [vmem:[%s7887_s5 + $0x1b4] ss:$8 sps:$4 sm:$0xff]   ;;  %v5693_v45 = vld [vmem:[%s7887_s5 + $0x1b0] ss:$8 sps:$4 sm:$0xff]   ;;  %v5698_v54 = vld [vmem:[%s7887_s5 + $0x1c4] ss:$8 sps:$4 sm:$0xff]  }
 0x4a7   : > { %v2909_v59 = vrot.slane %v2812_v26, 4  ;;  %v2912_v6 = vrot.slane %v2814_v37, 4  ;;  %v2908_v1 = vrot.slane %v2811_v51, 4  ;;  %v2911_v14 = vrot.slane %v2813_v23, 4  ;;  %3480 = vmatprep.mubr.bf16.mxu0 %v2938_v48  ;;  %v7329_v55 = vpop.permute.xlu1 %2763  ;;  %v2758_v46 = vpop.permute.xlu0 %2757  ;;  %v5699_v37 = vld [vmem:[%s7887_s5 + $0x1d0] ss:$8 sps:$4 sm:$0xff]  }
 0x4a8   : > { %v2778_v36 = vsel %vm2574_vm12, %v7156_v18, %v2758_v46  ;;  %v2779_v35 = vsel %vm561_vm7, %v2758_v46, %v7329_v55  ;;  %3481 = vmatmul.mubr.bf16.gmra.mrb[56].mxu0 %v2937_v17  ;;  %v5689_v18 = vld [vmem:[%s7887_s5 + $0x194] ss:$8 sps:$4 sm:$0xff]   ;;  %v5704_v51 = vld [vmem:[%s7887_s5 + $0x1e4] ss:$8 sps:$4 sm:$0xff]   ;;  %vm4210_vm12 = vcmask 1042432  }
 0x4a9   : > { %3516 = vmatpush1.bf16.msra.mxu0 %v5681_v12  ;;  %v2910_v61 = vsel %vm532_vm3, %v2908_v1, %v2909_v59  ;;  %v2913_v29 = vsel %vm532_vm3, %v2911_v14, %v2912_v6  ;;  %v5701_v12 = vld [vmem:[%s7887_s5 + $0x1d4] ss:$8 sps:$4 sm:$0xff]   ;;  %v5702_v1 = vld [vmem:[%s7887_s5 + $0x1e0] ss:$8 sps:$4 sm:$0xff]  }
 0x4aa   : > { %v2942_v8 = vpack.c.bf16 %v2910_v61, %v2778_v36  ;;  %v2943_v40 = vpack.c.bf16 %v2913_v29, %v2779_v35  ;;  %3517 = vmatprep.subr.bf16.mxu0 %v5686_v4  ;;  %v5707_v46 = vld [vmem:[%s7887_s5 + $0x1f4] ss:$8 sps:$4 sm:$0xff]  }
 0x4ab   : > { %v7343_v5 = vpop.permute.xlu1 %5428  ;;  %v5424_v50 = vpop.permute.xlu0 %5423 }
 0x4ac   : > { %v7346_v43 = vunpack.i.l.bf16 %v7343_v5  ;;  %v5426_v28 = vunpack.i.h.bf16 %v5424_v50  ;;  %v5425_v30 = vunpack.i.l.bf16 %v5424_v50  ;;  %3490 = vmatprep.mubr.bf16.mxu0 %v2943_v40  ;;  %v5431_v49 = vunpack.i.h.bf16 %v7343_v5  ;;  %v5710_v40 = vld [vmem:[%s7887_s5 + $0x204] ss:$8 sps:$4 sm:$0xff]  }
 0x4ad   : > { %3518 = vmatpush1.bf16.msra.mxu0 %v5684_v56  ;;  %v5705_v56 = vld [vmem:[%s7887_s5 + $0x1f0] ss:$8 sps:$4 sm:$0xff]  }
 0x4ae   : > { %v2615_v20 = vsel %vm2577_vm13, %v5381_v63, %v5426_v28  ;;  %v2617_v41 = vsel %vm2579_vm14, %v5426_v28, %v7346_v43  ;;  %v2614_v2 = vsel %vm2577_vm13, %v5380_v60, %v5425_v30  ;;  %3519 = vmatprep.subr.bf16.mxu0 %v5689_v18  ;;  %v2616_v52 = vsel %vm2579_vm14, %v5425_v30, %v7346_v43 }
 0x4af   : > { %v2834_v27 = vrot.slane %v2615_v20, 4  ;;  %v2837_v21 = vrot.slane %v2617_v41, 4  ;;  %v2833_v25 = vrot.slane %v2614_v2, 4  ;;  %v5434_v58 = vpop.permute.xlu0 %5433  ;;  %v2836_v63 = vrot.slane %v2616_v52, 4  ;;  %v5439_v17 = vpop.permute.xlu1 %5438 }
 0x4b0   : > { %3491 = vmatmul.mubr.bf16.gmra.mrb[60].mxu0 %v2942_v8  ;;  %v5435_v0 = vunpack.i.l.bf16 %v5434_v58  ;;  %v5440_v23 = vunpack.i.l.bf16 %v5439_v17  ;;  %v5436_v4 = vunpack.i.h.bf16 %v5434_v58  ;;  %v5441_v28 = vunpack.i.h.bf16 %v5439_v17 }
 0x4b1   : > { %3520 = vmatpush1.bf16.msra.mxu0 %v5687_v19  ;;  %v7366_v60 = vsel %vm532_vm3, %v2833_v25, %v2834_v27  ;;  %v2838_v15 = vsel %vm532_vm3, %v2836_v63, %v2837_v21 }
 0x4b2   : > { %3521 = vmatprep.subr.bf16.mxu0 %v5692_v31  ;;  %v2578_v10 = vsel %vm2577_vm13, %v7213_v53, %v5435_v0  ;;  %v2580_v44 = vsel %vm2579_vm14, %v5435_v0, %v5431_v49  ;;  %v5696_v53 = vld [vmem:[%s7887_s5 + $0x1c0] ss:$8 sps:$4 sm:$0xff]   ;;  %v2682_v30 = vsel %vm2577_vm13, %v5391_v57, %v5440_v23  ;;  %v2681_v19 = vsel %vm2577_vm13, %v5390_v16, %v5436_v4  ;;  %v5713_v57 = vld [vmem:[%s7887_s5 + $0x214] ss:$8 sps:$4 sm:$0xff]  }
 0x4b3   : > { %v2929_v38 = vpack.c.bf16 %v7366_v60, %v2578_v10  ;;  %v2930_v9 = vpack.c.bf16 %v2838_v15, %v2580_v44  ;;  %v7390_v48 = vpop.permute.xlu0 %5443  ;;  %v5449_v36 = vpop.permute.xlu1 %5448  ;;  %v5708_v31 = vld [vmem:[%s7887_s5 + $0x200] ss:$8 sps:$4 sm:$0xff]   ;;  %v2861_v16 = vrot.slane %v2682_v30, 4  ;;  %v2860_v52 = vrot.slane %v2681_v19, 4  ;;  %v5711_v60 = vld [vmem:[%s7887_s5 + $0x210] ss:$8 sps:$4 sm:$0xff]  }
 0x4b4   : > { %v7396_v26 = vunpack.i.l.bf16 %v7390_v48  ;;  %v5446_v8 = vunpack.i.h.bf16 %v7390_v48  ;;  %v5451_v18 = vunpack.i.h.bf16 %v5449_v36  ;;  %v5450_v50 = vunpack.i.l.bf16 %v5449_v36  ;;  %v5722_v36 = vld [vmem:[%s7887_s5 + $0x244] ss:$8 sps:$4 sm:$0xff]   ;;  %v3022_v48 = vld [vmem:[%s7888_s6] sm:$0x3] }
 0x4b5   : > { %3522 = vmatpush1.bf16.msra.mxu0 %v5690_v33  ;;  %3533 = vmatprep.mubr.bf16.mxu0 %v2930_v9  ;;  %v2862_v10 = vsel %vm532_vm3, %v2860_v52, %v2861_v16 }
 0x4b6   : > { %3523 = vmatprep.subr.bf16.mxu0 %v5695_v13  ;;  %v2683_v59 = vsel %vm2579_vm14, %v5436_v4, %v7396_v26  ;;  %v2684_v6 = vsel %vm2579_vm14, %v5440_v23, %v7396_v26  ;;  %v2647_v34 = vsel %vm2579_vm14, %v5441_v28, %v5446_v8  ;;  %v5716_v13 = vld [vmem:[%s7887_s5 + $0x224] ss:$8 sps:$4 sm:$0xff]   ;;  %v2749_v44 = vsel %vm2577_vm13, %v5410_v7, %v5451_v18  ;;  %v5714_v7 = vld [vmem:[%s7887_s5 + $0x220] ss:$8 sps:$4 sm:$0xff]  }
 0x4b7   : > { %v7411_v14 = vpop.permute.xlu0 %5453  ;;  %v2863_v35 = vrot.slane %v2683_v59, 4  ;;  %v2864_v61 = vrot.slane %v2684_v6, 4  ;;  %v5459_v27 = vpop.permute.xlu1 %5458  ;;  %v5717_v6 = vld [vmem:[%s7887_s5 + $0x230] ss:$8 sps:$4 sm:$0xff]  }
 0x4b8   : > { %v7417_v29 = vunpack.i.l.bf16 %v7411_v14  ;;  %v5460_v33 = vunpack.i.l.bf16 %v5459_v27  ;;  %v5456_v15 = vunpack.i.h.bf16 %v7411_v14 }
 0x4b9   : > { %3524 = vmatpush1.bf16.msra.mxu0 %v5693_v45  ;;  %v2865_v20 = vsel %vm532_vm3, %v2863_v35, %v2864_v61 }
 0x4ba   : > { %3525 = vmatprep.subr.bf16.mxu0 %v5698_v54  ;;  %v2750_v41 = vsel %vm2579_vm14, %v5450_v50, %v7417_v29  ;;  %v2751_v2 = vsel %vm2579_vm14, %v5451_v18, %v7417_v29  ;;  %v2935_v25 = vpack.c.bf16 %v2865_v20, %v2647_v34  ;;  %v5461_v54 = vunpack.i.h.bf16 %v5459_v27 }
 0x4bb   : > { %v7440_v21 = vpop.permute.xlu0 %5463  ;;  %v2890_v58 = vrot.slane %v2750_v41, 4  ;;  %v2891_v63 = vrot.slane %v2751_v2, 4  ;;  %v7463_v9 = vpop.permute.xlu1 %2808  ;;  %v2713_v35 = vsel %vm2577_vm13, %v5411_v32, %v5460_v33  ;;  %v2839_v27 = vrot.slane %v7346_v43, 4 }
 0x4bc   : > { %v5465_v0 = vunpack.i.l.bf16 %v7440_v21  ;;  %v2817_v11 = vsel %vm2579_vm14, %v5461_v54, %v7463_v9  ;;  %v2815_v32 = vsel %vm2577_vm13, %v5420_v42, %v5461_v54  ;;  %v2866_v34 = vrot.slane %v7396_v26, 4  ;;  %v7923_v26 = vld [vmem:[#allocation2_spill] sm:$0xff] }
 0x4bd   : > { %3526 = vmatpush1.bf16.msra.mxu0 %v5696_v53  ;;  %v2892_v45 = vsel %vm532_vm3, %v2890_v58, %v2891_v63  ;;  %v2920_v5 = vrot.slane %v7463_v9, 4 }
 0x4be   : > { %3527 = vmatprep.subr.bf16.mxu0 %v5701_v12  ;;  %v2818_v53 = vsel %vm2579_vm14, %v5465_v0, %v7463_v9  ;;  %v2646_v12 = vsel %vm2577_vm13, %v5400_v62, %v5441_v28 }
 0x4bf   : > { %v2934_v17 = vpack.c.bf16 %v2862_v10, %v2646_v12  ;;  %v2918_v4 = vrot.slane %v2818_v53, 4  ;;  %v2776_v59 = vpop.permute.xlu0 %2775 }
 0x4c1   : > { %3528 = vmatpush1.bf16.msra.mxu0 %v5699_v37  ;;  %v5719_v37 = vld [vmem:[%s7887_s5 + $0x234] ss:$8 sps:$4 sm:$0xff]  }
 0x4c2   : > { %3529 = vmatprep.subr.bf16.mxu0 %v5704_v51  ;;  %v2888_v51 = vrot.slane %v2749_v44, 4 }
 0x4c5   : > { %3530 = vmatpush1.bf16.msra.mxu0 %v5702_v1  ;;  %v2917_v1 = vrot.slane %v2817_v11, 4 }
 0x4c6   : > { %3531 = vmatprep.subr.bf16.mxu0 %v5707_v46  ;;  %v5466_v46 = vunpack.i.h.bf16 %v7440_v21  ;;  %v2931_v21 = vpack.c.bf16 %v2839_v27, %v5431_v49  ;;  %v2946_v49 = vpack.c.bf16 %v2920_v5, %v2776_v59 }
 0x4c8   : > { %v2781_v18 = vsel %vm2579_vm14, %v5466_v46, %v2776_v59  ;;  %v2780_v24 = vsel %vm2577_vm13, %v7329_v55, %v5466_v46  ;;  %v2893_v55 = vrot.slane %v7417_v29, 4  ;;  %v7925_v29 = vsub.s32 1, %v7923_v26 }
 0x4c9   : > { %3532 = vmatpush1.bf16.msra.mxu0 %v5705_v56  ;;  %v3021_v56 = vld [vmem:[%s7887_s5 + $0x250] sm:$0xff] }
 0x4ca   : > { %3574 = vmatprep.subr.bf16.mxu0 %v5710_v40  ;;  %v2816_v40 = vsel %vm2577_vm13, %v5421_v39, %v5465_v0  ;;  %v4771_v30 = vcombine.high %v3021_v56, %v3021_v56  ;;  %v4770_v19 = vcombine.low %v3021_v56, %v3021_v56  ;;  %v2914_v39 = vrot.slane %v2815_v32, 4 }
 0x4cb   : > { %v2915_v20 = vrot.slane %v2816_v40, 4  ;;  %v2941_v43 = vpack.c.bf16 %v2893_v55, %v5456_v15  ;;  %v7535_v52 = vrot.slane %v3022_v48, %v7925_v29 }
 0x4cc   : > { %3534 = vmatmul.mubr.bf16.vlgmr.msra.gmra.mrb[48].mxu0 %v2929_v38  ;;  %v2748_v38 = vsel %vm2577_vm13, %v5401_v3, %v5450_v50  ;;  %v2714_v3 = vsel %vm2579_vm14, %v5460_v33, %v5456_v15  ;;  %v2919_v50 = vsel %vm532_vm3, %v2917_v1, %v2918_v4  ;;  %v3423_v2 = vsel %vm532_vm3, %v4770_v19, 0 }
 0x4cd   : > { %3543 = vmatprep.mubr.bf16.mxu0 %v2935_v25  ;;  %3575 = vmatpush1.bf16.msra.mxu0 %v5708_v31  ;;  %v2887_v23 = vrot.slane %v2748_v38, 4  ;;  %v2940_v62 = vpack.c.bf16 %v2892_v45, %v2714_v3  ;;  %v2945_v41 = vpack.c.bf16 %v2919_v50, %v2781_v18  ;;  %v2916_v31 = vsel %vm532_vm3, %v2914_v39, %v2915_v20 }
 0x4ce   : > { %3576 = vmatprep.subr.bf16.mxu0 %v5713_v57  ;;  %v2944_v42 = vpack.c.bf16 %v2916_v31, %v2780_v24  ;;  %v2936_v57 = vpack.c.bf16 %v2866_v34, %v5446_v8  ;;  %v7924_v8 = vsub.s32 0, %v7923_v26 }
 0x4cf   : > { %v2889_v61 = vsel %vm532_vm3, %v2887_v23, %v2888_v51 }
 0x4d0   : > { %v2939_v28 = vpack.c.bf16 %v2889_v61, %v2713_v35  ;;  %v7531_v16 = vrot.slane %v3022_v48, %v7924_v8 }
 0x4d1   : > { %3577 = vmatpush1.bf16.msra.mxu0 %v5711_v60 }
 0x4d2   : > { %3578 = vmatprep.subr.bf16.mxu0 %v5716_v13 }
 0x4d4   : > { %3544 = vmatmul.mubr.bf16.gmra.mrb[52].mxu0 %v2934_v17 }
 0x4d5   : > { %3553 = vmatprep.mubr.bf16.mxu0 %v2940_v62  ;;  %3579 = vmatpush1.bf16.msra.mxu0 %v5714_v7 }
 0x4d6   : > { %3580 = vmatprep.subr.bf16.mxu0 %v5719_v37 }
 0x4d9   : > { %3581 = vmatpush1.bf16.msra.mxu0 %v5717_v6 }
 0x4da   : > { %3582 = vmatprep.subr.bf16.mxu0 %v5722_v36 }
 0x4dc   : > { %3554 = vmatmul.mubr.bf16.gmra.mrb[56].mxu0 %v2939_v28 }
 0x4dd   : > { %3563 = vmatprep.mubr.bf16.mxu0 %v2945_v41  ;;  %3583 = vmatpush1.bf16.msra.mxu0 %v5720_v22 }
 0x4de   : > { %4772 = vmatprep.subr.msk.bf16.mxu0 %vm532_vm3, %v4771_v30 }
 0x4e1   : > { %3585 = vmatpush1.bf16.msra.mxu0 %v3423_v2 }
 0x4e4   : > { %3564 = vmatmul.mubr.bf16.gmra.mrb[60].mxu0 %v2944_v42 }
 0x4e5   : > { %3606 = vmatprep.mubr.bf16.mxu0 %v5789_v47 }
 0x4ec   : > { %4773 = vmatmul.mubr.msk.bf16.vlgmr.msra.gmra.mrb[48].mxu0 %vm3409_vm15, %v2931_v21 }
 0x4ed   : > { %3616 = vmatprep.mubr.bf16.mxu0 %v5789_v47 }
 0x4f4   : > { %4774 = vmatmul.mubr.msk.bf16.gmra.mrb[52].mxu0 %vm3409_vm15, %v2936_v57 }
 0x4f5   : > { %3626 = vmatprep.mubr.bf16.mxu0 %v5789_v47 }
 0x4fc   : > { %4775 = vmatmul.mubr.msk.bf16.gmra.mrb[56].mxu0 %vm3409_vm15, %v2941_v43 }
 0x4fd   : > { %3636 = vmatprep.mubr.bf16.mxu0 %v5789_v47 }
 0x504   : > { %4776 = vmatmul.mubr.msk.bf16.gmra.mrb[60].mxu0 %vm3409_vm15, %v2946_v49 }
 0x5bf   : > { %v3608_v14 = vpop.f32.mrb[48].mxu0 }
 0x5c0   : > { %v7538_v25 = vadd.f32 %v3608_v14, %v7531_v16  ;;  %v3610_v58 = vpop.f32.mrb[49].mxu0 }
 0x5c1   : > { %v7541_v63 = vadd.f32 %v3610_v58, %v7535_v52  ;;  %v3612_v0 = vpop.f32.mrb[50].mxu0 }
 0x5c2   : > { %v4882_v60 = vadd.f32 %v3612_v0, %v7531_v16  ;;  %v3614_v33 = vpop.f32.mrb[51].mxu0  ;;  %v3687_v13 = vrot.slane %v7538_v25, 1 }
 0x5c3   : > { %v4883_v15 = vadd.f32 %v3614_v33, %v7535_v52  ;;  %v3690_v44 = vrot.slane %v7541_v63, 1 }
 0x5c4   : > { %v3688_v10 = vrot.slane %v4882_v60, 1 }
 0x5c5   : > { %v3691_v38 = vrot.slane %v4883_v15, 1 }
 0x5c6   : > { %v3689_v9 = vsel %vm481_vm0, %v3687_v13, %v3688_v10 }
 0x5c7   : > { %v7551_v45 = vmax.f32 %v7538_v25, %v3689_v9  ;;  %v3692_v54 = vsel %vm481_vm0, %v3690_v44, %v3691_v38  ;;  %v3618_v53 = vpop.f32.mrb[52].mxu0 }
 0x5c8   : > { %v7557_v12 = vmax.f32 %v7541_v63, %v3692_v54  ;;  %v4884_v7 = vadd.f32 %v3618_v53, %v7531_v16  ;;  %v3620_v17 = vpop.f32.mrb[53].mxu0 }
 0x5c9   : > { %v4885_v3 = vadd.f32 %v3620_v17, %v7535_v52  ;;  %v3622_v37 = vpop.f32.mrb[54].mxu0 }
 0x5ca   : > { %v3693_v51 = vrot.slane %v4884_v7, 1  ;;  %v4886_v23 = vadd.f32 %v3622_v37, %v7531_v16  ;;  %v3624_v11 = vpop.f32.mrb[55].mxu0 }
 0x5cb   : > { %v3695_v62 = vrot.slane %v4885_v3, 1  ;;  %v4887_v4 = vadd.f32 %v3624_v11, %v7535_v52 }
 0x5cc   : > { %v3694_v59 = vsel %vm481_vm0, %v3688_v10, %v3693_v51  ;;  %v3697_v6 = vrot.slane %v4886_v23, 1 }
 0x5cd   : > { %v7564_v1 = vmax.f32 %v4882_v60, %v3694_v59  ;;  %v3696_v46 = vsel %vm481_vm0, %v3691_v38, %v3695_v62  ;;  %v3699_v36 = vrot.slane %v4887_v4, 1 }
 0x5ce   : > { %v7567_v35 = vmax.f32 %v4883_v15, %v3696_v46  ;;  %v3698_v61 = vsel %vm481_vm0, %v3693_v51, %v3697_v6 }
 0x5cf   : > { %v7570_v56 = vmax.f32 %v4884_v7, %v3698_v61  ;;  %v3700_v40 = vsel %vm481_vm0, %v3695_v62, %v3699_v36  ;;  %v3628_v18 = vpop.f32.mrb[56].mxu0  ;;  %v5472_v50 = vpack.i.bf16 %v7564_v1, %v7551_v45 }
 0x5d0   : > { %v7575_v22 = vmax.f32 %v4885_v3, %v3700_v40  ;;  %v4888_v32 = vadd.f32 %v3628_v18, %v7531_v16  ;;  %v3630_v28 = vpop.f32.mrb[57].mxu0  ;;  %v5477_v24 = vpack.i.bf16 %v7567_v35, %v7557_v12 }
 0x5d1   : > { %v4889_v30 = vadd.f32 %v3630_v28, %v7535_v52  ;;  %v3632_v19 = vpop.f32.mrb[58].mxu0  ;;  %5473 = vrot.lane.b32.xlu1 %v5472_v50, %s5793_s18  ;;  %5468 = vrot.lane.b32.xlu0 %v5472_v50, %s5794_s20 }
 0x5d2   : > { %v3701_v20 = vrot.slane %v4888_v32, 1  ;;  %v4890_v41 = vadd.f32 %v3632_v19, %v7531_v16  ;;  %v3634_v39 = vpop.f32.mrb[59].mxu0 }
 0x5d3   : > { %v3703_v2 = vrot.slane %v4889_v30, 1  ;;  %v4891_v31 = vadd.f32 %v3634_v39, %v7535_v52 }
 0x5d4   : > { %v3702_v42 = vsel %vm481_vm0, %v3697_v6, %v3701_v20  ;;  %v3705_v27 = vrot.slane %v4890_v41, 1 }
 0x5d5   : > { %v7586_v21 = vmax.f32 %v4886_v23, %v3702_v42  ;;  %v3704_v34 = vsel %vm481_vm0, %v3699_v36, %v3703_v2  ;;  %v3707_v57 = vrot.slane %v4891_v31, 1  ;;  %5478 = vrot.lane.b32.xlu1 %v5477_v24, %s5793_s18 }
 0x5d6   : > { %v7590_v55 = vmax.f32 %v4887_v4, %v3704_v34  ;;  %v3706_v43 = vsel %vm481_vm0, %v3701_v20, %v3705_v27 }
 0x5d7   : > { %v7593_v5 = vmax.f32 %v4888_v32, %v3706_v43  ;;  %v3708_v49 = vsel %vm481_vm0, %v3703_v2, %v3707_v57  ;;  %v3638_v48 = vpop.f32.mrb[60].mxu0  ;;  %v5482_v26 = vpack.i.bf16 %v7586_v21, %v7570_v56 }
 0x5d8   : > { %v7598_v8 = vmax.f32 %v4889_v30, %v3708_v49  ;;  %v4892_v29 = vadd.f32 %v3638_v48, %v7531_v16  ;;  %v3640_v14 = vpop.f32.mrb[61].mxu0  ;;  %v5492_v9 = vpack.i.bf16 %v7590_v55, %v7575_v22 }
 0x5d9   : > { %v4893_v58 = vadd.f32 %v3640_v14, %v7535_v52  ;;  %v3642_v0 = vpop.f32.mrb[62].mxu0  ;;  %5483 = vrot.lane.b32.xlu1 %v5482_v26, %s5794_s20  ;;  %5488 = vrot.lane.b32.xlu0 %v5482_v26, %s5793_s18 }
 0x5da   : > { %v3709_v60 = vrot.slane %v4892_v29, 1  ;;  %v4894_v33 = vadd.f32 %v3642_v0, %v7531_v16  ;;  %v3644_v15 = vpop.f32.mrb[63].mxu0 }
 0x5db   : > { %v3711_v10 = vrot.slane %v4893_v58, 1  ;;  %v4895_v38 = vadd.f32 %v3644_v15, %v7535_v52 }
 0x5dc   : > { %v3710_v54 = vsel %vm481_vm0, %v3705_v27, %v3709_v60  ;;  %v3713_v53 = vrot.slane %v4894_v33, 1 }
 0x5dd   : > { %v7609_v7 = vmax.f32 %v4890_v41, %v3710_v54  ;;  %v3712_v17 = vsel %vm481_vm0, %v3707_v57, %v3711_v10  ;;  %v3715_v3 = vrot.slane %v4895_v38, 1  ;;  %5493 = vrot.lane.b32.xlu0 %v5492_v9, %s5793_s18 }
 0x5de   : > { %v7613_v37 = vmax.f32 %v4891_v31, %v3712_v17  ;;  %v3714_v16 = vsel %vm481_vm0, %v3709_v60, %v3713_v53  ;;  %v3735_v52 = vsel %vm481_vm0, %v3713_v53, %v3687_v13 }
 0x5df   : > { %v7619_v51 = vmax.f32 %v4892_v29, %v3714_v16  ;;  %v7621_v23 = vmax.f32 %v4894_v33, %v3735_v52  ;;  %v3716_v11 = vsel %vm481_vm0, %v3711_v10, %v3715_v3  ;;  %v3736_v62 = vsel %vm481_vm0, %v3715_v3, %v3690_v44 }
 0x5e0   : > { %v7627_v4 = vmax.f32 %v4893_v58, %v3716_v11  ;;  %v7629_v59 = vmax.f32 %v4895_v38, %v3736_v62  ;;  %v5502_v6 = vpack.i.bf16 %v7609_v7, %v7593_v5  ;;  %v5507_v13 = vpack.i.bf16 %v7613_v37, %v7598_v8 }
 0x5e1   : > { %v5522_v63 = vpack.i.bf16 %v7621_v23, %v7619_v51 }
 0x5e2   : > { %v5517_v25 = vpack.i.bf16 %v7629_v59, %v7627_v4  ;;  %5503 = vrot.lane.b32.xlu1 %v5502_v6, %s5793_s18  ;;  %5498 = vrot.lane.b32.xlu0 %v5502_v6, %s5794_s20 }
 0x5e6   : > { %5508 = vrot.lane.b32.xlu1 %v5507_v13, %s5793_s18  ;;  %5518 = vrot.lane.b32.xlu0 %v5517_v25, %s5793_s18 }
 0x5ea   : > { %5513 = vrot.lane.b32.xlu1 %v5522_v63, %s5794_s20  ;;  %5523 = vrot.lane.b32.xlu0 %v5522_v63, %s5793_s18 }
 0x643   : > { %v5474_v44 = vpop.permute.xlu1 %5473  ;;  %v5469_v46 = vpop.permute.xlu0 %5468 }
 0x644   : > { %v5476_v36 = vunpack.i.h.bf16 %v5474_v44  ;;  %v5475_v61 = vunpack.i.l.bf16 %v5474_v44  ;;  %v5471_v18 = vunpack.i.h.bf16 %v5469_v46  ;;  %v5470_v50 = vunpack.i.l.bf16 %v5469_v46 }
 0x647   : > { %v5479_v40 = vpop.permute.xlu1 %5478 }
 0x648   : > { %v5481_v32 = vunpack.i.h.bf16 %v5479_v40  ;;  %v5480_v28 = vunpack.i.l.bf16 %v5479_v40 }
 0x64a   : > { %v3802_v30 = vsel %vm3801_vm4, %v5475_v61, %v5480_v28  ;;  %v3803_v19 = vsel %vm3801_vm4, %v5476_v36, %v5481_v32  ;;  %v3850_v20 = vsel %vm1267_vm8, %v5480_v28, %v5470_v50  ;;  %v3851_v41 = vsel %vm1267_vm8, %v5481_v32, %v5471_v18 }
 0x64b   : > { %v3858_v39 = vmax.f32 %v7551_v45, %v3802_v30  ;;  %v3860_v2 = vmax.f32 %v7564_v1, %v3803_v19  ;;  %v5489_v31 = vpop.permute.xlu0 %5488  ;;  %v3859_v24 = vmax.f32 %v7557_v12, %v3850_v20  ;;  %v3861_v42 = vmax.f32 %v7567_v35, %v3851_v41  ;;  %v5484_v27 = vpop.permute.xlu1 %5483 }
 0x64c   : > { %v5486_v48 = vunpack.i.h.bf16 %v5484_v27  ;;  %v5485_v26 = vunpack.i.l.bf16 %v5484_v27  ;;  %v5491_v0 = vunpack.i.h.bf16 %v5489_v31  ;;  %v5490_v60 = vunpack.i.l.bf16 %v5489_v31 }
 0x64d   : > { %v3874_v34 = vmax.f32 %v3858_v39, 0.0  ;;  %v3876_v57 = vmax.f32 %v3860_v2, 0.0  ;;  %v3875_v43 = vmax.f32 %v3859_v24, 0.0  ;;  %v3877_v49 = vmax.f32 %v3861_v42, 0.0 }
 0x64f   : > { %v5494_v29 = vpop.permute.xlu0 %5493  ;;  %v3891_v14 = vpack.c.bf16 %v3877_v49, %v3875_v43  ;;  %v3890_v58 = vpack.c.bf16 %v3876_v57, %v3874_v34 }
 0x650   : > { %v5496_v45 = vunpack.i.h.bf16 %v5494_v29  ;;  %v5495_v33 = vunpack.i.l.bf16 %v5494_v29 }
 0x651   : > { %3914 = vmatprep.subr.bf16.mxu1 %v3891_v14 }
 0x652   : > { %v3853_v1 = vsel %vm1267_vm8, %v5496_v45, %v5486_v48  ;;  %v3804_v12 = vsel %vm3801_vm4, %v5490_v60, %v5495_v33  ;;  %v3805_v35 = vsel %vm3801_vm4, %v5491_v0, %v5496_v45  ;;  %v3852_v15 = vsel %vm1267_vm8, %v5495_v33, %v5485_v26  ;;  %3915 = vmatpush1.bf16.msra.mxu1 %v3890_v58 }
 0x653   : > { %v3862_v10 = vmax.f32 %v7570_v56, %v3804_v12  ;;  %v3864_v38 = vmax.f32 %v7586_v21, %v3805_v35  ;;  %v3863_v9 = vmax.f32 %v7575_v22, %v3852_v15  ;;  %v3865_v54 = vmax.f32 %v7590_v55, %v3853_v1  ;;  %v5729_v12 = vld [vmem:[%s7890_s8 + $0x10] sm:$0xff]   ;;  %v5730_v35 = vld [vmem:[%s7890_s8 + $0x18] sm:$0xff]   ;;  %v5731_v15 = vld [vmem:[%s7890_s8 + $0x20] sm:$0xff]  }
 0x654   : > { %v5504_v53 = vpop.permute.xlu1 %5503  ;;  %v5499_v17 = vpop.permute.xlu0 %5498 }
 0x655   : > { %v3878_v3 = vmax.f32 %v3862_v10, 0.0  ;;  %v3880_v16 = vmax.f32 %v3864_v38, 0.0  ;;  %v3879_v52 = vmax.f32 %v3863_v9, 0.0  ;;  %v3881_v11 = vmax.f32 %v3865_v54, 0.0  ;;  %v5732_v10 = vld [vmem:[%s7890_s8 + $0x28] sm:$0xff]   ;;  %v5733_v38 = vld [vmem:[%s7890_s8 + $0x30] sm:$0xff]  }
 0x656   : > { %v5506_v6 = vunpack.i.h.bf16 %v5504_v53  ;;  %v5505_v25 = vunpack.i.l.bf16 %v5504_v53  ;;  %v5501_v46 = vunpack.i.h.bf16 %v5499_v17  ;;  %v5500_v56 = vunpack.i.l.bf16 %v5499_v17  ;;  %v5734_v9 = vld [vmem:[%s7890_s8 + $0x38] sm:$0xff]   ;;  %v5735_v54 = vld [vmem:[%s7890_s8 + $0x40] sm:$0xff]   ;;  %v5736_v53 = vld [vmem:[%s7890_s8 + $0x48] sm:$0xff]  }
 0x657   : > { %v3892_v62 = vpack.c.bf16 %v3880_v16, %v3878_v3  ;;  %v3893_v44 = vpack.c.bf16 %v3881_v11, %v3879_v52 }
 0x658   : > { %v5509_v13 = vpop.permute.xlu1 %5508  ;;  %v5519_v63 = vpop.permute.xlu0 %5518 }
 0x659   : > { %v5511_v36 = vunpack.i.h.bf16 %v5509_v13  ;;  %v5510_v21 = vunpack.i.l.bf16 %v5509_v13  ;;  %v5521_v61 = vunpack.i.h.bf16 %v5519_v63  ;;  %v5520_v22 = vunpack.i.l.bf16 %v5519_v63  ;;  %3916 = vmatprep.subr.bf16.mxu1 %v3893_v44 }
 0x65a   : > { %3917 = vmatpush1.bf16.msra.mxu1 %v3892_v62 }
 0x65b   : > { %v3806_v55 = vsel %vm3801_vm4, %v5505_v25, %v5510_v21  ;;  %v3807_v40 = vsel %vm3801_vm4, %v5506_v6, %v5511_v36  ;;  %v3854_v18 = vsel %vm1267_vm8, %v5510_v21, %v5500_v56  ;;  %v3855_v50 = vsel %vm1267_vm8, %v5511_v36, %v5501_v46  ;;  %v5737_v46 = vld [vmem:[%s7891_s9 + $0x40] sm:$0xff]   ;;  %v5739_v36 = vld [vmem:[%s7891_s9 + $0x48] sm:$0xff]  }
 0x65c   : > { %v3866_v32 = vmax.f32 %v7593_v5, %v3806_v55  ;;  %v3868_v28 = vmax.f32 %v7609_v7, %v3807_v40  ;;  %v5514_v30 = vpop.permute.xlu1 %5513  ;;  %v5524_v19 = vpop.permute.xlu0 %5523  ;;  %v3867_v20 = vmax.f32 %v7598_v8, %v3854_v18  ;;  %v3869_v41 = vmax.f32 %v7613_v37, %v3855_v50  ;;  %v5738_v56 = vld [vmem:[%s7891_s9] sm:$0xff]   ;;  %v5740_v21 = vld [vmem:[%s7891_s9 + $0x8] sm:$0xff]   ;;  %v5743_v55 = vld [vmem:[%s7891_s9 + $0x58] sm:$0xff]  }
 0x65d   : > { %v5516_v39 = vunpack.i.h.bf16 %v5514_v30  ;;  %v5515_v2 = vunpack.i.l.bf16 %v5514_v30  ;;  %v5526_v31 = vunpack.i.h.bf16 %v5524_v19  ;;  %v5525_v24 = vunpack.i.l.bf16 %v5524_v19  ;;  %v5744_v40 = vld [vmem:[%s7891_s9 + $0x18] sm:$0xff]   ;;  %v5745_v18 = vld [vmem:[%s7891_s9 + $0x60] sm:$0xff]  }
 0x65e   : > { %v3882_v42 = vmax.f32 %v3866_v32, 0.0  ;;  %v3884_v27 = vmax.f32 %v3868_v28, 0.0  ;;  %v3883_v34 = vmax.f32 %v3867_v20, 0.0  ;;  %v3885_v57 = vmax.f32 %v3869_v41, 0.0  ;;  %v5746_v32 = vld [vmem:[%s7891_s9 + $0x20] sm:$0xff]  }
 0x65f   : > { %v3856_v43 = vsel %vm1267_vm8, %v5520_v22, %v5515_v2  ;;  %v3857_v5 = vsel %vm1267_vm8, %v5521_v61, %v5516_v39  ;;  %v3808_v7 = vsel %vm3801_vm4, %v5525_v24, %v5520_v22  ;;  %v3809_v49 = vsel %vm3801_vm4, %v5526_v31, %v5521_v61  ;;  %v5741_v61 = vld [vmem:[%s7891_s9 + $0x50] sm:$0xff]  }
 0x660   : > { %v3870_v8 = vmax.f32 %v7619_v51, %v3808_v7  ;;  %v3872_v37 = vmax.f32 %v7621_v23, %v3809_v49  ;;  %v3895_v48 = vpack.c.bf16 %v3885_v57, %v3883_v34  ;;  %v3894_v26 = vpack.c.bf16 %v3884_v27, %v3882_v42  ;;  %v5725_v51 = vld [vmem:[%s7889_s7] sm:$0xff]   ;;  %v5742_v22 = vld [vmem:[%s7891_s9 + $0x10] sm:$0xff]   ;;  %v5747_v42 = vld [vmem:[%s7891_s9 + $0x68] sm:$0xff]  }
 0x661   : > { %v3871_v29 = vmax.f32 %v7627_v4, %v3856_v43  ;;  %v3873_v14 = vmax.f32 %v7629_v59, %v3857_v5  ;;  %v5727_v23 = vld [vmem:[%s7890_s8] sm:$0xff]   ;;  %v5728_v4 = vld [vmem:[%s7890_s8 + $0x8] sm:$0xff]   ;;  %v5749_v5 = vld [vmem:[%s7891_s9 + $0x70] sm:$0xff]   ;;  %vm4100_vm8 = vcmask 654336  }
 0x662   : > { %v3886_v58 = vmax.f32 %v3870_v8, 0.0  ;;  %v3888_v0 = vmax.f32 %v3872_v37, 0.0  ;;  %3918 = vmatprep.subr.bf16.mxu1 %v3895_v48  ;;  %v5726_v59 = vld [vmem:[%s7889_s7 + $0x8] sm:$0xff]   ;;  %v5750_v37 = vld [vmem:[%s7891_s9 + $0x30] sm:$0xff]  }
 0x663   : > { %3919 = vmatpush1.bf16.msra.mxu1 %v3894_v26  ;;  %v3887_v60 = vmax.f32 %v3871_v29, 0.0  ;;  %v3889_v45 = vmax.f32 %v3873_v14, 0.0  ;;  %v5748_v27 = vld [vmem:[%s7891_s9 + $0x28] sm:$0xff]  }
 0x664   : > { %v3896_v33 = vpack.c.bf16 %v3888_v0, %v3886_v58 }
 0x665   : > { %v3897_v1 = vpack.c.bf16 %v3889_v45, %v3887_v60  ;;  %v5751_v45 = vld [vmem:[%s7891_s9 + $0x78] sm:$0xff]  }
 0x667   : > { %3920 = vmatprep.subr.bf16.mxu1 %v3897_v1 }
 0x668   : > { %3921 = vmatpush1.bf16.msra.mxu1 %v3896_v33  ;;  %v5752_v33 = vld [vmem:[%s7891_s9 + $0x38] sm:$0xff]  }
 0x669   : > { %4038 = vmatprep.subr.bf16.mxu1 %v5789_v47 }
 0x66b   : > { %4779 = vmatmul.mubr.msk.bf16.vlgmr.msra.gmra.mrb[48].mxu1 %vm2235_vm9, %v5725_v51 }
 0x66c   : > { %3956 = vmatprep.mubr.bf16.mxu1 %v5789_v47  ;;  %4039 = vmatpush1.bf16.msra.mxu1 %v5727_v23  ;;  %v5797_v23 = vmov 0.0  }
 0x66d   : > { %4040 = vmatprep.subr.bf16.mxu1 %v5789_v47  ;;  %4868 = vmatprep.subr.bf16.mxu0 %v5797_v23 }
 0x66e   : > { %4876 = vmatprep.mubr.msk.bf16.mxu0 %vm5798_vm6, %v5797_v23 }
 0x670   : > { %4041 = vmatpush1.bf16.msra.mxu1 %v5728_v4 }
 0x671   : > { %4042 = vmatprep.subr.bf16.mxu1 %v5789_v47 }
 0x673   : > { %4780 = vmatmul.mubr.msk.bf16.gmra.mrb[52].mxu1 %vm2235_vm9, %v5726_v59 }
 0x674   : > { %4043 = vmatpush1.bf16.msra.mxu1 %v5729_v12 }
 0x675   : > { %4044 = vmatprep.subr.bf16.mxu1 %v5789_v47 }
 0x678   : > { %4045 = vmatpush1.bf16.msra.mxu1 %v5730_v35 }
 0x679   : > { %4046 = vmatprep.subr.bf16.mxu1 %v5789_v47 }
 0x67c   : > { %4047 = vmatpush1.bf16.msra.mxu1 %v5731_v15 }
 0x67d   : > { %4048 = vmatprep.subr.bf16.mxu1 %v5789_v47 }
 0x680   : > { %4049 = vmatpush1.bf16.msra.mxu1 %v5732_v10 }
 0x681   : > { %4050 = vmatprep.subr.bf16.mxu1 %v5789_v47 }
 0x684   : > { %4051 = vmatpush1.bf16.msra.mxu1 %v5733_v38 }
 0x685   : > { %4052 = vmatprep.subr.bf16.mxu1 %v5789_v47 }
 0x688   : > { %4053 = vmatpush1.bf16.msra.mxu1 %v5734_v9 }
 0x689   : > { %4054 = vmatprep.subr.bf16.mxu1 %v5789_v47 }
 0x68c   : > { %4055 = vmatpush1.bf16.msra.mxu1 %v5735_v54 }
 0x68d   : > { %4056 = vmatprep.subr.bf16.mxu1 %v5789_v47 }
 0x690   : > { %4057 = vmatpush1.bf16.msra.mxu1 %v5736_v53 }
 0x691   : > { %4824 = vmatprep.subr.bf16.mxu1 %v5737_v46 }
 0x73e   : > { %v3948_v17 = vpop.f32.mrb[48].mxu1 }
 0x73f   : > { %v3950_v3 = vpop.f32.mrb[49].mxu1 }
 0x740   : > { %v3952_v16 = vpop.f32.mrb[50].mxu1 }
 0x741   : > { %v3967_v52 = vpack.c.bf16 %v3952_v16, %v3948_v17  ;;  %v3954_v11 = vpop.f32.mrb[51].mxu1 }
 0x742   : > { %v3968_v62 = vpack.c.bf16 %v3954_v11, %v3950_v3 }
 0x744   : > { %4791 = vmatprep.mubr.msk.bf16.mxu1 %vm4031_vm5, %v3968_v62 }
 0x745   : > { %4071 = vmatmul.mubr.bf16.vlgmr.msra.gmra.mrb[56].mxu1 %v3967_v52 }
 0x746   : > { %v3958_v6 = vpop.f32.mrb[52].mxu1  ;;  %4825 = vmatpush3.bf16.msra.mxu1 %v5738_v56 }
 0x747   : > { %v3960_v25 = vpop.f32.mrb[53].mxu1  ;;  %4826 = vmatprep.subr.bf16.mxu1 %v5739_v36 }
 0x748   : > { %v3962_v13 = vpop.f32.mrb[54].mxu1 }
 0x749   : > { %v3969_v63 = vpack.c.bf16 %v3962_v13, %v3958_v6  ;;  %v3964_v47 = vpop.f32.mrb[55].mxu1 }
 0x74a   : > { %v3970_v44 = vpack.c.bf16 %v3964_v47, %v3960_v25  ;;  %4827 = vmatpush3.bf16.msra.mxu1 %v5740_v21 }
 0x74b   : > { %4828 = vmatprep.subr.bf16.mxu1 %v5741_v61 }
 0x74c   : > { %4792 = vmatprep.mubr.msk.bf16.mxu1 %vm4031_vm5, %v3970_v44 }
 0x74d   : > { %4079 = vmatmul.mubr.bf16.gmra.mrb[60].mxu1 %v3969_v63 }
 0x74e   : > { %4829 = vmatpush3.bf16.msra.mxu1 %v5742_v22 }
 0x74f   : > { %4830 = vmatprep.subr.bf16.mxu1 %v5743_v55 }
 0x752   : > { %4831 = vmatpush3.bf16.msra.mxu1 %v5744_v40 }
 0x753   : > { %4832 = vmatprep.subr.bf16.mxu1 %v5745_v18 }
 0x756   : > { %4833 = vmatpush3.bf16.msra.mxu1 %v5746_v32 }
 0x757   : > { %4834 = vmatprep.subr.bf16.mxu1 %v5747_v42 }
 0x75a   : > { %4835 = vmatpush3.bf16.msra.mxu1 %v5748_v27 }
 0x75b   : > { %4836 = vmatprep.subr.bf16.mxu1 %v5749_v5 }
 0x75e   : > { %4837 = vmatpush3.bf16.msra.mxu1 %v5750_v37 }
 0x75f   : > { %4838 = vmatprep.subr.bf16.mxu1 %v5751_v45 }
 0x762   : > { %4839 = vmatpush3.bf16.msra.mxu1 %v5752_v33 }
 0x763   : > { %4856 = vmatprep.subr.bf16.mxu1 %v5797_v23 }
 0x818   : > { %v7755_v50 = vpop.f32.mrb[56].mxu1 }
 0x819   : > { %v4074_v28 = vpop.f32.mrb[57].mxu1  ;;  %v4088_v30 = vrot.slane %v7755_v50, 1  ;;  %v4092_v19 = vrot.slane %v7755_v50, 2  ;;  %v4096_v41 = vrot.slane %v7755_v50, 3 }
 0x81a   : > { %v4075_v20 = vpop.f32.mrb[58].mxu1 }
 0x81b   : > { %v4105_v39 = vrot.slane %v4075_v20, 1  ;;  %v4109_v2 = vrot.slane %v4075_v20, 2  ;;  %v4113_v31 = vrot.slane %v4075_v20, 3  ;;  %v4077_v24 = vpop.f32.mrb[59].mxu1 }
 0x81d   : > { %v5527_v34 = vpack.i.bf16 %v4105_v39, %v4088_v30  ;;  %v5532_v57 = vpack.i.bf16 %v4109_v2, %v4092_v19  ;;  %v5537_v43 = vpack.i.bf16 %v4113_v31, %v4096_v41 }
 0x81f   : > { %5528 = vrot.lane.b32.xlu1 %v5527_v34, %s5795_s30  ;;  %5533 = vrot.lane.b32.xlu0 %v5532_v57, %s5796_s14 }
 0x820   : > { %v7772_v7 = vpop.f32.mrb[60].mxu1 }
 0x821   : > { %v4082_v49 = vpop.f32.mrb[61].mxu1  ;;  %v4121_v48 = vrot.slane %v7772_v7, 1  ;;  %v4125_v26 = vrot.slane %v7772_v7, 2  ;;  %v4129_v1 = vrot.slane %v7772_v7, 3 }
 0x822   : > { %v7774_v8 = vpop.f32.mrb[62].mxu1 }
 0x823   : > { %v4137_v29 = vrot.slane %v7774_v8, 1  ;;  %v4141_v14 = vrot.slane %v7774_v8, 2  ;;  %5538 = vrot.lane.b32.xlu1 %v5537_v43, %s5786_s19  ;;  %v4085_v58 = vpop.f32.mrb[63].mxu1  ;;  %v4145_v51 = vrot.slane %v7774_v8, 3 }
 0x825   : > { %v5542_v0 = vpack.i.bf16 %v4137_v29, %v4121_v48  ;;  %v5547_v60 = vpack.i.bf16 %v4141_v14, %v4125_v26 }
 0x827   : > { %5543 = vrot.lane.b32.xlu0 %v5542_v0, %s5795_s30  ;;  %5548 = vrot.lane.b32.xlu1 %v5547_v60, %s5796_s14 }
 0x82b   : > { %4130 = vrot.lane.b32.xlu0 %v4129_v1, %s5786_s19  ;;  %4146 = vrot.lane.b32.xlu1 %v4145_v51, %s5786_s19  ;;  %v5753_v1 = vld [vmem:[%s7891_s9 + $0x80] sm:$0xff]  }
 0x891   : > { %v5529_v4 = vpop.permute.xlu1 %5528  ;;  %v5534_v59 = vpop.permute.xlu0 %5533 }
 0x892   : > { %v5531_v12 = vunpack.i.h.bf16 %v5529_v4  ;;  %v5530_v35 = vunpack.i.l.bf16 %v5529_v4  ;;  %v5535_v15 = vunpack.i.l.bf16 %v5534_v59  ;;  %v5536_v9 = vunpack.i.h.bf16 %v5534_v59 }
 0x894   : > { %v4117_v10 = vsel %vm4100_vm8, %v4075_v20, %v5531_v12  ;;  %v4101_v38 = vsel %vm4100_vm8, %v7755_v50, %v5530_v35  ;;  %v4102_v62 = vsel %vm4031_vm5, %v5530_v35, %v5535_v15  ;;  %v4118_v25 = vsel %vm4031_vm5, %v5531_v12, %v5536_v9 }
 0x895   : > { %v4162_v54 = vrot.slane %v4117_v10, 6  ;;  %v4154_v53 = vrot.slane %v4101_v38, 3  ;;  %v5539_v17 = vpop.permute.xlu1 %5538  ;;  %v4168_v52 = vrot.slane %v4117_v10, 1  ;;  %v5754_v10 = vld [vmem:[%s7891_s9 + $0x88] sm:$0xff]  }
 0x896   : > { %v5541_v3 = vunpack.i.h.bf16 %v5539_v17  ;;  %v5540_v16 = vunpack.i.l.bf16 %v5539_v17 }
 0x897   : > { %v4203_v11 = vsel %vm4202_vm10, %v4101_v38, %v4154_v53 }
 0x898   : > { %v4207_v6 = vsel %vm4206_vm11, %v4203_v11, %v4162_v54  ;;  %v4103_v13 = vsel %vm561_vm7, %v4102_v62, %v5540_v16  ;;  %v4119_v63 = vsel %vm561_vm7, %v4118_v25, %v5541_v3  ;;  %v4156_v42 = vrot.slane %v5540_v16, 3  ;;  %v5755_v54 = vld [vmem:[%s7891_s9 + $0x90] sm:$0xff]   ;;  %v5757_v62 = vld [vmem:[%s7893_s11] sm:$0xff]  }
 0x899   : > { %v4155_v47 = vrot.slane %v4103_v13, 3  ;;  %v5544_v44 = vpop.permute.xlu0 %5543  ;;  %v5549_v46 = vpop.permute.xlu1 %5548  ;;  %v4211_v56 = vsel %vm4210_vm12, %v4207_v6, %v4168_v52  ;;  %v4163_v36 = vrot.slane %v4119_v63, 6  ;;  %v4169_v39 = vrot.slane %v4119_v63, 1  ;;  %4869 = vmatpush3.bf16.msra.mxu0 %v5757_v62  ;;  %v5758_v6 = vld [vmem:[%s7893_s11 + $0x8] sm:$0xff]   ;;  %v5759_v25 = vld [vmem:[%s7893_s11 + $0x10] sm:$0xff]  }
 0x89a   : > { %v5546_v21 = vunpack.i.h.bf16 %v5544_v44  ;;  %v5545_v61 = vunpack.i.l.bf16 %v5544_v44  ;;  %v5551_v55 = vunpack.i.h.bf16 %v5549_v46  ;;  %v5550_v40 = vunpack.i.l.bf16 %v5549_v46  ;;  %4870 = vmatprep.subr.bf16.mxu0 %v5797_v23 }
 0x89b   : > { %v4204_v22 = vsel %vm4202_vm10, %v4103_v13, %v4155_v47  ;;  %v4164_v48 = vrot.slane %v5541_v3, 6  ;;  %v4205_v58 = vsel %vm4202_vm10, %v5540_v16, %v4156_v42  ;;  %v4170_v12 = vrot.slane %v5541_v3, 1  ;;  %v5756_v16 = vld [vmem:[%s7891_s9 + $0x98] sm:$0xff]  }
 0x89c   : > { %v4133_v18 = vsel %vm4100_vm8, %v7772_v7, %v5545_v61  ;;  %v4208_v30 = vsel %vm4206_vm11, %v4204_v22, %v4163_v36  ;;  %v4149_v19 = vsel %vm4100_vm8, %v7774_v8, %v5546_v21  ;;  %v4134_v41 = vsel %vm4031_vm5, %v5545_v61, %v5550_v40  ;;  %v5760_v13 = vld [vmem:[%s7893_s11 + $0x18] ss:$0 sps:$4 sm:$0x11]  }
 0x89d   : > { %v4176_v50 = vrot.slane %v4133_v18, 4  ;;  %v4131_v32 = vpop.permute.xlu0 %4130  ;;  %v4147_v28 = vpop.permute.xlu1 %4146  ;;  %v4182_v20 = vrot.slane %v4133_v18, 7  ;;  %v4150_v24 = vsel %vm4031_vm5, %v5546_v21, %v5551_v55  ;;  %v4190_v43 = vrot.slane %v4149_v19, 2  ;;  %4871 = vmatpush3.bf16.msra.mxu0 %v5758_v6  ;;  %v4793_v21 = vld [vmem:[%s7892_s10] ss:$0 sm:$0xff] }
 0x89e   : > { %v4135_v2 = vsel %vm561_vm7, %v4134_v41, %v4131_v32  ;;  %v4151_v57 = vsel %vm561_vm7, %v4150_v24, %v4147_v28  ;;  %v4212_v5 = vsel %vm4210_vm12, %v4208_v30, %v4169_v39  ;;  %v4196_v7 = vrot.slane %v4149_v19, 5  ;;  %4872 = vmatprep.subr.bf16.mxu0 %v5797_v23 }
 0x89f   : > { %v4214_v31 = vsel %vm532_vm3, %v4211_v56, %v4176_v50  ;;  %v4177_v27 = vrot.slane %v4135_v2, 4  ;;  %v4183_v34 = vrot.slane %v4135_v2, 7  ;;  %v4191_v8 = vrot.slane %v4151_v57, 2 }
 0x8a0   : > { %v4217_v37 = vsel %vm515_vm1, %v4214_v31, %v4182_v20  ;;  %v4197_v29 = vrot.slane %v4151_v57, 5  ;;  %v4209_v51 = vsel %vm4206_vm11, %v4205_v58, %v4164_v48  ;;  %v4178_v4 = vrot.slane %v4131_v32, 4 }
 0x8a1   : > { %v4215_v49 = vsel %vm532_vm3, %v4212_v5, %v4177_v27  ;;  %v4220_v14 = vsel %vm498_vm2, %v4217_v37, %v4190_v43  ;;  %v4213_v35 = vsel %vm4210_vm12, %v4209_v51, %v4170_v12  ;;  %v4184_v15 = vrot.slane %v4131_v32, 7  ;;  %4873 = vmatpush3.bf16.msra.mxu0 %v5759_v25 }
 0x8a2   : > { %v4218_v26 = vsel %vm515_vm1, %v4215_v49, %v4183_v34  ;;  %v4223_v60 = vsel %vm481_vm0, %v4220_v14, %v4196_v7  ;;  %v4216_v38 = vsel %vm532_vm3, %v4213_v35, %v4178_v4  ;;  %v4192_v53 = vrot.slane %v4147_v28, 2  ;;  %4874 = vmatprep.subr.bf16.mxu0 %v5797_v23 }
 0x8a3   : > { %v4221_v0 = vsel %vm498_vm2, %v4218_v26, %v4191_v8  ;;  %v4226_v59 = vpack.c.bf16 %v4223_v60, %v4223_v60  ;;  %v4219_v9 = vsel %vm515_vm1, %v4216_v38, %v4184_v15  ;;  %v4198_v3 = vrot.slane %v4147_v28, 5  ;;  %v4815_v28 = vld [vmem:[%s7894_s12] ss:$0 sm:$0xff] }
 0x8a4   : > { %v4224_v45 = vsel %vm481_vm0, %v4221_v0, %v4197_v29  ;;  %v4222_v17 = vsel %vm498_vm2, %v4219_v9, %v4192_v53  ;;  %v4521_v63 = vsel %vm4202_vm10, %v5760_v13, 0 }
 0x8a5   : > { %v4227_v33 = vpack.c.bf16 %v4224_v45, %v4224_v45  ;;  %v4225_v52 = vsel %vm481_vm0, %v4222_v17, %v4198_v3  ;;  %4875 = vmatpush3.bf16.msra.mxu0 %v4521_v63  ;;  %vm4516_vm0 = vcmask 408576  }
 0x8a6   : > { %v4228_v11 = vpack.c.bf16 %v4225_v52, %v4225_v52 }
 0x8a7   : > { %4431 = vmatprep.mubr.bf16.mxu1 %v4227_v33 }
 0x8a8   : > { %4432 = vmatmul.mubr.bf16.vlgmr.msra.gmra.mrb[64].mxu1 %v4226_v59 }
 0x8a9   : > { %4857 = vmatpush3.bf16.msra.mxu1 %v5753_v1  ;;  %4864 = vmatprep.mubr.msk.bf16.mxu1 %vm5798_vm6, %v5797_v23 }
 0x8aa   : > { %4858 = vmatprep.subr.bf16.mxu1 %v5797_v23 }
 0x8ad   : > { %4859 = vmatpush3.bf16.msra.mxu1 %v5754_v10 }
 0x8ae   : > { %4860 = vmatprep.subr.bf16.mxu1 %v5797_v23 }
 0x8b1   : > { %4861 = vmatpush3.bf16.msra.mxu1 %v5755_v54 }
 0x8b2   : > { %4862 = vmatprep.subr.bf16.mxu1 %v5797_v23 }
 0x8b5   : > { %4863 = vmatpush3.bf16.msra.mxu1 %v5756_v16 }
 0x8b8   : > { %4865 = vmatmul.mubr.msk.bf16.vlgmr.msra.gmra.mrb[68].mxu1 %vm2235_vm9, %v4228_v11 }
 0x97b   : > { %v4840_v47 = vpop.f32.mrb[64].mxu1 }
 0x97c   : > { %v4841_v44 = vpop.f32.mrb[65].mxu1 }
 0x97d   : > { %v4842_v46 = vadd.f32 %v4841_v44, %v4840_v47  ;;  %v4843_v56 = vpop.f32.mrb[66].mxu1 }
 0x97e   : > { %v4844_v36 = vpop.f32.mrb[67].mxu1 }
 0x97f   : > { %v4434_v61 = vadd.f32 %v4842_v46, %v4793_v21 }
 0x98b   : > { %v4473_v23 = vpop.f32.mrb[68].mxu1 }
 0x98c   : > { %v4474_v22 = vadd.f32 %v4473_v23, %v4434_v61  ;;  %v4866_v55 = vpop.f32.mrb[69].mxu1 }
 0x98d   : > { %v4476_v40 = vpop.f32.mrb[70].mxu1 }
 0x98e   : > { %v4479_v18 = vmax.f32 %v4474_v22, 0.0  ;;  %v4867_v50 = vpop.f32.mrb[71].mxu1 }
 0x990   : > { %v4480_v32 = vpack.c.bf16 %v4479_v18, %v4479_v18 }
 0x992   : > { %4877 = vmatmul.mubr.msk.bf16.vlgmr.msra.gmra.mrb[64].mxu0 %vm4516_vm0, %v4480_v32 }
 0xa65   : > { %v4557_v30 = vpop.f32.mrb[64].mxu0 }
 0xa66   : > { %v4558_v19 = vadd.f32 %v4815_v28, %v4557_v30  ;;  %v4878_v20 = vpop.f32.mrb[65].mxu0 }
 0xa67   : > { %v4560_v41 = vpop.f32.mrb[66].mxu0 }
 0xa68   : > { %4563 = vst [vmem:[%s443_s24] sm:$0xff] %v4558_v19  ;;  %v4879_v39 = vpop.f32.mrb[67].mxu0 }
 0xa69 PF: > { %s23_s25 = sadd.s32 1, %s5781_s25  }
 0xa6a   : > { %p20_p5 = scmp.ge.s32.totalorder %s23_s25, 4  }
 0xa6c   :  { %22 = sbr.rel (!%p20_p5) target bundleno = 1 (0x1), region = 102 }

</bundles_post_ra>
